<compile_context>
chip_gen: v5e
topology: v5e:2x2
jax: 0.10.0
libtpu: 0.0.40
codegen_flags: <defaults>
</compile_context>

<pallas_src>
from collections import OrderedDict

import jax
import jax.numpy as jnp
from jax.experimental import pallas as pl
from jax.experimental.pallas import tpu as pltpu


# ----------------------------------------------------------------------------
# Exceptions (mirroring the PyTorch module)
# ----------------------------------------------------------------------------
class InfError(Exception):
    pass


class NaNError(Exception):
    pass


LANE = 128               # TPU lane width; K and Cout are padded to this
_CHECK_TILE_ROWS = 512   # rows (of 128 lanes) per check-kernel grid step


# ----------------------------------------------------------------------------
# Pallas kernels
# ----------------------------------------------------------------------------
def _fused_conv_relu_check_kernel(a_ref, w_ref, b_ref, conv_ref, y_ref, flag_ref):
    """Conv-as-matmul + bias + ReLU + packed NaN/Inf flags.

    flag bits: x_nan<<5 | x_inf<<4 | conv_nan<<3 | conv_inf<<2 | y_nan<<1 | y_inf
    (x is checked through the im2col matrix A, which contains every element of
    x at least once -- the 3x3 center tap -- plus zero padding only.)
    """
    a = a_ref[...]                                                   # bf16 [M, 128]
    acc = jnp.dot(a, w_ref[...], preferred_element_type=jnp.float32)  # MXU, f32 acc
    conv = acc + b_ref[...]                                          # bias broadcast
    y = jnp.maximum(conv, 0.0)                                       # fused ReLU
    conv_ref[...] = conv                                             # lane-dense stores
    y_ref[...] = y

    def _flags(v):
        nan = jnp.max(jnp.isnan(v).astype(jnp.int32), axis=(0, 1), keepdims=True)
        inf = jnp.max(jnp.isinf(v).astype(jnp.int32), axis=(0, 1), keepdims=True)
        return nan, inf

    x_nan, x_inf = _flags(a)
    c_nan, c_inf = _flags(conv)
    y_nan, y_inf = _flags(y)
    flag_ref[...] = (x_nan * 32 + x_inf * 16 + c_nan * 8 + c_inf * 4
                     + y_nan * 2 + y_inf)


def _check_kernel(x_ref, flag_ref):
    """Grid-tiled NaN/Inf reduction; flag bits nan<<1 | inf, OR-accumulated."""
    @pl.when(pl.program_id(0) == 0)
    def _():
        flag_ref[...] = jnp.zeros_like(flag_ref)

    x = x_ref[...]
    nan = jnp.max(jnp.isnan(x).astype(jnp.int32), axis=(0, 1), keepdims=True)
    inf = jnp.max(jnp.isinf(x).astype(jnp.int32), axis=(0, 1), keepdims=True)
    flag_ref[...] = flag_ref[...] | (nan * 2 + inf)


# ----------------------------------------------------------------------------
# Pallas wrappers
# ----------------------------------------------------------------------------
def fused_conv_relu_check(a, w, b):
    """a[M,128] bf16, w[128,128] bf16, b[1,128] f32 -> (conv, relu, packed flags)."""
    m = a.shape[0]
    cout_pad = w.shape[1]
    return pl.pallas_call(
        _fused_conv_relu_check_kernel,
        out_shape=(
            jax.ShapeDtypeStruct((m, cout_pad), jnp.float32),
            jax.ShapeDtypeStruct((m, cout_pad), jnp.float32),
            jax.ShapeDtypeStruct((1, 1), jnp.int32),
        ),
    )(a, w, b)


def pallas_nan_inf_flags(x, tile_rows=_CHECK_TILE_ROWS):
    """Packed int32 (nan<<1 | inf) flag for `x` as a (1,1) DEVICE array (no host sync)."""
    flat = jnp.asarray(x, jnp.float32).reshape(-1)
    n = flat.shape[0]
    rows = max(8, -(-n // LANE))          # cdiv, at least one (8,128) tile
    rows = ((rows + 7) // 8) * 8
    tm = min(tile_rows, rows)             # multiple of 8 by construction
    rows = ((rows + tm - 1) // tm) * tm   # grid divides evenly
    total = rows * LANE
    if total != n:
        # zeros are neither NaN nor Inf, so padding never creates false positives
        flat = jnp.concatenate([flat, jnp.zeros((total - n,), jnp.float32)])
    mat = flat.reshape(rows, LANE)
    return pl.pallas_call(
        _check_kernel,
        out_shape=jax.ShapeDtypeStruct((1, 1), jnp.int32),
        grid_spec=pltpu.PrefetchScalarGridSpec(
            num_scalar_prefetch=0,
            grid=(rows // tm,),
            in_specs=[pl.BlockSpec((tm, LANE), lambda i: (i, 0))],
            out_specs=pl.BlockSpec((1, 1), lambda i: (0, 0)),
        ),
        compiler_params=pltpu.CompilerParams(
            dimension_semantics=("arbitrary",)),   # reduction axis
    )(mat)


# ----------------------------------------------------------------------------
# Synthetic model wrapped by the Debugger: Conv2d(4,8,3,pad=1) + ReLU
# ----------------------------------------------------------------------------
class SmallConvReLU:
    def __init__(self, cin=4, cout=8, k=3, key=jax.random.PRNGKey(42)):
        kw, kb = jax.random.split(key)
        fan_in = cin * k * k
        bound = 1.0 / (fan_in ** 0.5)
        # Deterministic synthetic parameters (PyTorch Conv2d default-init shapes)
        self.weight = jax.random.uniform(kw, (cout, cin, k, k), jnp.float32, -bound, bound)
        self.bias = jax.random.uniform(kb, (cout,), jnp.float32, -bound, bound)
        self.cin, self.cout, self.k = cin, cout, k
        # named_modules() of nn.Sequential(conv, relu):  '', 'conv', 'relu'
        self.module_names = ["", "conv", "relu"]
        # Pre-padded bf16 parameters (K 36->128, Cout 8->128: lane-dense MXU tiles)
        K = cin * k * k
        w2d = self.weight.reshape(cout, K).T                          # [K, Cout]
        self._w_pad = jnp.pad(w2d, ((0, LANE - K), (0, LANE - cout))).astype(jnp.bfloat16)
        self._b_pad = jnp.pad(self.bias.reshape(1, cout), ((0, 0), (0, LANE - cout)))

    def forward_with_hooks(self, x):
        """Forward pass; returns (y, hook records, deferred per-tensor NaN/Inf flags)."""
        N, C, H, W = x.shape
        k, pad = self.k, self.k // 2
        xp = jnp.pad(x, ((0, 0), (0, 0), (pad, pad), (pad, pad)))
        # im2col -> A[M, K], K ordered as (cin, kh, kw) to match weight layout
        patches = []
        for i in range(k):
            for j in range(k):
                patches.append(xp[:, :, i:i + H, j:j + W])            # [N, C, H, W]
        a = jnp.stack(patches, axis=2)                                # [N, C, k*k, H, W]
        a = a.transpose(0, 3, 4, 1, 2).reshape(N * H * W, C * k * k)
        M, K = a.shape
        M_pad = ((M + 7) // 8) * 8
        a = jnp.pad(a, ((0, M_pad - M), (0, LANE - K))).astype(jnp.bfloat16)

        # Single fused Pallas call: matmul + bias + ReLU + all NaN/Inf flags
        conv_flat, y_flat, flags = fused_conv_relu_check(a, self._w_pad, self._b_pad)

        # One deferred NHWC->NCHW transpose per tensor, at the very end
        conv_nchw = conv_flat[:M, :self.cout].reshape(N, H, W, self.cout).transpose(0, 3, 1, 2)
        y_nchw = y_flat[:M, :self.cout].reshape(N, H, W, self.cout).transpose(0, 3, 1, 2)

        records = [
            ("conv", (x,), conv_nchw),
            ("relu", (conv_nchw,), y_nchw),
            ("", (x,), y_nchw),
        ]
        # Deferred flags: id(tensor) -> (packed device flag word, bit shift of its
        # 2-bit (nan<<1|inf) field).  No host sync here.
        deferred = {
            id(x): (flags, 4),
            id(conv_nchw): (flags, 2),
            id(y_nchw): (flags, 0),
        }
        return y_nchw, records, deferred


# ----------------------------------------------------------------------------
# Debugger (forward == wrapped model's forward; __call__ adds NaN/Inf checks)
# ----------------------------------------------------------------------------
class Debugger:
    def __init__(self, model, raise_exception):
        self.model = model
        self.hookN = model.module_names
        self.raise_exception = raise_exception
        self._records = []
        self._deferred = {}
        self._flag_cache = {}
        self.isnan = False
        self.isinf = False

    def forward(self, *inputs, **kwargs):
        y, records, deferred = self.model.forward_with_hooks(*inputs, **kwargs)
        self._records = records
        self._deferred = deferred
        return y

    def _resolve_flags(self):
        """Single batched device->host readback of all unique packed flag words."""
        arrays, index_of = [], {}
        for arr, _ in self._deferred.values():
            key = id(arr)
            if key not in index_of:
                index_of[key] = len(arrays)
                arrays.append(arr.reshape(-1)[:1])
        host = jax.device_get(jnp.concatenate(arrays)) if arrays else []
        cache = {}
        for tid, (arr, shift) in self._deferred.items():
            packed = int(host[index_of[id(arr)]]) >> shift
            cache[tid] = (bool((packed >> 1) & 1), bool(packed & 1))
        self._flag_cache = cache

    def check_fault(self, inp, which):
        """which in {'nan','inf'}; inp is an array or tuple/list of arrays."""
        idx = 0 if which == "nan" else 1

        def one(t):
            tid = id(t)
            if tid not in self._flag_cache:
                # Fallback: one grid-tiled check kernel computes BOTH flags; cached.
                packed = int(jax.device_get(pallas_nan_inf_flags(t))[0, 0])
                self._flag_cache[tid] = (bool((packed >> 1) & 1), bool(packed & 1))
            return self._flag_cache[tid][idx]

        if isinstance(inp, (list, tuple)):
            found = False
            for t in inp:
                found = found or one(t)
            return found
        return one(inp)

    def _assertF(self, records, which, mode):
        assert mode in ["fwd", "bwd"]
        result = OrderedDict()
        for name, inp, out in records:
            result = OrderedDict()  # quirk preserved from the original implementation
            inpF = self.check_fault(inp, which)
            optF = self.check_fault(out, which)
            if inpF or optF:
                result[name] = {mode: {"inp": inpF, "opt": optF}}
        return result

    def _printsing(self, dic, value, mode):
        print("Detected %s values:" % value)
        for key in dic:
            r = dic[key][mode]
            print("Layer: " + key + ".Input " + mode + ": %s. Output " % r["inp"]
                  + mode + ": %s " % r["opt"])

    def assertnan(self, records, mode):
        result = self._assertF(records, "nan", mode)
        self.isnan = bool(result)
        return result

    def assertinf(self, records, mode):
        result = self._assertF(records, "inf", mode)
        self.isinf = bool(result)
        return result

    def __call__(self, *args, **kwargs):
        result = self.forward(*args, **kwargs)
        self._resolve_flags()  # one batched host sync for all NaN/Inf flags
        nan_dic = self.assertnan(self._records, "fwd")
        inf_dic = self.assertinf(self._records, "fwd")
        if self.isnan:
            self._printsing(nan_dic, "NaN", "fwd")
            if self.raise_exception:
                raise NaNError("NaN found while processing this sample.")
            # NOTE: the nested `isnan` re-test and the InfError message below
            # mirror quirks of the original reference implementation on purpose.
            if self.isnan:
                self._printsing(inf_dic, "Inf", "fwd")
                if self.raise_exception:
                    raise InfError("NaN found while processing this sample.")
        return result


# ----------------------------------------------------------------------------
# Main
# ----------------------------------------------------------------------------
if __name__ == "__main__":
    key = jax.random.PRNGKey(0)
    x = jax.random.normal(key, (2, 4, 16, 16), jnp.float32)  # NCHW

    model = SmallConvReLU(cin=4, cout=8, k=3)
    debugger = Debugger(model, raise_exception=True)

    y = debugger(x)
    y = jax.block_until_ready(y)

    # reference check of the wrapped model's forward (conv + relu)
    ref = jax.lax.conv_general_dilated(
        x, model.weight, window_strides=(1, 1), padding="SAME",
        dimension_numbers=("NCHW", "OIHW", "NCHW"),
    ) + model.bias.reshape(1, -1, 1, 1)
    ref = jnp.maximum(ref, 0.0)
    assert y.shape == (2, 8, 16, 16)
    assert jnp.allclose(y, ref, atol=5e-2, rtol=5e-2), float(jnp.max(jnp.abs(y - ref)))
    assert debugger.isnan is False and debugger.isinf is False

    # standalone grid-tiled check kernel: negative + positive coverage
    clean = jnp.ones((1000, 300), jnp.float32)  # 2344 rows of 128 -> multi-step grid
    assert int(jax.device_get(pallas_nan_inf_flags(clean))[0, 0]) == 0
    bad = clean.at[123, 45].set(jnp.nan).at[777, 7].set(jnp.inf)
    assert int(jax.device_get(pallas_nan_inf_flags(bad))[0, 0]) == 3  # nan|inf

    print("KERNEL_OK")
</pallas_src>

<mosaic_0001>
module attributes {stable_mosaic.version = 11 : i64} {
  func.func @_fused_conv_relu_check_kernel(%arg0: memref<512x128xbf16, #tpu.memory_space<vmem>>, %arg1: memref<128x128xbf16, #tpu.memory_space<vmem>>, %arg2: memref<1x128xf32, #tpu.memory_space<vmem>>, %arg3: memref<512x128xf32, #tpu.memory_space<vmem>>, %arg4: memref<512x128xf32, #tpu.memory_space<vmem>>, %arg5: memref<1x1xi32, #tpu.memory_space<vmem>>) attributes {dimension_semantics = [], scalar_prefetch = 0 : i64, scratch_operands = 0 : i64, tpu.core_type = #tpu.core_type<tc>} {
    %c0 = arith.constant 0 : index
    %c0_0 = arith.constant 0 : index
    %0 = vector.load %arg0[%c0, %c0_0] : memref<512x128xbf16, #tpu.memory_space<vmem>>, vector<512x128xbf16>
    %c0_1 = arith.constant 0 : index
    %c0_2 = arith.constant 0 : index
    %1 = vector.load %arg1[%c0_1, %c0_2] : memref<128x128xbf16, #tpu.memory_space<vmem>>, vector<128x128xbf16>
    %cst = arith.constant dense<0.000000e+00> : vector<512x128xf32>
    %2 = tpu.matmul %0, %1, %cst {dimension_numbers = #tpu.dot_dimension_numbers<[1], [0], [0], [1], [0, 0, 1, 1], [], []>} : vector<512x128xbf16>, vector<128x128xbf16>, vector<512x128xf32> -> vector<512x128xf32>
    %c0_3 = arith.constant 0 : index
    %c0_4 = arith.constant 0 : index
    %3 = vector.load %arg2[%c0_3, %c0_4] : memref<1x128xf32, #tpu.memory_space<vmem>>, vector<1x128xf32>
    %4 = vector.broadcast %3 : vector<1x128xf32> to vector<512x128xf32>
    %5 = arith.addf %2, %4 : vector<512x128xf32>
    %cst_5 = arith.constant 0.000000e+00 : f32
    %6 = vector.broadcast %cst_5 : f32 to vector<512x128xf32>
    %7 = arith.maximumf %5, %6 : vector<512x128xf32>
    %c0_6 = arith.constant 0 : index
    %c0_7 = arith.constant 0 : index
    %8 = vector.load %arg3[%c0_6, %c0_7] : memref<512x128xf32, #tpu.memory_space<vmem>>, vector<512x128xf32>
    tpu.vector_store %arg3[%c0_6, %c0_7], %5 {strides = array<i32>} : memref<512x128xf32, #tpu.memory_space<vmem>>, vector<512x128xf32>,
    %c0_8 = arith.constant 0 : index
    %c0_9 = arith.constant 0 : index
    %9 = vector.load %arg4[%c0_8, %c0_9] : memref<512x128xf32, #tpu.memory_space<vmem>>, vector<512x128xf32>
    tpu.vector_store %arg4[%c0_8, %c0_9], %7 {strides = array<i32>} : memref<512x128xf32, #tpu.memory_space<vmem>>, vector<512x128xf32>,
    %10 = arith.cmpf one, %0, %0 : vector<512x128xbf16>
    %11 = arith.extui %10 : vector<512x128xi1> to vector<512x128xi32>
    %12 = vector.shape_cast %11 : vector<512x128xi32> to vector<1x512x128xi32>
    %cst_10 = arith.constant dense<-2147483648> : vector<1xi32>
    %13 = vector.multi_reduction <maxsi>, %12, %cst_10 [1, 2] : vector<1x512x128xi32> to vector<1xi32>
    %14 = vector.shape_cast %13 : vector<1xi32> to vector<1x1x1xi32>
    %15 = vector.extract %14[0, 0, 0] : i32 from vector<1x1x1xi32>
    %16 = vector.broadcast %15 : i32 to vector<1x1xi32>
    %17 = math.absf %0 : vector<512x128xbf16>
    %cst_11 = arith.constant 0x7F80 : bf16
    %18 = vector.broadcast %cst_11 : bf16 to vector<512x128xbf16>
    %19 = arith.cmpf oeq, %17, %18 : vector<512x128xbf16>
    %20 = arith.extui %19 : vector<512x128xi1> to vector<512x128xi32>
    %21 = vector.shape_cast %20 : vector<512x128xi32> to vector<1x512x128xi32>
    %cst_12 = arith.constant dense<-2147483648> : vector<1xi32>
    %22 = vector.multi_reduction <maxsi>, %21, %cst_12 [1, 2] : vector<1x512x128xi32> to vector<1xi32>
    %23 = vector.shape_cast %22 : vector<1xi32> to vector<1x1x1xi32>
    %24 = vector.extract %23[0, 0, 0] : i32 from vector<1x1x1xi32>
    %25 = vector.broadcast %24 : i32 to vector<1x1xi32>
    %26 = arith.cmpf one, %5, %5 : vector<512x128xf32>
    %27 = arith.extui %26 : vector<512x128xi1> to vector<512x128xi32>
    %28 = vector.shape_cast %27 : vector<512x128xi32> to vector<1x512x128xi32>
    %cst_13 = arith.constant dense<-2147483648> : vector<1xi32>
    %29 = vector.multi_reduction <maxsi>, %28, %cst_13 [1, 2] : vector<1x512x128xi32> to vector<1xi32>
    %30 = vector.shape_cast %29 : vector<1xi32> to vector<1x1x1xi32>
    %31 = vector.extract %30[0, 0, 0] : i32 from vector<1x1x1xi32>
    %32 = vector.broadcast %31 : i32 to vector<1x1xi32>
    %33 = math.absf %5 : vector<512x128xf32>
    %cst_14 = arith.constant 0x7F800000 : f32
    %34 = vector.broadcast %cst_14 : f32 to vector<512x128xf32>
    %35 = arith.cmpf oeq, %33, %34 : vector<512x128xf32>
    %36 = arith.extui %35 : vector<512x128xi1> to vector<512x128xi32>
    %37 = vector.shape_cast %36 : vector<512x128xi32> to vector<1x512x128xi32>
    %cst_15 = arith.constant dense<-2147483648> : vector<1xi32>
    %38 = vector.multi_reduction <maxsi>, %37, %cst_15 [1, 2] : vector<1x512x128xi32> to vector<1xi32>
    %39 = vector.shape_cast %38 : vector<1xi32> to vector<1x1x1xi32>
    %40 = vector.extract %39[0, 0, 0] : i32 from vector<1x1x1xi32>
    %41 = vector.broadcast %40 : i32 to vector<1x1xi32>
    %42 = arith.cmpf one, %7, %7 : vector<512x128xf32>
    %43 = arith.extui %42 : vector<512x128xi1> to vector<512x128xi32>
    %44 = vector.shape_cast %43 : vector<512x128xi32> to vector<1x512x128xi32>
    %cst_16 = arith.constant dense<-2147483648> : vector<1xi32>
    %45 = vector.multi_reduction <maxsi>, %44, %cst_16 [1, 2] : vector<1x512x128xi32> to vector<1xi32>
    %46 = vector.shape_cast %45 : vector<1xi32> to vector<1x1x1xi32>
    %47 = vector.extract %46[0, 0, 0] : i32 from vector<1x1x1xi32>
    %48 = vector.broadcast %47 : i32 to vector<1x1xi32>
    %49 = math.absf %7 : vector<512x128xf32>
    %cst_17 = arith.constant 0x7F800000 : f32
    %50 = vector.broadcast %cst_17 : f32 to vector<512x128xf32>
    %51 = arith.cmpf oeq, %49, %50 : vector<512x128xf32>
    %52 = arith.extui %51 : vector<512x128xi1> to vector<512x128xi32>
    %53 = vector.shape_cast %52 : vector<512x128xi32> to vector<1x512x128xi32>
    %cst_18 = arith.constant dense<-2147483648> : vector<1xi32>
    %54 = vector.multi_reduction <maxsi>, %53, %cst_18 [1, 2] : vector<1x512x128xi32> to vector<1xi32>
    %55 = vector.shape_cast %54 : vector<1xi32> to vector<1x1x1xi32>
    %56 = vector.extract %55[0, 0, 0] : i32 from vector<1x1x1xi32>
    %57 = vector.broadcast %56 : i32 to vector<1x1xi32>
    %c32_i32 = arith.constant 32 : i32
    %58 = vector.broadcast %c32_i32 : i32 to vector<1x1xi32>
    %59 = arith.muli %16, %58 : vector<1x1xi32>
    %c16_i32 = arith.constant 16 : i32
    %60 = vector.broadcast %c16_i32 : i32 to vector<1x1xi32>
    %61 = arith.muli %25, %60 : vector<1x1xi32>
    %62 = arith.addi %59, %61 : vector<1x1xi32>
    %c8_i32 = arith.constant 8 : i32
    %63 = vector.broadcast %c8_i32 : i32 to vector<1x1xi32>
    %64 = arith.muli %32, %63 : vector<1x1xi32>
    %65 = arith.addi %62, %64 : vector<1x1xi32>
    %c4_i32 = arith.constant 4 : i32
    %66 = vector.broadcast %c4_i32 : i32 to vector<1x1xi32>
    %67 = arith.muli %41, %66 : vector<1x1xi32>
    %68 = arith.addi %65, %67 : vector<1x1xi32>
    %c2_i32 = arith.constant 2 : i32
    %69 = vector.broadcast %c2_i32 : i32 to vector<1x1xi32>
    %70 = arith.muli %48, %69 : vector<1x1xi32>
    %71 = arith.addi %68, %70 : vector<1x1xi32>
    %72 = arith.addi %71, %57 : vector<1x1xi32>
    %c0_19 = arith.constant 0 : index
    %c0_20 = arith.constant 0 : index
    %73 = vector.load %arg5[%c0_19, %c0_20] : memref<1x1xi32, #tpu.memory_space<vmem>>, vector<1x1xi32>
    tpu.vector_store %arg5[%c0_19, %c0_20], %72 {strides = array<i32>} : memref<1x1xi32, #tpu.memory_space<vmem>>, vector<1x1xi32>,
    return
  }
}

</mosaic_0001>

<bundles_post_ra>
// kernel: tpu_custom_call.1
= control target key start
LH: loop header
LB: loop body
LE: loop exit
PB: predicated region body
PF: predicated region fallthrough
CT: control target
= control target key end

     0   :  { %11 = vsyncpa [#allocation3], 0  ;;  %s7758_s0 = inlined_call_operand.hbm [shape: bf16[512,128], index: 0, kind: input, shape index: {}]   ;;  %s7759_s1 = inlined_call_operand.hbm [shape: bf16[128,128], index: 1, kind: input, shape index: {}]   ;;  %s7760_s2 = inlined_call_operand.vmem [shape: f32[1,128], index: 2, kind: input, shape index: {}]   ;;  %s7761_s3 = inlined_call_operand.hbm [shape: f32[512,128], index: 3, kind: output, shape index: {0}]   ;;  %s7762_s4 = inlined_call_operand.hbm [shape: f32[512,128], index: 4, kind: output, shape index: {1}]   ;;  %s7763_s5 = inlined_call_operand.hbm [shape: s32[1,1], index: 5, kind: output, shape index: {2}]  }
   0x1   :  { %12 = vsyncpa [#allocation6], 0 }
   0x2   :  { %13 = vsyncpa [#allocation4], 0 }
   0x3   :  { %14 = vsyncpa [#allocation9], 0  ;;  %s19_s20 = sshll.u32 %s7758_s0, 4  ;;  %s3239_s21 = smov [#allocation2]   ;;  %s20_s20 = int_to_ptr.hbm [resolvable:$true] %s19_s20 }
   0x4   :  { %s21_s22 = sshll.u32 %s3239_s21, 4  ;;  %s32_s25 = sshll.u32 %s7759_s1, 4  ;;  %s22_s22 = int_to_ptr.vmem [resolvable:$true] %s21_s22  ;;  %s33_s25 = int_to_ptr.hbm [resolvable:$true] %s32_s25 }
   0x5   :  { %s3240_s26 = smov 64   ;;  %s3241_s27 = smov 4  }
   0x6   :  { %27 = dma.hbm_to_vmem [thread:$0]  %s20_s20, 4096, %s22_s22, [#allocation3], %s3240_s26, %s3240_s26, %s3241_s27  }
   0x7   :  { %s3242_s28 = smov [#allocation5]  }
   0x8   :  { %s34_s29 = sshll.u32 %s3242_s28, 4  ;;  %s35_s29 = int_to_ptr.vmem [resolvable:$true] %s34_s29 }
   0x9   :  { %40 = dma.hbm_to_vmem [thread:$0]  %s33_s25, 1024, %s35_s29, [#allocation6], %s3240_s26, %s3240_s26, %s3241_s27  }
   0xa   :  { %3231 = dma.done.wait [#allocation3], 4096  }
   0xb   :  { %3232 = vsyncadd [#allocation3], 4294963200 }
   0xc   :  { %3233 = dma.done.wait [#allocation6], 1024  }
   0xd   :  { %3234 = vsyncadd [#allocation6], 4294966272  ;;  %v2994_v0 = vld [vmem:[#allocation5 + $0x38] sm:$0xff]  ;;  %v2993_v1 = vld [vmem:[#allocation5 + $0x30] sm:$0xff]  ;;  %s2761_s12 = sshll.u32 %s7762_s4, 4  ;;  %s3244_s13 = smov [#allocation8]   ;;  %s2762_s12 = int_to_ptr.hbm [resolvable:$true] %s2761_s12 }
   0xe   :  { %375 = vmatpush.bf16.msra.mxu0 %v2994_v0  ;;  %2995 = vmatpush.bf16.msra.mxu1 %v2994_v0  ;;  %v2992_v2 = vld [vmem:[#allocation5 + $0x28] sm:$0xff]  ;;  %v2991_v3 = vld [vmem:[#allocation5 + $0x20] sm:$0xff]  ;;  %v2990_v4 = vld [vmem:[#allocation5 + $0x18] sm:$0xff]  ;;  %s2759_s14 = sshll.u32 %s3244_s13, 4  ;;  %s2748_s17 = sshll.u32 %s7761_s3, 4  ;;  %s2760_s14 = int_to_ptr.vmem [resolvable:$true] %s2759_s14  ;;  %s2749_s17 = int_to_ptr.hbm [resolvable:$true] %s2748_s17 }
   0xf   :  { %2996 = vmatpush.bf16.msra.mxu2 %v2994_v0  ;;  %2997 = vmatpush.bf16.msra.mxu3 %v2994_v0  ;;  %v2989_v5 = vld [vmem:[#allocation5 + $0x10] sm:$0xff]  ;;  %v2988_v6 = vld [vmem:[#allocation5 + $0x8] sm:$0xff]  ;;  %v2987_v7 = vld [vmem:[#allocation5] sm:$0xff]  ;;  %s3245_s18 = smov 128   ;;  %s3246_s19 = smov 8  }
  0x10   :  { %v2955_v8 = vld [vmem:[#allocation2] sm:$0xff]  ;;  %v2956_v12 = vld [vmem:[#allocation2 + $0x8] sm:$0xff]  ;;  %v2957_v16 = vld [vmem:[#allocation2 + $0x10] sm:$0xff]  ;;  %s3247_s20 = smov [#allocation7]   ;;  %s3248_s25 = smov [#allocation10]  }
  0x11   :  { %v2963_v9 = vld [vmem:[#allocation2 + $0x40] sm:$0xff]  ;;  %v2964_v13 = vld [vmem:[#allocation2 + $0x48] sm:$0xff]  ;;  %v2965_v17 = vld [vmem:[#allocation2 + $0x50] sm:$0xff]  ;;  %s2746_s21 = sshll.u32 %s3247_s20, 4  ;;  %s2773_s26 = sshll.u32 %s3248_s25, 4  ;;  %s2747_s21 = int_to_ptr.vmem [resolvable:$true] %s2746_s21  ;;  %s2774_s26 = int_to_ptr.vmem [resolvable:$true] %s2773_s26 }
  0x12   :  { %376 = vmatpush.bf16.msra.mxu0 %v2993_v1  ;;  %2998 = vmatpush.bf16.msra.mxu1 %v2993_v1  ;;  %v2971_v10 = vld [vmem:[#allocation2 + $0x80] sm:$0xff]  ;;  %v2972_v14 = vld [vmem:[#allocation2 + $0x88] sm:$0xff]  ;;  %v2973_v18 = vld [vmem:[#allocation2 + $0x90] sm:$0xff]  ;;  %s2775_s29 = sshll.u32 %s7763_s5, 4  ;;  %s2776_s29 = int_to_ptr.hbm [resolvable:$true] %s2775_s29 }
  0x13   :  { %2999 = vmatpush.bf16.msra.mxu2 %v2993_v1  ;;  %3000 = vmatpush.bf16.msra.mxu3 %v2993_v1  ;;  %v2979_v11 = vld [vmem:[#allocation2 + $0xc0] sm:$0xff]  ;;  %v2980_v15 = vld [vmem:[#allocation2 + $0xc8] sm:$0xff]  ;;  %v2981_v19 = vld [vmem:[#allocation2 + $0xd0] sm:$0xff] }
  0x14   :  { %v2958_v20 = vld [vmem:[#allocation2 + $0x18] sm:$0xff]  ;;  %v2959_v24 = vld [vmem:[#allocation2 + $0x20] sm:$0xff]  ;;  %v2960_v28 = vld [vmem:[#allocation2 + $0x28] sm:$0xff] }
  0x15   :  { %v2966_v21 = vld [vmem:[#allocation2 + $0x58] sm:$0xff]  ;;  %v2967_v25 = vld [vmem:[#allocation2 + $0x60] sm:$0xff]  ;;  %v2968_v29 = vld [vmem:[#allocation2 + $0x68] sm:$0xff] }
  0x16   :  { %377 = vmatpush.bf16.msra.mxu0 %v2992_v2  ;;  %3001 = vmatpush.bf16.msra.mxu1 %v2992_v2  ;;  %v2974_v22 = vld [vmem:[#allocation2 + $0x98] sm:$0xff]  ;;  %v2975_v26 = vld [vmem:[#allocation2 + $0xa0] sm:$0xff]  ;;  %v2976_v30 = vld [vmem:[#allocation2 + $0xa8] sm:$0xff] }
  0x17   :  { %3002 = vmatpush.bf16.msra.mxu2 %v2992_v2  ;;  %3003 = vmatpush.bf16.msra.mxu3 %v2992_v2  ;;  %v2982_v23 = vld [vmem:[#allocation2 + $0xd8] sm:$0xff]  ;;  %v2983_v27 = vld [vmem:[#allocation2 + $0xe0] sm:$0xff]  ;;  %v2984_v31 = vld [vmem:[#allocation2 + $0xe8] sm:$0xff] }
  0x18   :  { %v2961_v32 = vld [vmem:[#allocation2 + $0x30] sm:$0xff]  ;;  %v2962_v36 = vld [vmem:[#allocation2 + $0x38] sm:$0xff]  ;;  %v3285_v40 = vld [vmem:[#allocation2] sm:$0xf] }
  0x19   :  { %v2969_v33 = vld [vmem:[#allocation2 + $0x70] sm:$0xff]  ;;  %v2970_v37 = vld [vmem:[#allocation2 + $0x78] sm:$0xff]  ;;  %v3287_v41 = vld [vmem:[#allocation2 + $0x4] sm:$0xf]  ;;  %v736_v62 = vunpack.c.l.bf16 %v3285_v40 }
  0x1a   :  { %378 = vmatpush.bf16.msra.mxu0 %v2991_v3  ;;  %3004 = vmatpush.bf16.msra.mxu1 %v2991_v3  ;;  %v2977_v34 = vld [vmem:[#allocation2 + $0xb0] sm:$0xff]  ;;  %v2978_v38 = vld [vmem:[#allocation2 + $0xb8] sm:$0xff]  ;;  %v3289_v42 = vld [vmem:[#allocation2 + $0x8] sm:$0xf]  ;;  %v737_v63 = vunpack.c.l.bf16 %v3287_v41 }
  0x1b   :  { %3005 = vmatpush.bf16.msra.mxu2 %v2991_v3  ;;  %3006 = vmatpush.bf16.msra.mxu3 %v2991_v3  ;;  %v2985_v35 = vld [vmem:[#allocation2 + $0xf0] sm:$0xff]  ;;  %v2986_v39 = vld [vmem:[#allocation2 + $0xf8] sm:$0xff]  ;;  %v3291_v43 = vld [vmem:[#allocation2 + $0xc] sm:$0xf]  ;;  %vm3400_vm0 = vcmp.ne.f32.partialorder %v736_v62, %v736_v62 }
  0x1c   :  { %v3293_v44 = vld [vmem:[#allocation2 + $0x10] sm:$0xf]  ;;  %v3295_v45 = vld [vmem:[#allocation2 + $0x14] sm:$0xf]  ;;  %v3297_v46 = vld [vmem:[#allocation2 + $0x18] sm:$0xf]  ;;  %vm3433_vm1 = vcmp.ne.f32.partialorder %v737_v63, %v737_v63 }
  0x1d   :  { %v3299_v47 = vld [vmem:[#allocation2 + $0x1c] sm:$0xf]  ;;  %v3301_v48 = vld [vmem:[#allocation2 + $0x20] sm:$0xf]  ;;  %v3303_v49 = vld [vmem:[#allocation2 + $0x24] sm:$0xf] }
  0x1e   :  { %379 = vmatpush.bf16.msra.mxu0 %v2990_v4  ;;  %3007 = vmatpush.bf16.msra.mxu1 %v2990_v4  ;;  %v3305_v50 = vld [vmem:[#allocation2 + $0x28] sm:$0xf]  ;;  %v3307_v51 = vld [vmem:[#allocation2 + $0x2c] sm:$0xf]  ;;  %v3309_v52 = vld [vmem:[#allocation2 + $0x30] sm:$0xf]  ;;  %v8060_v63 = vunpack.c.l.bf16 %v3301_v48 }
  0x1f   :  { %3008 = vmatpush.bf16.msra.mxu2 %v2990_v4  ;;  %3009 = vmatpush.bf16.msra.mxu3 %v2990_v4  ;;  %v3311_v53 = vld [vmem:[#allocation2 + $0x34] sm:$0xf]  ;;  %v3313_v54 = vld [vmem:[#allocation2 + $0x38] sm:$0xf]  ;;  %v3315_v55 = vld [vmem:[#allocation2 + $0x3c] sm:$0xf]  ;;  %v738_v4 = vunpack.c.l.bf16 %v3289_v42 }
  0x20   :  { %v3317_v56 = vld [vmem:[#allocation2 + $0x40] sm:$0xf]  ;;  %v3319_v57 = vld [vmem:[#allocation2 + $0x44] sm:$0xf]  ;;  %v3321_v58 = vld [vmem:[#allocation2 + $0x48] sm:$0xf]  ;;  %vm3497_vm8 = vcmp.ne.f32.partialorder %v8060_v63, %v8060_v63 }
  0x21   :  { %v3323_v59 = vld [vmem:[#allocation2 + $0x4c] sm:$0xf]  ;;  %v3325_v60 = vld [vmem:[#allocation2 + $0x50] sm:$0xf]  ;;  %v3327_v61 = vld [vmem:[#allocation2 + $0x54] sm:$0xf]  ;;  %vm3437_vm2 = vcmp.ne.f32.partialorder %v738_v4, %v738_v4 }
  0x22   :  { %380 = vmatpush.bf16.msra.mxu0 %v2989_v5  ;;  %3010 = vmatpush.bf16.msra.mxu1 %v2989_v5  ;;  %v3331_v0 = vld [vmem:[#allocation2 + $0x58] sm:$0xf]  ;;  %v3333_v1 = vld [vmem:[#allocation2 + $0x5c] sm:$0xf]  ;;  %v3335_v2 = vld [vmem:[#allocation2 + $0x60] sm:$0xf] }
  0x23   :  { %3011 = vmatpush.bf16.msra.mxu2 %v2989_v5  ;;  %3012 = vmatpush.bf16.msra.mxu3 %v2989_v5  ;;  %v3337_v3 = vld [vmem:[#allocation2 + $0x64] sm:$0xf]  ;;  %v739_v5 = vunpack.c.l.bf16 %v3291_v43  ;;  %v3447_v43 = vld [vmem:[#allocation2 + $0xc8] sm:$0xf]  ;;  %v3511_v48 = vld [vmem:[#allocation2 + $0xdc] sm:$0xf] }
  0x24   :  { %v3394_v40 = vld [vmem:[#allocation2 + $0xa4] sm:$0xf]  ;;  %v3513_v63 = vld [vmem:[#allocation2 + $0xe0] sm:$0xf] }
  0x25   :  { %8034 = vst [vmem:[#allocation22_spill] sm:$0xff] %v3394_v40  ;;  %vm3441_vm3 = vcmp.ne.f32.partialorder %v739_v5, %v739_v5  ;;  %v3708_v40 = vld [vmem:[#allocation2 + $0xfc] sm:$0xf] }
  0x26   :  { %381 = vmatpush.bf16.msra.mxu0 %v2988_v6  ;;  %3013 = vmatpush.bf16.msra.mxu1 %v2988_v6 }
  0x27   :  { %3014 = vmatpush.bf16.msra.mxu2 %v2988_v6  ;;  %3015 = vmatpush.bf16.msra.mxu3 %v2988_v6  ;;  %v740_v6 = vunpack.c.l.bf16 %v3293_v44 }
  0x29   :  { %vm3458_vm4 = vcmp.ne.f32.partialorder %v740_v6, %v740_v6 }
  0x2a   :  { %382 = vmatpush.bf16.msra.mxu0 %v2987_v7  ;;  %3016 = vmatpush.bf16.msra.mxu1 %v2987_v7 }
  0x2b   :  { %3017 = vmatpush.bf16.msra.mxu2 %v2987_v7  ;;  %3018 = vmatpush.bf16.msra.mxu3 %v2987_v7  ;;  %v741_v7 = vunpack.c.l.bf16 %v3295_v45  ;;  %v3483_v45 = vld [vmem:[#allocation2 + $0xd0] sm:$0xf] }
  0x2d   :  { %383 = vmatmul.bf16.vlgmr.msra.gmra.mxu0 %v2955_v8  ;;  %423 = vmatmul.bf16.vlgmr.msra.gmra.mxu1 %v2963_v9  ;;  %v3346_v8 = vld [vmem:[%s7760_s2] ss:$0 sm:$0xff]  ;;  %v3348_v9 = vld [vmem:[#allocation2 + $0x68] sm:$0xf]  ;;  %vm3465_vm5 = vcmp.ne.f32.partialorder %v741_v7, %v741_v7  ;;  %v3504_v7 = vld [vmem:[#allocation2 + $0xd8] sm:$0xf] }
  0x2e   :  { %463 = vmatmul.bf16.vlgmr.msra.gmra.mxu2 %v2971_v10  ;;  %503 = vmatmul.bf16.vlgmr.msra.gmra.mxu3 %v2979_v11  ;;  %8027 = vst [vmem:[#allocation15_spill] sm:$0xff] %v3346_v8  ;;  %v3350_v10 = vld [vmem:[#allocation2 + $0x6c] sm:$0xf]  ;;  %v3352_v11 = vld [vmem:[#allocation2 + $0x70] sm:$0xf] }
  0x3d   :  { %388 = vmatmul.bf16.gmra.mxu0 %v2956_v12  ;;  %428 = vmatmul.bf16.gmra.mxu1 %v2964_v13  ;;  %v742_v12 = vunpack.c.l.bf16 %v3297_v46  ;;  %v8057_v46 = vunpack.c.l.bf16 %v3299_v47 }
  0x3e   :  { %468 = vmatmul.bf16.gmra.mxu2 %v2972_v14  ;;  %508 = vmatmul.bf16.gmra.mxu3 %v2980_v15  ;;  %v3426_v15 = vld [vmem:[#allocation2 + $0xc0] sm:$0xf] }
  0x3f   :  { %8043 = vst [vmem:[#allocation29_spill] sm:$0xff] %v3426_v15  ;;  %vm3472_vm6 = vcmp.ne.f32.partialorder %v742_v12, %v742_v12  ;;  %vm3490_vm7 = vcmp.ne.f32.partialorder %v8057_v46, %v8057_v46  ;;  %v8063_v46 = vunpack.c.l.bf16 %v3303_v49  ;;  %v3541_v49 = vld [vmem:[#allocation2 + $0xe4] sm:$0xf] }
  0x41   :  { %vm3522_vm9 = vcmp.ne.f32.partialorder %v8063_v46, %v8063_v46  ;;  %v3543_v46 = vld [vmem:[#allocation2 + $0xe8] sm:$0xf] }
  0x4d   :  { %393 = vmatmul.bf16.gmra.mxu0 %v2957_v16  ;;  %433 = vmatmul.bf16.gmra.mxu1 %v2965_v17  ;;  %v3358_v16 = vld [vmem:[#allocation2 + $0x74] sm:$0xf]  ;;  %v3360_v17 = vld [vmem:[#allocation2 + $0x78] sm:$0xf] }
  0x4e   :  { %473 = vmatmul.bf16.gmra.mxu2 %v2973_v18  ;;  %513 = vmatmul.bf16.gmra.mxu3 %v2981_v19  ;;  %v3362_v18 = vld [vmem:[#allocation2 + $0x7c] sm:$0xf] }
  0x4f   :  { %v3424_v19 = vld [vmem:[#allocation2 + $0xbc] sm:$0xf] }
  0x50   :  { %8042 = vst [vmem:[#allocation28_spill] sm:$0xff] %v3424_v19 }
  0x5d   :  { %398 = vmatmul.bf16.gmra.mxu0 %v2958_v20  ;;  %438 = vmatmul.bf16.gmra.mxu1 %v2966_v21  ;;  %v3422_v20 = vld [vmem:[#allocation2 + $0xb8] sm:$0xf] }
  0x5e   :  { %478 = vmatmul.bf16.gmra.mxu2 %v2974_v22  ;;  %518 = vmatmul.bf16.gmra.mxu3 %v2982_v23  ;;  %v3368_v23 = vld [vmem:[#allocation2 + $0x80] sm:$0xf]  ;;  %v3410_v22 = vld [vmem:[#allocation2 + $0xb4] sm:$0xf]  ;;  %8041 = vst [vmem:[#allocation27_spill] sm:$0xff] %v3422_v20  ;;  %v8080_v20 = vunpack.c.l.bf16 %v3313_v54 }
  0x5f   :  { %8040 = vst [vmem:[#allocation26_spill] sm:$0xff] %v3410_v22 }
  0x60   :  { %vm3610_vm14 = vcmp.ne.f32.partialorder %v8080_v20, %v8080_v20 }
  0x6d   :  { %403 = vmatmul.bf16.gmra.mxu0 %v2959_v24  ;;  %443 = vmatmul.bf16.gmra.mxu1 %v2967_v25  ;;  %v3370_v24 = vld [vmem:[#allocation2 + $0x84] sm:$0xf]  ;;  %v3372_v25 = vld [vmem:[#allocation2 + $0x88] sm:$0xf] }
  0x6e   :  { %483 = vmatmul.bf16.gmra.mxu2 %v2975_v26  ;;  %523 = vmatmul.bf16.gmra.mxu3 %v2983_v27  ;;  %8028 = vst [vmem:[#allocation16_spill] sm:$0xff] %v3370_v24  ;;  %v3406_v27 = vld [vmem:[#allocation2 + $0xac] sm:$0xf]  ;;  %v3408_v26 = vld [vmem:[#allocation2 + $0xb0] sm:$0xf] }
  0x6f   :  { %8029 = vst [vmem:[#allocation17_spill] sm:$0xff] %v3372_v25  ;;  %v8069_v25 = vunpack.c.l.bf16 %v3307_v51  ;;  %v8072_v51 = vunpack.c.l.bf16 %v3309_v52 }
  0x70   :  { %8038 = vst [vmem:[#allocation24_spill] sm:$0xff] %v3406_v27  ;;  %v3558_v27 = vld [vmem:[#allocation2 + $0xf0] sm:$0xf] }
  0x71   :  { %8039 = vst [vmem:[#allocation25_spill] sm:$0xff] %v3408_v26  ;;  %vm3536_vm11 = vcmp.ne.f32.partialorder %v8069_v25, %v8069_v25  ;;  %vm3552_vm12 = vcmp.ne.f32.partialorder %v8072_v51, %v8072_v51  ;;  %v3556_v26 = vld [vmem:[#allocation2 + $0xec] sm:$0xf] }
  0x7d   :  { %408 = vmatmul.bf16.gmra.mxu0 %v2960_v28  ;;  %448 = vmatmul.bf16.gmra.mxu1 %v2968_v29  ;;  %v3404_v28 = vld [vmem:[#allocation2 + $0xa8] sm:$0xf] }
  0x7e   :  { %488 = vmatmul.bf16.gmra.mxu2 %v2976_v30  ;;  %528 = vmatmul.bf16.gmra.mxu3 %v2984_v31  ;;  %v3378_v30 = vld [vmem:[#allocation2 + $0x8c] sm:$0xf]  ;;  %v3380_v31 = vld [vmem:[#allocation2 + $0x90] sm:$0xf]  ;;  %8037 = vst [vmem:[#allocation23_spill] sm:$0xff] %v3404_v28 }
  0x7f   :  { %8030 = vst [vmem:[#allocation18_spill] sm:$0xff] %v3378_v30  ;;  %v3502_v30 = vld [vmem:[#allocation2 + $0xd4] sm:$0xf] }
  0x80   :  { %8031 = vst [vmem:[#allocation19_spill] sm:$0xff] %v3380_v31  ;;  %v3560_v28 = vld [vmem:[#allocation2 + $0xf4] sm:$0xf] }
  0x81   :  { %8075 = vst [vmem:[#allocation31_spill] sm:$0xff] %v3560_v28  ;;  %v3618_v28 = vld [vmem:[#allocation2 + $0xf8] sm:$0xf] }
  0x8d   :  { %413 = vmatmul.bf16.gmra.mxu0 %v2961_v32  ;;  %453 = vmatmul.bf16.gmra.mxu1 %v2969_v33  ;;  %v3382_v32 = vld [vmem:[#allocation2 + $0x94] sm:$0xf]  ;;  %v3449_v33 = vld [vmem:[#allocation2 + $0xcc] sm:$0xf] }
  0x8e   :  { %493 = vmatmul.bf16.gmra.mxu2 %v2977_v34  ;;  %533 = vmatmul.bf16.gmra.mxu3 %v2985_v35  ;;  %8032 = vst [vmem:[#allocation20_spill] sm:$0xff] %v3382_v32  ;;  %v3445_v34 = vld [vmem:[#allocation2 + $0xc4] sm:$0xf]  ;;  %v8066_v32 = vunpack.c.l.bf16 %v3305_v50 }
  0x8f   :  { %8050 = vst [vmem:[#allocation30_spill] sm:$0xff] %v3445_v34 }
  0x90   :  { %vm3529_vm10 = vcmp.ne.f32.partialorder %v8066_v32, %v8066_v32  ;;  %v7779_v32 = vmov 0  }
  0x9d   :  { %418 = vmatmul.bf16.gmra.mxu0 %v2962_v36  ;;  %458 = vmatmul.bf16.gmra.mxu1 %v2970_v37  ;;  %v3388_v37 = vld [vmem:[#allocation2 + $0x98] sm:$0xf] }
  0x9e   :  { %498 = vmatmul.bf16.gmra.mxu2 %v2978_v38  ;;  %538 = vmatmul.bf16.gmra.mxu3 %v2986_v39  ;;  %v3390_v38 = vld [vmem:[#allocation2 + $0x9c] sm:$0xf]  ;;  %v3392_v39 = vld [vmem:[#allocation2 + $0xa0] sm:$0xf] }
  0x9f   :  { %8033 = vst [vmem:[#allocation21_spill] sm:$0xff] %v3392_v39 }
  0xaa   :  { %v384_v36 = vpop.f32.mrf.mxu0  ;;  %v424_v29 = vpop.f32.mrf.mxu1 }
  0xab   :  { %v3417_v42 = vadd.f32 %v3346_v8, %v384_v36  ;;  %v3420_v21 = vadd.f32 %v3346_v8, %v424_v29 }
  0xad   :  { %v3477_v44 = vmax.f32 %v3417_v42, 0.0  ;;  %608 = vst [vmem:[#allocation7] sm:$0xff] %v3417_v42  ;;  %v3481_v6 = vmax.f32 %v3420_v21, 0.0  ;;  %vm1486_vm15 = vcmp.ne.f32.partialorder %v3417_v42, %v3417_v42  ;;  %v1781_v36 = vand.u32 2147483647, %v3420_v21 }
  0xae   :  { %624 = vst [vmem:[#allocation7 + $0x80] sm:$0xff] %v3420_v21 }
  0xaf   :  { %672 = vst [vmem:[#allocation8] sm:$0xff] %v3477_v44 }
  0xb0   :  { %688 = vst [vmem:[#allocation8 + $0x80] sm:$0xff] %v3481_v6 }
  0xb1   :  { %v464_v22 = vpop.f32.mrf.mxu2  ;;  %v504_v19 = vpop.f32.mrf.mxu3 }
  0xb2   :  { %v386_v50 = vpop.f32.mrf.mxu0  ;;  %v426_v51 = vpop.f32.mrf.mxu1  ;;  %v3567_v34 = vadd.f32 %v3346_v8, %v464_v22  ;;  %v8077_v22 = vunpack.c.l.bf16 %v3311_v53  ;;  %v8083_v53 = vmov 0  }
  0xb3   :  { %v3573_v39 = vadd.f32 %v3346_v8, %v386_v50  ;;  %v3576_v47 = vadd.f32 %v3346_v8, %v426_v51  ;;  %v3587_v50 = vsel %vm3400_vm0, 1, %v7779_v32  ;;  %v1765_v51 = vand.u32 2147483647, %v3417_v42 }
  0xb4   :  { %640 = vst [vmem:[#allocation7 + $0x100] sm:$0xff] %v3567_v34  ;;  %v3598_v15 = vmax.f32 %v3567_v34, 0.0  ;;  %vm3603_vm13 = vcmp.ne.f32.partialorder %v8077_v22, %v8077_v22  ;;  %v3623_v22 = vsel %vm3433_vm1, 1, %v8083_v53  ;;  %v3628_v54 = vsel %vm3437_vm2, 1, %v8083_v53 }
  0xb5   :  { %8076 = vst [vmem:[#allocation32_spill] sm:$0xff] %v3587_v50  ;;  %v3591_v31 = vmax.f32 %v3573_v39, 0.0  ;;  %v3595_v52 = vmax.f32 %v3576_v47, 0.0  ;;  %v3616_v50 = vadd.f32 %v3346_v8, %v504_v19  ;;  %v3633_v20 = vsel %vm3441_vm3, 1, %v8083_v53 }
  0xb6   :  { %609 = vst [vmem:[#allocation7 + $0x8] sm:$0xff] %v3573_v39  ;;  %v3641_v19 = vsel %vm3458_vm4, 1, %v8083_v53  ;;  %v3646_v62 = vsel %vm3465_vm5, 1, %v8083_v53  ;;  %v3651_v29 = vsel %vm3472_vm6, 1, %v8083_v53  ;;  %vm1502_vm0 = vcmp.ne.f32.partialorder %v3420_v21, %v3420_v21 }
  0xb7   :  { %625 = vst [vmem:[#allocation7 + $0x88] sm:$0xff] %v3576_v47  ;;  %v3660_v5 = vsel %vm3490_vm7, 1, %v8083_v53  ;;  %v3665_v13 = vsel %vm3497_vm8, 1, %v8083_v53  ;;  %vm3667_vm1 = vcmp.eq.f32.partialorder %v1765_v51, inf  ;;  %v3679_v41 = vsel %vm1486_vm15, 1, %v8083_v53 }
  0xb8   :  { %8084 = vst [vmem:[#allocation33_spill] sm:$0xff] %v3623_v22  ;;  %v3690_v22 = vsel %vm3529_vm10, 1, %v8083_v53  ;;  %v3695_v42 = vsel %vm3536_vm11, 1, %v8083_v53  ;;  %vm2108_vm2 = vcmp.ne.f32.partialorder %v3477_v44, %v3477_v44  ;;  %v3703_v4 = vsel %vm1502_vm0, 1, %v8083_v53 }
  0xb9   :  { %8085 = vst [vmem:[#allocation34_spill] sm:$0xff] %v3628_v54  ;;  %v2403_v54 = vand.u32 2147483647, %v3481_v6  ;;  %v3713_v24 = vsel %vm3552_vm12, 1, %v8083_v53  ;;  %vm1845_vm3 = vcmp.eq.f32.partialorder %v1781_v36, inf  ;;  %vm2124_vm4 = vcmp.ne.f32.partialorder %v3481_v6, %v3481_v6 }
  0xba   :  { %8086 = vst [vmem:[#allocation35_spill] sm:$0xff] %v3633_v20  ;;  %v2387_v20 = vand.u32 2147483647, %v3477_v44  ;;  %v429_v51 = vpop.f32.mrf.mxu1  ;;  %v1766_v14 = vand.u32 2147483647, %v3573_v39  ;;  %v3763_v44 = vsel %vm3603_vm13, 1, %v8083_v53  ;;  %vm1487_vm7 = vcmp.ne.f32.partialorder %v3573_v39, %v3573_v39 }
  0xbb   :  { %673 = vst [vmem:[#allocation8 + $0x8] sm:$0xff] %v3591_v31  ;;  %v3723_v21 = vadd.f32 %v3346_v8, %v429_v51  ;;  %vm2467_vm6 = vcmp.eq.f32.partialorder %v2403_v54, inf  ;;  %v1782_v36 = vand.u32 2147483647, %v3576_v47  ;;  %v3743_v54 = vsel %vm2108_vm2, 1, %v8083_v53 }
  0xbc   :  { %8087 = vst [vmem:[#allocation36_spill] sm:$0xff] %v3641_v19  ;;  %vm2451_vm5 = vcmp.eq.f32.partialorder %v2387_v20, inf  ;;  %v3746_v20 = vsel %vm1845_vm3, 1, %v8083_v53  ;;  %v2388_v51 = vand.u32 2147483647, %v3591_v31  ;;  %v3757_v6 = vsel %vm2467_vm6, 1, %v8083_v53 }
  0xbd   :  { %8088 = vst [vmem:[#allocation37_spill] sm:$0xff] %v3646_v62  ;;  %vm1503_vm8 = vcmp.ne.f32.partialorder %v3576_v47, %v3576_v47  ;;  %vm1830_vm10 = vcmp.eq.f32.partialorder %v1766_v14, inf  ;;  %vm2109_vm11 = vcmp.ne.f32.partialorder %v3591_v31, %v3591_v31  ;;  %vm3780_vm12 = vcmp.eq.f32.partialorder %v1782_v36, inf  ;;  %v8253_v62 = vld [vmem:[#allocation25_spill] sm:$0xff] }
  0xbe   :  { %8089 = vst [vmem:[#allocation38_spill] sm:$0xff] %v3651_v29  ;;  %v466_v29 = vpop.f32.mrf.mxu2  ;;  %vm3787_vm13 = vcmp.eq.f32.partialorder %v2388_v51, inf  ;;  %v3795_v35 = vmax.f32 %v3616_v50, 0.0  ;;  %v3798_v14 = vsel %vm1487_vm7, 1, %v8083_v53  ;;  %v3801_v36 = vsel %vm1503_vm8, 1, %v8083_v53 }
  0xbf   :  { %689 = vst [vmem:[#allocation8 + $0x88] sm:$0xff] %v3595_v52  ;;  %v3730_v25 = vadd.f32 %v3346_v8, %v466_v29  ;;  %v3749_v29 = vsel %vm2124_vm4, 1, %v8083_v53  ;;  %v1783_v32 = vand.u32 2147483647, %v3723_v21  ;;  %v8254_v19 = vunpack.c.l.bf16 %v8253_v62 }
  0xc0   :  { %8090 = vst [vmem:[#allocation39_spill] sm:$0xff] %v3660_v5  ;;  %v3685_v5 = vsel %vm3522_vm9, 1, %v8083_v53  ;;  %vm1518_vm9 = vcmp.ne.f32.partialorder %v3567_v34, %v3567_v34 }
  0xc1   :  { %8091 = vst [vmem:[#allocation40_spill] sm:$0xff] %v3665_v13  ;;  %v389_v13 = vpop.f32.mrf.mxu0  ;;  %v3785_v39 = vmax.f32 %v3730_v25, 0.0  ;;  %v3804_v51 = vsel %vm1518_vm9, 1, %v8083_v53 }
  0xc2   :  { %704 = vst [vmem:[#allocation8 + $0x100] sm:$0xff] %v3598_v15  ;;  %v3706_v12 = vadd.f32 %v3346_v8, %v389_v13 }
  0xc3   :  { %8094 = vst [vmem:[#allocation41_spill] sm:$0xff] %v3679_v41  ;;  %v3718_v41 = vsel %vm3667_vm1, 1, %v8083_v53  ;;  %vm2140_vm1 = vcmp.ne.f32.partialorder %v3598_v15, %v3598_v15 }
  0xc4   :  { %656 = vst [vmem:[#allocation7 + $0x180] sm:$0xff] %v3616_v50  ;;  %v3726_v13 = vmax.f32 %v3706_v12, 0.0  ;;  %vm1488_vm3 = vcmp.ne.f32.partialorder %v3706_v12, %v3706_v12 }
  0xc5   :  { %8095 = vst [vmem:[#allocation42_spill] sm:$0xff] %v3685_v5  ;;  %v8251_v5 = vmov 0 }
  0xc6   :  { %8096 = vst [vmem:[#allocation43_spill] sm:$0xff] %v3690_v22  ;;  %v8233_v22 = vmov 0 }
  0xc7   :  { %8097 = vst [vmem:[#allocation44_spill] sm:$0xff] %v3695_v42 }
  0xc8   :  { %8098 = vst [vmem:[#allocation45_spill] sm:$0xff] %v3703_v4  ;;  %v3735_v4 = vmax.f32 %v3723_v21, 0.0 }
  0xc9   :  { %8099 = vst [vmem:[#allocation46_spill] sm:$0xff] %v3713_v24  ;;  %v391_v31 = vpop.f32.mrf.mxu0 }
  0xca   :  { %8100 = vst [vmem:[#allocation47_spill] sm:$0xff] %v3718_v41  ;;  %v3754_v41 = vsel %vm2451_vm5, 1, %v8083_v53  ;;  %vm1504_vm5 = vcmp.ne.f32.partialorder %v3723_v21, %v3723_v21 }
  0xcb   :  { %610 = vst [vmem:[#allocation7 + $0x10] sm:$0xff] %v3706_v12 }
  0xcc   :  { %626 = vst [vmem:[#allocation7 + $0x90] sm:$0xff] %v3723_v21  ;;  %v8178_v21 = vunpack.c.l.bf16 %v3352_v11  ;;  %v8267_v11 = vld [vmem:[#allocation27_spill] sm:$0xff] }
  0xcd   :  { %8101 = vst [vmem:[#allocation48_spill] sm:$0xff] %v3743_v54  ;;  %v3809_v54 = vsel %vm1830_vm10, 1, %v8083_v53 }
  0xce   :  { %8102 = vst [vmem:[#allocation49_spill] sm:$0xff] %v3746_v20  ;;  %v3768_v20 = vsel %vm3610_vm14, 1, %v8083_v53  ;;  %vm2125_vm14 = vcmp.ne.f32.partialorder %v3595_v52, %v3595_v52 }
  0xcf   :  { %8103 = vst [vmem:[#allocation50_spill] sm:$0xff] %v3749_v29  ;;  %v2419_v29 = vand.u32 2147483647, %v3598_v15 }
  0xd0   :  { %674 = vst [vmem:[#allocation8 + $0x10] sm:$0xff] %v3726_v13 }
  0xd1   :  { %8104 = vst [vmem:[#allocation51_spill] sm:$0xff] %v3754_v41  ;;  %v431_v41 = vpop.f32.mrf.mxu1  ;;  %vm3848_vm2 = vcmp.eq.f32.partialorder %v2419_v29, inf }
  0xd2   :  { %8105 = vst [vmem:[#allocation52_spill] sm:$0xff] %v3757_v6  ;;  %v1797_v6 = vand.u32 2147483647, %v3567_v34  ;;  %v2404_v34 = vand.u32 2147483647, %v3595_v52  ;;  %v3843_v47 = vadd.f32 %v3346_v8, %v431_v41  ;;  %v8159_v52 = vmov 0 }
  0xd3   :  { %690 = vst [vmem:[#allocation8 + $0x90] sm:$0xff] %v3735_v4  ;;  %v2389_v41 = vand.u32 2147483647, %v3726_v13 }
  0xd4   :  { %8106 = vst [vmem:[#allocation53_spill] sm:$0xff] %v3763_v44  ;;  %vm1861_vm15 = vcmp.eq.f32.partialorder %v1797_v6, inf  ;;  %v3833_v6 = vadd.f32 %v3346_v8, %v391_v31  ;;  %vm3835_vm0 = vcmp.eq.f32.partialorder %v2404_v34, inf  ;;  %v3866_v29 = vmax.f32 %v3843_v47, 0.0 }
  0xd5   :  { %8107 = vst [vmem:[#allocation54_spill] sm:$0xff] %v3768_v20  ;;  %v3812_v20 = vsel %vm2109_vm11, 1, %v8083_v53  ;;  %v8137_v44 = vunpack.c.l.bf16 %v3319_v57  ;;  %v2405_v57 = vand.u32 2147483647, %v3735_v4  ;;  %v8175_v31 = vunpack.c.l.bf16 %v3350_v10 }
  0xd6   :  { %641 = vst [vmem:[#allocation7 + $0x108] sm:$0xff] %v3730_v25  ;;  %v3855_v34 = vmax.f32 %v3833_v6, 0.0 }
  0xd7   :  { %8112 = vst [vmem:[#allocation55_spill] sm:$0xff] %v3798_v14  ;;  %v1767_v14 = vand.u32 2147483647, %v3706_v12  ;;  %vm3886_vm8 = vcmp.ne.f32.partialorder %v8137_v44, %v8137_v44  ;;  %v8145_v44 = vunpack.c.l.bf16 %v3323_v59  ;;  %v3936_v59 = vsel %vm3848_vm2, 1, %v8083_v53 }
  0xd8   :  { %8113 = vst [vmem:[#allocation56_spill] sm:$0xff] %v3801_v36  ;;  %v3819_v36 = vsel %vm3787_vm13, 1, %v8083_v53  ;;  %v8161_v12 = vunpack.c.l.bf16 %v3333_v1 }
  0xd9   :  { %8114 = vst [vmem:[#allocation57_spill] sm:$0xff] %v3804_v51  ;;  %v3824_v51 = vsel %vm3780_vm12, 1, %v8083_v53  ;;  %vm3858_vm4 = vcmp.eq.f32.partialorder %v1767_v14, inf  ;;  %v8134_v14 = vunpack.c.l.bf16 %v3317_v56  ;;  %v3899_v56 = vsel %vm2140_vm1, 1, %v8083_v53 }
  0xda   :  { %705 = vst [vmem:[#allocation8 + $0x108] sm:$0xff] %v3785_v39  ;;  %vm3915_vm11 = vcmp.ne.f32.partialorder %v8145_v44, %v8145_v44  ;;  %v3981_v1 = vsel %vm3858_vm4, 1, %v8083_v53  ;;  %vm4001_vm4 = vcmp.ne.f32.partialorder %v8175_v31, %v8175_v31  ;;  %v8189_v31 = vunpack.c.l.bf16 %v3360_v17  ;;  %v8198_v17 = vld [vmem:[#allocation16_spill] sm:$0xff]  ;;  %v8210_v44 = vld [vmem:[#allocation18_spill] sm:$0xff] }
  0xdb   :  { %8115 = vst [vmem:[#allocation58_spill] sm:$0xff] %v3809_v54  ;;  %vm3879_vm7 = vcmp.ne.f32.partialorder %v8134_v14, %v8134_v14  ;;  %v8148_v14 = vunpack.c.l.bf16 %v3325_v60  ;;  %v3942_v60 = vsel %vm1488_vm3, 1, %v8083_v53 }
  0xdc   :  { %8116 = vst [vmem:[#allocation59_spill] sm:$0xff] %v3812_v20  ;;  %v3830_v20 = vsel %vm2125_vm14, 1, %v8083_v53  ;;  %vm3944_vm14 = vcmp.eq.f32.partialorder %v1783_v32, inf  ;;  %v8162_v32 = vmov 0 }
  0xdd   :  { %720 = vst [vmem:[#allocation8 + $0x180] sm:$0xff] %v3795_v35  ;;  %vm3922_vm12 = vcmp.ne.f32.partialorder %v8148_v14, %v8148_v14  ;;  %v506_v14 = vpop.f32.mrf.mxu3 }
  0xde   :  { %8117 = vst [vmem:[#allocation60_spill] sm:$0xff] %v3819_v36  ;;  %v4400_v36 = vsel %vm3922_vm12, 1, %v8083_v53 }
  0xdf   :  { %8118 = vst [vmem:[#allocation61_spill] sm:$0xff] %v3824_v51  ;;  %v3846_v51 = vsel %vm1861_vm15, 1, %v8083_v53 }
  0xe0   :  { %8119 = vst [vmem:[#allocation62_spill] sm:$0xff] %v3830_v20  ;;  %v8131_v20 = vunpack.c.l.bf16 %v3315_v55  ;;  %v3893_v55 = vsel %vm3835_vm0, 1, %v8083_v53  ;;  %vm3960_vm0 = vcmp.ne.f32.partialorder %v8161_v12, %v8161_v12  ;;  %v469_v12 = vpop.f32.mrf.mxu2 }
  0xe1   :  { %8120 = vst [vmem:[#allocation63_spill] sm:$0xff] %v3833_v6  ;;  %v8163_v32 = vsel %vm3960_vm0, 4294967295, %v8162_v32 }
  0xe2   :  { %8123 = vst [vmem:[#allocation64_spill] sm:$0xff] %v3843_v47  ;;  %vm3872_vm6 = vcmp.ne.f32.partialorder %v8131_v20, %v8131_v20  ;;  %v8142_v20 = vunpack.c.l.bf16 %v3321_v58  ;;  %v8151_v58 = vunpack.c.l.bf16 %v3327_v61  ;;  %v1798_v61 = vand.u32 2147483647, %v3730_v25 }
  0xe3   :  { %8124 = vst [vmem:[#allocation65_spill] sm:$0xff] %v3846_v51  ;;  %v8332_v51 = vunpack.c.l.bf16 %v3708_v40 }
  0xe4   :  { %8127 = vst [vmem:[#allocation66_spill] sm:$0xff] %v3855_v34  ;;  %vm3908_vm10 = vcmp.ne.f32.partialorder %v8142_v20, %v8142_v20  ;;  %vm3929_vm13 = vcmp.ne.f32.partialorder %v8151_v58, %v8151_v58  ;;  %v8158_v58 = vunpack.c.l.bf16 %v3331_v0  ;;  %v8167_v0 = vunpack.c.l.bf16 %v3337_v3 }
  0xe5   :  { %611 = vst [vmem:[#allocation7 + $0x18] sm:$0xff] %v3833_v6  ;;  %v1813_v3 = vand.u32 2147483647, %v3616_v50  ;;  %v4390_v24 = vsel %vm3908_vm10, 1, %v8083_v53  ;;  %v4405_v40 = vsel %vm3929_vm13, 1, %v8083_v53  ;;  %v8379_v6 = vld [vmem:[#allocation40_spill] sm:$0xff] }
  0xe6   :  { %8130 = vst [vmem:[#allocation67_spill] sm:$0xff] %v3866_v29  ;;  %vm3953_vm15 = vcmp.ne.f32.partialorder %v8158_v58, %v8158_v58  ;;  %vm3974_vm2 = vcmp.ne.f32.partialorder %v8167_v0, %v8167_v0  ;;  %v8168_v58 = vmov 0  ;;  %v8172_v0 = vunpack.c.l.bf16 %v3348_v9 }
  0xe7   :  { %627 = vst [vmem:[#allocation7 + $0x98] sm:$0xff] %v3843_v47  ;;  %v8160_v52 = vsel %vm3953_vm15, 4294967295, %v8159_v52  ;;  %v8169_v58 = vsel %vm3974_vm2, 4294967295, %v8168_v58  ;;  %v8181_v9 = vunpack.c.l.bf16 %v3358_v16  ;;  %v4032_v16 = vadd.f32 %v3346_v8, %v469_v12 }
  0xe8   :  { %8140 = vst [vmem:[#allocation68_spill] sm:$0xff] %v3893_v55  ;;  %vm3994_vm3 = vcmp.ne.f32.partialorder %v8172_v0, %v8172_v0  ;;  %v8182_v0 = vmov 0  ;;  %v8196_v12 = vmov 0  ;;  %vm4148_vm0 = vcmp.eq.f32.partialorder %v1813_v3, inf }
  0xe9   :  { %8141 = vst [vmem:[#allocation69_spill] sm:$0xff] %v3899_v56  ;;  %v8165_v56 = vmov 0  ;;  %vm4015_vm9 = vcmp.ne.f32.partialorder %v8181_v9, %v8181_v9  ;;  %v8195_v9 = vunpack.c.l.bf16 %v3368_v23  ;;  %v4074_v23 = vadd.f32 %v3346_v8, %v506_v14 }
  0xea   :  { %675 = vst [vmem:[#allocation8 + $0x18] sm:$0xff] %v3855_v34  ;;  %v8183_v0 = vsel %vm4015_vm9, 4294967295, %v8182_v0  ;;  %vm4037_vm9 = vcmp.ne.f32.partialorder %v8189_v31, %v8189_v31  ;;  %v8200_v31 = vmov 0  ;;  %v8216_v14 = vmov 0 }
  0xeb   :  { %8154 = vst [vmem:[#allocation70_spill] sm:$0xff] %v3936_v59  ;;  %v8164_v59 = vunpack.c.l.bf16 %v3335_v2  ;;  %v3987_v2 = vsel %vm1504_vm5, 1, %v8083_v53  ;;  %vm4008_vm5 = vcmp.ne.f32.partialorder %v8178_v21, %v8178_v21  ;;  %v8190_v21 = vmov 0 }
  0xec   :  { %8155 = vst [vmem:[#allocation71_spill] sm:$0xff] %v3942_v60  ;;  %v8173_v60 = vmov 0  ;;  %v8191_v21 = vsel %vm4037_vm9, 4294967295, %v8190_v21 }
  0xed   :  { %691 = vst [vmem:[#allocation8 + $0x98] sm:$0xff] %v3866_v29  ;;  %vm3967_vm1 = vcmp.ne.f32.partialorder %v8164_v59, %v8164_v59  ;;  %v2420_v59 = vand.u32 2147483647, %v3785_v39  ;;  %v8174_v60 = vsel %vm3994_vm3, 4294967295, %v8173_v60  ;;  %vm8184_vm3 = vcmp.ne.f32.partialorder %v3726_v13, %v3726_v13 }
  0xee   :  { %v8166_v56 = vsel %vm3967_vm1, 4294967295, %v8165_v56  ;;  %8170 = vst [vmem:[#allocation72_spill] sm:$0xff] %v3981_v1  ;;  %v8176_v1 = vmov 0  ;;  %v4023_v10 = vsel %vm8184_vm3, 1, %v8083_v53  ;;  %v8192_v13 = vunpack.c.l.bf16 %v3362_v18 }
  0xef   :  { %8171 = vst [vmem:[#allocation73_spill] sm:$0xff] %v3987_v2  ;;  %v8177_v1 = vsel %vm4001_vm4, 4294967295, %v8176_v1  ;;  %v8179_v2 = vmov 0  ;;  %vm4025_vm4 = vcmp.eq.f32.partialorder %v2389_v41, inf  ;;  %v8193_v41 = vmov 0 }
  0xf0   :  { %v8180_v2 = vsel %vm4008_vm5, 4294967295, %v8179_v2  ;;  %8185 = vst [vmem:[#allocation74_spill] sm:$0xff] %v4023_v10  ;;  %vm4044_vm3 = vcmp.ne.f32.partialorder %v8192_v13, %v8192_v13  ;;  %vm4051_vm5 = vcmp.ne.f32.partialorder %v8195_v9, %v8195_v9  ;;  %v8199_v10 = vunpack.c.l.bf16 %v8198_v17  ;;  %v8206_v9 = vld [vmem:[#allocation17_spill] sm:$0xff] }
  0xf1   :  { %8188 = vst [vmem:[#allocation75_spill] sm:$0xff] %v4032_v16  ;;  %v8194_v41 = vsel %vm4044_vm3, 4294967295, %v8193_v41  ;;  %v8197_v12 = vsel %vm4051_vm5, 4294967295, %v8196_v12  ;;  %v4065_v18 = vsel %vm3944_vm14, 1, %v8083_v53  ;;  %vm4067_vm3 = vcmp.eq.f32.partialorder %v2405_v57, inf }
  0xf2   :  { %vm4058_vm2 = vcmp.ne.f32.partialorder %v8199_v10, %v8199_v10  ;;  %8202 = vst [vmem:[#allocation16_spill] sm:$0xff] %v4065_v18  ;;  %v8207_v10 = vunpack.c.l.bf16 %v8206_v9  ;;  %v8208_v17 = vmov 0  ;;  %v8211_v29 = vunpack.c.l.bf16 %v8210_v44  ;;  %v8214_v18 = vld [vmem:[#allocation19_spill] sm:$0xff]  ;;  %v8218_v9 = vld [vmem:[#allocation20_spill] sm:$0xff] }
  0xf3   :  { %v8201_v31 = vsel %vm4058_vm2, 4294967295, %v8200_v31  ;;  %8205 = vst [vmem:[#allocation76_spill] sm:$0xff] %v4074_v23  ;;  %v8212_v57 = vmov 0  ;;  %v8215_v47 = vunpack.c.l.bf16 %v8214_v18  ;;  %v8219_v8 = vunpack.c.l.bf16 %v8218_v9  ;;  %v8231_v9 = vld [vmem:[#allocation21_spill] sm:$0xff] }
  0xf4   :  { %vm4079_vm5 = vcmp.ne.f32.partialorder %v8207_v10, %v8207_v10  ;;  %vm4086_vm14 = vcmp.ne.f32.partialorder %v8211_v29, %v8211_v29  ;;  %v8220_v10 = vmov 0  ;;  %642 = vst [vmem:[#allocation7 + $0x110] sm:$0xff] %v4032_v16  ;;  %v8226_v29 = vmov 0 }
  0xf5   :  { %v8209_v17 = vsel %vm4079_vm5, 4294967295, %v8208_v17  ;;  %v8213_v57 = vsel %vm4086_vm14, 4294967295, %v8212_v57  ;;  %vm4093_vm9 = vcmp.ne.f32.partialorder %v8215_v47, %v8215_v47  ;;  %vm4100_vm2 = vcmp.ne.f32.partialorder %v8219_v8, %v8219_v8  ;;  %657 = vst [vmem:[#allocation7 + $0x188] sm:$0xff] %v4074_v23 }
  0xf6   :  { %v8217_v14 = vsel %vm4093_vm9, 4294967295, %v8216_v14  ;;  %v8221_v10 = vsel %vm4100_vm2, 4294967295, %v8220_v10  ;;  %vm4104_vm5 = vcmp.eq.f32.partialorder %v1798_v61, inf  ;;  %v4113_v47 = vmax.f32 %v4032_v16, 0.0 }
  0xf7   :  { %v8225_v8 = vunpack.c.l.bf16 %v3388_v37  ;;  %v8228_v61 = vunpack.c.l.bf16 %v3390_v38  ;;  %v8229_v18 = vmov 0  ;;  %v8232_v42 = vunpack.c.l.bf16 %v8231_v9  ;;  %v8235_v37 = vld [vmem:[#allocation22_spill] sm:$0xff] }
  0xf8   :  { %8224 = vst [vmem:[#allocation17_spill] sm:$0xff] %v4113_v47  ;;  %v8236_v16 = vunpack.c.l.bf16 %v8235_v37  ;;  %v8249_v37 = vld [vmem:[#allocation24_spill] sm:$0xff]  ;;  %v4200_v62 = vsel %vm4067_vm3, 1, %v8083_v53  ;;  %v8273_v13 = vmov 0  ;;  %v8288_v44 = vunpack.c.l.bf16 %v3447_v43 }
  0xf9   :  { %vm4119_vm9 = vcmp.ne.f32.partialorder %v8225_v8, %v8225_v8  ;;  %vm4126_vm2 = vcmp.ne.f32.partialorder %v8228_v61, %v8228_v61  ;;  %vm4133_vm1 = vcmp.ne.f32.partialorder %v8232_v42, %v8232_v42  ;;  %v8237_v8 = vmov 0  ;;  %8264 = vst [vmem:[#allocation22_spill] sm:$0xff] %v4200_v62  ;;  %v8275_v62 = vld [vmem:[#allocation29_spill] sm:$0xff] }
  0xfa   :  { %v8227_v29 = vsel %vm4119_vm9, 4294967295, %v8226_v29  ;;  %v8230_v18 = vsel %vm4126_vm2, 4294967295, %v8229_v18  ;;  %v8234_v22 = vsel %vm4133_vm1, 4294967295, %v8233_v22  ;;  %vm4140_vm14 = vcmp.ne.f32.partialorder %v8236_v16, %v8236_v16  ;;  %v8245_v16 = vld [vmem:[#allocation23_spill] sm:$0xff]  ;;  %706 = vst [vmem:[#allocation8 + $0x110] sm:$0xff] %v4113_v47 }
  0xfb   :  { %v8238_v8 = vsel %vm4140_vm14, 4294967295, %v8237_v8  ;;  %vm4144_vm9 = vcmp.eq.f32.partialorder %v2420_v59, inf  ;;  %v4155_v42 = vmax.f32 %v4074_v23, 0.0  ;;  %v8246_v9 = vunpack.c.l.bf16 %v8245_v16  ;;  %v8257_v16 = vld [vmem:[#allocation26_spill] sm:$0xff]  ;;  %v8378_v47 = vld [vmem:[#allocation35_spill] sm:$0xff] }
  0xfc   :  { %8239 = vst [vmem:[#allocation18_spill] sm:$0xff] %v8238_v8  ;;  %v8250_v3 = vunpack.c.l.bf16 %v8249_v37  ;;  %vm4175_vm2 = vcmp.ne.f32.partialorder %v8254_v19, %v8254_v19  ;;  %v8258_v23 = vunpack.c.l.bf16 %v8257_v16  ;;  %v4189_v37 = vsel %vm4025_vm4, 1, %v8083_v53  ;;  %v8271_v16 = vld [vmem:[#allocation28_spill] sm:$0xff] }
  0xfd   :  { %8244 = vst [vmem:[#allocation19_spill] sm:$0xff] %v4155_v42  ;;  %vm4161_vm14 = vcmp.ne.f32.partialorder %v8246_v9, %v8246_v9  ;;  %v8259_v9 = vmov 0  ;;  %v8297_v43 = vunpack.c.l.bf16 %v3502_v30  ;;  %v8305_v38 = vmov 0 }
  0xfe   :  { %vm4168_vm1 = vcmp.ne.f32.partialorder %v8250_v3, %v8250_v3  ;;  %vm4182_vm15 = vcmp.ne.f32.partialorder %v8258_v23, %v8258_v23  ;;  %8261 = vst [vmem:[#allocation20_spill] sm:$0xff] %v4189_v37  ;;  %v8268_v3 = vunpack.c.l.bf16 %v8267_v11  ;;  %v8279_v11 = vld [vmem:[#allocation30_spill] sm:$0xff]  ;;  %v8308_v61 = vmov 0 }
  0xff   :  { %v8252_v5 = vsel %vm4168_vm1, 4294967295, %v8251_v5  ;;  %v8260_v9 = vsel %vm4182_vm15, 4294967295, %v8259_v9  ;;  %vm8262_vm1 = vcmp.ne.f32.partialorder %v3735_v4, %v3735_v4  ;;  %vm8265_vm15 = vcmp.ne.f32.partialorder %v3730_v25, %v3730_v25  ;;  %721 = vst [vmem:[#allocation8 + $0x188] sm:$0xff] %v4155_v42  ;;  %v8377_v42 = vld [vmem:[#allocation39_spill] sm:$0xff] }
 0x100   :  { %v4195_v19 = vsel %vm8262_vm1, 1, %v8083_v53  ;;  %v4206_v23 = vsel %vm8265_vm15, 1, %v8083_v53  ;;  %vm4212_vm4 = vcmp.ne.f32.partialorder %v8268_v3, %v8268_v3  ;;  %v8276_v25 = vunpack.c.l.bf16 %v8275_v62 }
 0x101   :  { %8263 = vst [vmem:[#allocation21_spill] sm:$0xff] %v4195_v19  ;;  %v8272_v19 = vunpack.c.l.bf16 %v8271_v16  ;;  %v8280_v37 = vunpack.c.l.bf16 %v8279_v11  ;;  %v8281_v3 = vmov 0  ;;  %vm8337_vm10 = vnez %v8166_v56 }
 0x102   :  { %8266 = vst [vmem:[#allocation23_spill] sm:$0xff] %v4206_v23  ;;  %vm4226_vm15 = vcmp.ne.f32.partialorder %v8276_v25, %v8276_v25  ;;  %v8277_v23 = vmov 0  ;;  %v4420_v55 = vsel %vm8337_vm10, 1, %v8083_v53  ;;  %vm8339_vm12 = vnez %v8174_v60 }
 0x103   :  { %vm4219_vm1 = vcmp.ne.f32.partialorder %v8272_v19, %v8272_v19  ;;  %v8278_v23 = vsel %vm4226_vm15, 4294967295, %v8277_v23  ;;  %vm4233_vm3 = vcmp.ne.f32.partialorder %v8280_v37, %v8280_v37  ;;  %v4240_v19 = vsel %vm4104_vm5, 1, %v8083_v53 }
 0x104   :  { %v8274_v13 = vsel %vm4219_vm1, 4294967295, %v8273_v13  ;;  %v8282_v3 = vsel %vm4233_vm3, 4294967295, %v8281_v3  ;;  %8283 = vst [vmem:[#allocation24_spill] sm:$0xff] %v4240_v19  ;;  %vm8284_vm1 = vcmp.ne.f32.partialorder %v3785_v39, %v3785_v39  ;;  %vm8286_vm15 = vcmp.ne.f32.partialorder %v3616_v50, %v3616_v50  ;;  %v8376_v19 = vld [vmem:[#allocation34_spill] sm:$0xff] }
 0x105   :  { %v4246_v62 = vsel %vm8284_vm1, 1, %v8083_v53  ;;  %v4252_v16 = vsel %vm8286_vm15, 1, %v8083_v53  ;;  %vm4259_vm5 = vcmp.ne.f32.partialorder %v8288_v44, %v8288_v44  ;;  %v8291_v39 = vunpack.c.l.bf16 %v3449_v33 }
 0x106   :  { %8285 = vst [vmem:[#allocation25_spill] sm:$0xff] %v4246_v62  ;;  %v8294_v50 = vunpack.c.l.bf16 %v3483_v45  ;;  %v8295_v37 = vmov 0  ;;  %vm4280_vm3 = vcmp.ne.f32.partialorder %v8297_v43, %v8297_v43  ;;  %v8298_v44 = vmov 0 }
 0x107   :  { %8287 = vst [vmem:[#allocation26_spill] sm:$0xff] %v4252_v16  ;;  %vm4266_vm1 = vcmp.ne.f32.partialorder %v8291_v39, %v8291_v39  ;;  %v8299_v44 = vsel %vm4280_vm3, 4294967295, %v8298_v44  ;;  %v4287_v33 = vsel %vm4144_vm9, 1, %v8083_v53  ;;  %v4292_v45 = vsel %vm4148_vm0, 1, %v8083_v53  ;;  %v8372_v16 = vld [vmem:[#allocation32_spill] sm:$0xff] }
 0x108   :  { %vm4273_vm15 = vcmp.ne.f32.partialorder %v8294_v50, %v8294_v50  ;;  %8300 = vst [vmem:[#allocation27_spill] sm:$0xff] %v4287_v33  ;;  %v8304_v50 = vunpack.c.l.bf16 %v3504_v7  ;;  %v8307_v43 = vunpack.c.l.bf16 %v3511_v48  ;;  %v8313_v7 = vunpack.c.l.bf16 %v3541_v49  ;;  %v8374_v33 = vld [vmem:[#allocation33_spill] sm:$0xff] }
 0x109   :  { %v8296_v37 = vsel %vm4273_vm15, 4294967295, %v8295_v37  ;;  %8301 = vst [vmem:[#allocation28_spill] sm:$0xff] %v4292_v45  ;;  %vm8302_vm15 = vcmp.ne.f32.partialorder %v3795_v35, %v3795_v35  ;;  %v8310_v45 = vunpack.c.l.bf16 %v3513_v63  ;;  %v8319_v63 = vunpack.c.l.bf16 %v3556_v26 }
 0x10a   :  { %v4298_v30 = vsel %vm8302_vm15, 1, %v8083_v53  ;;  %vm4304_vm3 = vcmp.ne.f32.partialorder %v8304_v50, %v8304_v50  ;;  %vm4311_vm9 = vcmp.ne.f32.partialorder %v8307_v43, %v8307_v43  ;;  %vm4325_vm15 = vcmp.ne.f32.partialorder %v8313_v7, %v8313_v7 }
 0x10b   :  { %8303 = vst [vmem:[#allocation29_spill] sm:$0xff] %v4298_v30  ;;  %v8306_v38 = vsel %vm4304_vm3, 4294967295, %v8305_v38  ;;  %v8309_v61 = vsel %vm4311_vm9, 4294967295, %v8308_v61  ;;  %vm4318_vm0 = vcmp.ne.f32.partialorder %v8310_v45, %v8310_v45  ;;  %v8311_v30 = vmov 0 }
 0x10c   :  { %v8312_v30 = vsel %vm4318_vm0, 4294967295, %v8311_v30  ;;  %v8314_v50 = vmov 0  ;;  %v8316_v43 = vunpack.c.l.bf16 %v3543_v46  ;;  %vm4340_vm0 = vcmp.ne.f32.partialorder %v8319_v63, %v8319_v63  ;;  %v8325_v46 = vld [vmem:[#allocation31_spill] sm:$0xff] }
 0x10d   :  { %v8315_v50 = vsel %vm4325_vm15, 4294967295, %v8314_v50  ;;  %v8322_v49 = vunpack.c.l.bf16 %v3558_v27  ;;  %v8323_v7 = vmov 0  ;;  %v8326_v48 = vunpack.c.l.bf16 %v8325_v46 }
 0x10e   :  { %vm4333_vm9 = vcmp.ne.f32.partialorder %v8316_v43, %v8316_v43  ;;  %v4361_v26 = vsel %vm3872_vm6, 1, %v8083_v53  ;;  %v4366_v27 = vsel %vm3879_vm7, 1, %v8083_v53  ;;  %v4371_v63 = vsel %vm3886_vm8, 1, %v8083_v53 }
 0x10f   :  { %vm4347_vm15 = vcmp.ne.f32.partialorder %v8322_v49, %v8322_v49  ;;  %vm4354_vm3 = vcmp.ne.f32.partialorder %v8326_v48, %v8326_v48  ;;  %v8329_v48 = vunpack.c.l.bf16 %v3618_v28  ;;  %vm4383_vm6 = vcmp.ne.f32.partialorder %v8332_v51, %v8332_v51  ;;  %v8375_v49 = vld [vmem:[#allocation38_spill] sm:$0xff] }
 0x110   :  { %v8324_v7 = vsel %vm4347_vm15, 4294967295, %v8323_v7  ;;  %v4395_v28 = vsel %vm3915_vm11, 1, %v8083_v53  ;;  %vm8335_vm7 = vnez %v8160_v52  ;;  %vm8336_vm8 = vnez %v8163_v32 }
 0x111   :  { %vm4376_vm15 = vcmp.ne.f32.partialorder %v8329_v48, %v8329_v48  ;;  %v4410_v54 = vsel %vm8335_vm7, 1, %v8083_v53  ;;  %v4415_v15 = vsel %vm8336_vm8, 1, %v8083_v53  ;;  %vm8338_vm11 = vnez %v8169_v58  ;;  %v8354_v48 = vld [vmem:[#allocation18_spill] sm:$0xff] }
 0x112   :  { %v4425_v20 = vsel %vm8338_vm11, 1, %v8083_v53  ;;  %v4430_v52 = vsel %vm8339_vm12, 1, %v8083_v53  ;;  %vm8340_vm13 = vnez %v8177_v1  ;;  %vm8341_vm7 = vnez %v8180_v2 }
 0x113   :  { %v4435_v32 = vsel %vm8340_vm13, 1, %v8083_v53  ;;  %v4440_v56 = vsel %vm8341_vm7, 1, %v8083_v53  ;;  %vm8342_vm8 = vnez %v8183_v0  ;;  %vm8343_vm10 = vnez %v8191_v21 }
 0x114   :  { %v4445_v58 = vsel %vm8342_vm8, 1, %v8083_v53  ;;  %v4450_v60 = vsel %vm8343_vm10, 1, %v8083_v53  ;;  %vm8344_vm11 = vnez %v8194_v41  ;;  %vm8345_vm12 = vnez %v8197_v12 }
 0x115   :  { %v4455_v1 = vsel %vm8344_vm11, 1, %v8083_v53  ;;  %v4460_v2 = vsel %vm8345_vm12, 1, %v8083_v53  ;;  %vm8346_vm13 = vnez %v8201_v31  ;;  %vm8347_vm7 = vnez %v8209_v17 }
 0x116   :  { %v4465_v0 = vsel %vm8346_vm13, 1, %v8083_v53  ;;  %v4470_v21 = vsel %vm8347_vm7, 1, %v8083_v53  ;;  %vm8348_vm8 = vnez %v8213_v57  ;;  %vm8349_vm10 = vnez %v8217_v14 }
 0x117   :  { %v4475_v41 = vsel %vm8348_vm8, 1, %v8083_v53  ;;  %v4480_v12 = vsel %vm8349_vm10, 1, %v8083_v53  ;;  %vm8350_vm11 = vnez %v8221_v10  ;;  %vm8351_vm12 = vnez %v8227_v29 }
 0x118   :  { %v4485_v31 = vsel %vm8350_vm11, 1, %v8083_v53  ;;  %v4490_v17 = vsel %vm8351_vm12, 1, %v8083_v53  ;;  %vm8352_vm13 = vnez %v8230_v18  ;;  %vm8353_vm7 = vnez %v8234_v22 }
 0x119   :  { %v4495_v57 = vsel %vm8352_vm13, 1, %v8083_v53  ;;  %v4500_v14 = vsel %vm8353_vm7, 1, %v8083_v53  ;;  %vm8355_vm8 = vnez %v8354_v48  ;;  %v4510_v29 = vsel %vm4161_vm14, 1, %v8083_v53  ;;  %v8371_v48 = vld [vmem:[#allocation36_spill] sm:$0xff] }
 0x11a   :  { %v4505_v10 = vsel %vm8355_vm8, 1, %v8083_v53  ;;  %vm8356_vm10 = vnez %v8252_v5  ;;  %v4520_v22 = vsel %vm4175_vm2, 1, %v8083_v53  ;;  %vm8357_vm11 = vnez %v8260_v9 }
 0x11b   :  { %v4515_v18 = vsel %vm8356_vm10, 1, %v8083_v53  ;;  %v4525_v51 = vsel %vm8357_vm11, 1, %v8083_v53  ;;  %v4530_v59 = vsel %vm4212_vm4, 1, %v8083_v53  ;;  %vm8358_vm14 = vnez %v8274_v13 }
 0x11c   :  { %v4535_v5 = vsel %vm8358_vm14, 1, %v8083_v53  ;;  %vm8359_vm12 = vnez %v8278_v23  ;;  %vm8360_vm2 = vnez %v8282_v3  ;;  %v4550_v4 = vsel %vm4259_vm5, 1, %v8083_v53 }
 0x11d   :  { %v4540_v8 = vsel %vm8359_vm12, 1, %v8083_v53  ;;  %v4545_v9 = vsel %vm8360_vm2, 1, %v8083_v53  ;;  %v4555_v13 = vsel %vm4266_vm1, 1, %v8083_v53  ;;  %vm8361_vm4 = vnez %v8296_v37 }
 0x11e   :  { %v4560_v23 = vsel %vm8361_vm4, 1, %v8083_v53  ;;  %vm8362_vm13 = vnez %v8299_v44  ;;  %vm8363_vm7 = vnez %v8306_v38  ;;  %vm8364_vm5 = vnez %v8309_v61 }
 0x11f   :  { %v4565_v3 = vsel %vm8362_vm13, 1, %v8083_v53  ;;  %v4570_v25 = vsel %vm8363_vm7, 1, %v8083_v53  ;;  %v4575_v11 = vsel %vm8364_vm5, 1, %v8083_v53  ;;  %vm8365_vm1 = vnez %v8312_v30 }
 0x120   :  { %v4580_v37 = vsel %vm8365_vm1, 1, %v8083_v53  ;;  %vm8366_vm8 = vnez %v8315_v50  ;;  %v4590_v38 = vsel %vm4333_vm9, 1, %v8083_v53  ;;  %v4595_v61 = vsel %vm4340_vm0, 1, %v8083_v53 }
 0x121   :  { %v4585_v44 = vsel %vm8366_vm8, 1, %v8083_v53  ;;  %vm8367_vm10 = vnez %v8324_v7  ;;  %v4605_v50 = vsel %vm4354_vm3, 1, %v8083_v53  ;;  %v4610_v39 = vsel %vm4376_vm15, 1, %v8083_v53  ;;  %v8373_v7 = vld [vmem:[#allocation37_spill] sm:$0xff] }
 0x122   :  { %v4600_v30 = vsel %vm8367_vm10, 1, %v8083_v53  ;;  %8368 = vst [vmem:[#allocation30_spill] sm:$0xff] %v4605_v50  ;;  %v4615_v45 = vsel %vm4383_vm6, 1, %v8083_v53  ;;  %vm928_vm9 = vcmp.gt.s32.totalorder %v8372_v16, %v8371_v48  ;;  %vm930_vm0 = vcmp.gt.s32.totalorder %v8374_v33, %v8373_v7  ;;  %v8380_v53 = vld [vmem:[#allocation42_spill] sm:$0xff] }
 0x123   :  { %8369 = vst [vmem:[#allocation31_spill] sm:$0xff] %v4610_v39  ;;  %v929_v43 = vsel %vm928_vm9, %v8372_v16, %v8371_v48  ;;  %v931_v62 = vsel %vm930_vm0, %v8374_v33, %v8373_v7  ;;  %vm932_vm3 = vcmp.gt.s32.totalorder %v8376_v19, %v8375_v49  ;;  %vm934_vm15 = vcmp.gt.s32.totalorder %v8378_v47, %v8377_v42  ;;  %v8381_v48 = vld [vmem:[#allocation43_spill] sm:$0xff]  ;;  %v8382_v7 = vld [vmem:[#allocation44_spill] sm:$0xff]  ;;  %v8385_v50 = vld [vmem:[#allocation54_spill] sm:$0xff] }
 0x124   :  { %8370 = vst [vmem:[#allocation18_spill] sm:$0xff] %v4615_v45  ;;  %v933_v46 = vsel %vm932_vm3, %v8376_v19, %v8375_v49  ;;  %v935_v34 = vsel %vm934_vm15, %v8378_v47, %v8377_v42  ;;  %vm936_vm6 = vcmp.gt.s32.totalorder %v929_v43, %v8379_v6  ;;  %vm938_vm11 = vcmp.gt.s32.totalorder %v931_v62, %v8380_v53  ;;  %v8383_v19 = vld [vmem:[#allocation46_spill] sm:$0xff]  ;;  %v8384_v49 = vld [vmem:[#allocation53_spill] sm:$0xff] }
 0x125   :  { %v937_v16 = vsel %vm936_vm6, %v929_v43, %v8379_v6  ;;  %v939_v33 = vsel %vm938_vm11, %v931_v62, %v8380_v53  ;;  %vm940_vm14 = vcmp.gt.s32.totalorder %v933_v46, %v8381_v48  ;;  %vm942_vm12 = vcmp.gt.s32.totalorder %v935_v34, %v8382_v7 }
 0x126   :  { %v941_v45 = vsel %vm940_vm14, %v933_v46, %v8381_v48  ;;  %v943_v39 = vsel %vm942_vm12, %v935_v34, %v8382_v7  ;;  %vm944_vm2 = vcmp.gt.s32.totalorder %v937_v16, %v8383_v19  ;;  %vm946_vm4 = vcmp.gt.s32.totalorder %v939_v33, %v8384_v49 }
 0x127   :  { %v945_v47 = vsel %vm944_vm2, %v937_v16, %v8383_v19  ;;  %v947_v42 = vsel %vm946_vm4, %v939_v33, %v8384_v49  ;;  %vm948_vm13 = vcmp.gt.s32.totalorder %v941_v45, %v8385_v50  ;;  %vm950_vm7 = vcmp.gt.s32.totalorder %v943_v39, %v4361_v26  ;;  %v434_v19 = vpop.f32.mrf.mxu1 }
 0x128   :  { %v949_v53 = vsel %vm948_vm13, %v941_v45, %v8385_v50  ;;  %v951_v6 = vsel %vm950_vm7, %v943_v39, %v4361_v26  ;;  %vm952_vm5 = vcmp.gt.s32.totalorder %v945_v47, %v4366_v27  ;;  %vm954_vm1 = vcmp.gt.s32.totalorder %v947_v42, %v4371_v63 }
 0x129   :  { %v953_v34 = vsel %vm952_vm5, %v945_v47, %v4366_v27  ;;  %v955_v62 = vsel %vm954_vm1, %v947_v42, %v4371_v63  ;;  %vm956_vm8 = vcmp.gt.s32.totalorder %v949_v53, %v4390_v24  ;;  %vm958_vm10 = vcmp.gt.s32.totalorder %v951_v6, %v4395_v28 }
 0x12a   :  { %v957_v43 = vsel %vm956_vm8, %v949_v53, %v4390_v24  ;;  %v959_v46 = vsel %vm958_vm10, %v951_v6, %v4395_v28  ;;  %vm960_vm9 = vcmp.gt.s32.totalorder %v953_v34, %v4400_v36  ;;  %vm962_vm0 = vcmp.gt.s32.totalorder %v955_v62, %v4405_v40  ;;  %v8390_v33 = vld [vmem:[#allocation31_spill] sm:$0xff] }
 0x12b   :  { %v961_v26 = vsel %vm960_vm9, %v953_v34, %v4400_v36  ;;  %v963_v50 = vsel %vm962_vm0, %v955_v62, %v4405_v40  ;;  %vm964_vm3 = vcmp.gt.s32.totalorder %v957_v43, %v4410_v54  ;;  %vm966_vm15 = vcmp.gt.s32.totalorder %v959_v46, %v4415_v15  ;;  %v509_v34 = vpop.f32.mrf.mxu3  ;;  %v8393_v62 = vld [vmem:[#allocation64_spill] sm:$0xff] }
 0x12c   :  { %v965_v27 = vsel %vm964_vm3, %v957_v43, %v4410_v54  ;;  %v967_v63 = vsel %vm966_vm15, %v959_v46, %v4415_v15  ;;  %vm968_vm6 = vcmp.gt.s32.totalorder %v961_v26, %v4420_v55  ;;  %vm970_vm11 = vcmp.gt.s32.totalorder %v963_v50, %v4425_v20 }
 0x12d   :  { %v969_v24 = vsel %vm968_vm6, %v961_v26, %v4420_v55  ;;  %v971_v28 = vsel %vm970_vm11, %v963_v50, %v4425_v20  ;;  %vm972_vm14 = vcmp.gt.s32.totalorder %v965_v27, %v4430_v52  ;;  %vm974_vm12 = vcmp.gt.s32.totalorder %v967_v63, %v4435_v32 }
 0x12e   :  { %v973_v36 = vsel %vm972_vm14, %v965_v27, %v4430_v52  ;;  %v975_v40 = vsel %vm974_vm12, %v967_v63, %v4435_v32  ;;  %vm976_vm2 = vcmp.gt.s32.totalorder %v969_v24, %v4440_v56  ;;  %vm978_vm4 = vcmp.gt.s32.totalorder %v971_v28, %v4445_v58  ;;  %v3096_v63 = vld [vmem:[#allocation2 + $0xd4] sm:$0xf] }
 0x12f   :  { %v977_v54 = vsel %vm976_vm2, %v969_v24, %v4440_v56  ;;  %v979_v15 = vsel %vm978_vm4, %v971_v28, %v4445_v58  ;;  %vm980_vm13 = vcmp.gt.s32.totalorder %v973_v36, %v4450_v60  ;;  %vm982_vm7 = vcmp.gt.s32.totalorder %v975_v40, %v4455_v1 }
 0x130   :  { %v981_v55 = vsel %vm980_vm13, %v973_v36, %v4450_v60  ;;  %v983_v20 = vsel %vm982_vm7, %v975_v40, %v4455_v1  ;;  %vm984_vm5 = vcmp.gt.s32.totalorder %v977_v54, %v4460_v2  ;;  %vm986_vm1 = vcmp.gt.s32.totalorder %v979_v15, %v4465_v0 }
 0x131   :  { %v985_v52 = vsel %vm984_vm5, %v977_v54, %v4460_v2  ;;  %v987_v32 = vsel %vm986_vm1, %v979_v15, %v4465_v0  ;;  %vm988_vm8 = vcmp.gt.s32.totalorder %v981_v55, %v4470_v21  ;;  %vm990_vm10 = vcmp.gt.s32.totalorder %v983_v20, %v4475_v41  ;;  %v8400_v54 = vld [vmem:[#allocation63_spill] sm:$0xff] }
 0x132   :  { %v989_v56 = vsel %vm988_vm8, %v981_v55, %v4470_v21  ;;  %v991_v58 = vsel %vm990_vm10, %v983_v20, %v4475_v41  ;;  %vm992_vm9 = vcmp.gt.s32.totalorder %v985_v52, %v4480_v12  ;;  %vm994_vm0 = vcmp.gt.s32.totalorder %v987_v32, %v4485_v31  ;;  %v8401_v15 = vld [vmem:[#allocation67_spill] sm:$0xff] }
 0x133   :  { %v993_v60 = vsel %vm992_vm9, %v985_v52, %v4480_v12  ;;  %v995_v1 = vsel %vm994_vm0, %v987_v32, %v4485_v31  ;;  %vm996_vm3 = vcmp.gt.s32.totalorder %v989_v56, %v4490_v17  ;;  %vm998_vm15 = vcmp.gt.s32.totalorder %v991_v58, %v4495_v57  ;;  %v3094_v52 = vld [vmem:[#allocation2 + $0xcc] sm:$0xf] }
 0x134   :  { %v997_v2 = vsel %vm996_vm3, %v989_v56, %v4490_v17  ;;  %v999_v0 = vsel %vm998_vm15, %v991_v58, %v4495_v57  ;;  %vm1000_vm6 = vcmp.gt.s32.totalorder %v993_v60, %v4500_v14  ;;  %vm1002_vm11 = vcmp.gt.s32.totalorder %v995_v1, %v4505_v10  ;;  %v8405_v56 = vld [vmem:[#allocation66_spill] sm:$0xff] }
 0x135   :  { %v1001_v21 = vsel %vm1000_vm6, %v993_v60, %v4500_v14  ;;  %v1003_v41 = vsel %vm1002_vm11, %v995_v1, %v4505_v10  ;;  %vm1004_vm14 = vcmp.gt.s32.totalorder %v997_v2, %v4510_v29  ;;  %vm1006_vm12 = vcmp.gt.s32.totalorder %v999_v0, %v4515_v18 }
 0x136   :  { %v1005_v12 = vsel %vm1004_vm14, %v997_v2, %v4510_v29  ;;  %v1007_v31 = vsel %vm1006_vm12, %v999_v0, %v4515_v18  ;;  %vm1008_vm2 = vcmp.gt.s32.totalorder %v1001_v21, %v4520_v22  ;;  %vm1010_vm4 = vcmp.gt.s32.totalorder %v1003_v41, %v4525_v51 }
 0x137   :  { %v1009_v17 = vsel %vm1008_vm2, %v1001_v21, %v4520_v22  ;;  %v1011_v57 = vsel %vm1010_vm4, %v1003_v41, %v4525_v51  ;;  %vm1012_vm13 = vcmp.gt.s32.totalorder %v1005_v12, %v4530_v59  ;;  %vm1014_vm7 = vcmp.gt.s32.totalorder %v1007_v31, %v4535_v5 }
 0x138   :  { %v1013_v14 = vsel %vm1012_vm13, %v1005_v12, %v4530_v59  ;;  %v1015_v10 = vsel %vm1014_vm7, %v1007_v31, %v4535_v5  ;;  %vm1016_vm5 = vcmp.gt.s32.totalorder %v1009_v17, %v4540_v8  ;;  %vm1018_vm1 = vcmp.gt.s32.totalorder %v1011_v57, %v4545_v9 }
 0x139   :  { %v1017_v29 = vsel %vm1016_vm5, %v1009_v17, %v4540_v8  ;;  %v1019_v18 = vsel %vm1018_vm1, %v1011_v57, %v4545_v9  ;;  %vm1020_vm8 = vcmp.gt.s32.totalorder %v1013_v14, %v4550_v4  ;;  %vm1022_vm10 = vcmp.gt.s32.totalorder %v1015_v10, %v4555_v13 }
 0x13a   :  { %v1021_v22 = vsel %vm1020_vm8, %v1013_v14, %v4550_v4  ;;  %v1023_v51 = vsel %vm1022_vm10, %v1015_v10, %v4555_v13  ;;  %vm1024_vm9 = vcmp.gt.s32.totalorder %v1017_v29, %v4560_v23  ;;  %vm1026_vm0 = vcmp.gt.s32.totalorder %v1019_v18, %v4565_v3  ;;  %v8418_v14 = vld [vmem:[#allocation75_spill] sm:$0xff] }
 0x13b   :  { %v1025_v59 = vsel %vm1024_vm9, %v1017_v29, %v4560_v23  ;;  %v1027_v5 = vsel %vm1026_vm0, %v1019_v18, %v4565_v3  ;;  %vm1028_vm3 = vcmp.gt.s32.totalorder %v1021_v22, %v4570_v25  ;;  %vm1030_vm15 = vcmp.gt.s32.totalorder %v1023_v51, %v4575_v11  ;;  %v436_v29 = vpop.f32.mrf.mxu1 }
 0x13c   :  { %v8386_v8 = vand.u32 2147483647, %v3795_v35  ;;  %v1029_v4 = vsel %vm1028_vm3, %v1021_v22, %v4570_v25  ;;  %v1031_v13 = vsel %vm1030_vm15, %v1023_v51, %v4575_v11  ;;  %vm1032_vm11 = vcmp.gt.s32.totalorder %v1025_v59, %v4580_v37  ;;  %v394_v35 = vpop.f32.mrf.mxu0  ;;  %v8389_v25 = vld [vmem:[#allocation30_spill] sm:$0xff]  ;;  %v471_v11 = vpop.f32.mrf.mxu2 }
 0x13d   :  { %vm1034_vm14 = vcmp.gt.s32.totalorder %v1027_v5, %v4585_v44  ;;  %v1033_v23 = vsel %vm1032_vm11, %v1025_v59, %v4580_v37  ;;  %vm1036_vm12 = vcmp.gt.s32.totalorder %v1029_v4, %v4590_v38  ;;  %vm1038_vm2 = vcmp.gt.s32.totalorder %v1031_v13, %v4595_v61  ;;  %v4849_v51 = vld [vmem:[%s7760_s2] ss:$0 sm:$0xff] }
 0x13e   :  { %vm4729_vm6 = vcmp.eq.f32.partialorder %v8386_v8, inf  ;;  %v1035_v3 = vsel %vm1034_vm14, %v1027_v5, %v4585_v44  ;;  %v1037_v39 = vsel %vm1036_vm12, %v1029_v4, %v4590_v38  ;;  %v1039_v45 = vsel %vm1038_vm2, %v1031_v13, %v4595_v61  ;;  %v8391_v44 = vld [vmem:[#allocation18_spill] sm:$0xff]  ;;  %v8392_v38 = vld [vmem:[#allocation15_spill] sm:$0xff] }
 0x13f   :  { %vm1040_vm4 = vcmp.gt.s32.totalorder %v1033_v23, %v4600_v30  ;;  %vm1042_vm13 = vcmp.gt.s32.totalorder %v1035_v3, %v8389_v25  ;;  %vm1044_vm7 = vcmp.gt.s32.totalorder %v1037_v39, %v8390_v33  ;;  %vm1046_vm5 = vcmp.gt.s32.totalorder %v1039_v45, %v8391_v44 }
 0x140   :  { %v1041_v16 = vsel %vm1040_vm4, %v1033_v23, %v4600_v30  ;;  %v1043_v37 = vsel %vm1042_vm13, %v1035_v3, %v8389_v25  ;;  %v1045_v48 = vsel %vm1044_vm7, %v1037_v39, %v8390_v33  ;;  %v1047_v7 = vsel %vm1046_vm5, %v1039_v45, %v8391_v44  ;;  %v511_v23 = vpop.f32.mrf.mxu3  ;;  %v8430_v44 = vld [vmem:[#allocation17_spill] sm:$0xff] }
 0x141   :  { %vm1048_vm1 = vcmp.gt.s32.totalorder %v1041_v16, %v1043_v37  ;;  %v395_v61 = vadd.f32 %v8392_v38, %v394_v35  ;;  %vm1050_vm8 = vcmp.gt.s32.totalorder %v1045_v48, %v1047_v7  ;;  %v4753_v47 = vadd.f32 %v8392_v38, %v434_v19 }
 0x142   :  { %v1049_v49 = vsel %vm1048_vm1, %v1041_v16, %v1043_v37  ;;  %v4756_v30 = vadd.f32 %v8392_v38, %v471_v11  ;;  %v1051_v42 = vsel %vm1050_vm8, %v1045_v48, %v1047_v7  ;;  %v1784_v43 = vand.u32 2147483647, %v8393_v62  ;;  %v8429_v16 = vld [vmem:[#allocation76_spill] sm:$0xff] }
 0x143   :  { %v548_v53 = vmax.f32 %v395_v61, 0.0  ;;  %612 = vst [vmem:[#allocation7 + $0x20] sm:$0xff] %v395_v61  ;;  %vm1490_vm10 = vcmp.ne.f32.partialorder %v395_v61, %v395_v61  ;;  %v1769_v6 = vand.u32 2147483647, %v395_v61  ;;  %vm1052_vm9 = vcmp.gt.s32.totalorder %v1049_v49, %v1051_v42 }
 0x144   :  { %v8394_v46 = vmov 0   ;;  %v4763_v50 = vmax.f32 %v4753_v47, 0.0  ;;  %628 = vst [vmem:[#allocation7 + $0xa0] sm:$0xff] %v4753_v47  ;;  %v4766_v27 = vsel %vm1052_vm9, %v1049_v49, %v1051_v42  ;;  %vm1489_vm11 = vcmp.ne.f32.partialorder %v8400_v54, %v8400_v54  ;;  %v396_v21 = vpop.f32.mrf.mxu0  ;;  %v474_v25 = vpop.f32.mrf.mxu2  ;;  %v8432_v49 = vld [vmem:[#allocation19_spill] sm:$0xff] }
 0x145   :  { %v4760_v26 = vsel %vm1490_vm10, 1, %v8394_v46  ;;  %8396 = vst [vmem:[#allocation32_spill] sm:$0xff] %v4766_v27  ;;  %vm1833_vm3 = vcmp.eq.f32.partialorder %v1769_v6, inf  ;;  %vm2112_vm15 = vcmp.ne.f32.partialorder %v548_v53, %v548_v53  ;;  %v1055_v24 = vshra.s32 %v4766_v27, 16  ;;  %v5427_v6 = vld [vmem:[#allocation2 + $0xa8] sm:$0xf] }
 0x146   :  { %8395 = vst [vmem:[#allocation36_spill] sm:$0xff] %v4760_v26  ;;  %v4772_v28 = vsel %vm1833_vm3, 1, %v8394_v46  ;;  %v4775_v36 = vsel %vm2112_vm15, 1, %v8394_v46  ;;  %v2391_v40 = vand.u32 2147483647, %v548_v53  ;;  %v4789_v32 = vsel %vm4729_vm6, 1, %v8394_v46 }
 0x147   :  { %676 = vst [vmem:[#allocation8 + $0x20] sm:$0xff] %v548_v53  ;;  %v2406_v55 = vand.u32 2147483647, %v8401_v15  ;;  %vm2111_vm2 = vcmp.ne.f32.partialorder %v8405_v56, %v8405_v56  ;;  %v4793_v58 = vcvt.s32.f32 %v1055_v24  ;;  %v8407_v60 = vand.u32 2147483647, %v8400_v54 }
 0x148   :  { %8398 = vst [vmem:[#allocation37_spill] sm:$0xff] %v4772_v28  ;;  %vm2455_vm4 = vcmp.eq.f32.partialorder %v2391_v40, inf  ;;  %vm1505_vm7 = vcmp.ne.f32.partialorder %v8393_v62, %v8393_v62  ;;  %v4807_v0 = vmax.f32 %v4756_v30, 0.0  ;;  %v8411_v41 = vand.u32 2147483647, %v8405_v56  ;;  %v514_v31 = vpop.f32.mrf.mxu3 }
 0x149   :  { %8399 = vst [vmem:[#allocation33_spill] sm:$0xff] %v4775_v36  ;;  %vm4797_vm13 = vcmp.eq.f32.partialorder %v8407_v60, inf  ;;  %v4804_v2 = vsel %vm2455_vm4, 1, %v8394_v46  ;;  %vm4815_vm5 = vcmp.eq.f32.partialorder %v1784_v43, inf  ;;  %vm2127_vm1 = vcmp.ne.f32.partialorder %v8401_v15, %v8401_v15  ;;  %1058 = vmax.xlane.f32.xlu0 %v4793_v58  ;;  %v5447_v15 = vld [vmem:[#allocation2 + $0xb8] sm:$0xf] }
 0x14a   :  { %692 = vst [vmem:[#allocation8 + $0xa0] sm:$0xff] %v4763_v50  ;;  %vm4811_vm6 = vcmp.eq.f32.partialorder %v8411_v41, inf  ;;  %v4828_v57 = vsel %vm1489_vm11, 1, %v8394_v46  ;;  %vm2470_vm10 = vcmp.eq.f32.partialorder %v2406_v55, inf  ;;  %vm1520_vm9 = vcmp.ne.f32.partialorder %v8418_v14, %v8418_v14  ;;  %v3095_v28 = vld [vmem:[#allocation2 + $0xd0] sm:$0xf] }
 0x14b   :  { %643 = vst [vmem:[#allocation7 + $0x118] sm:$0xff] %v4756_v30  ;;  %v1799_v10 = vand.u32 2147483647, %v8418_v14  ;;  %v4838_v18 = vsel %vm2111_vm2, 1, %v8394_v46  ;;  %v4844_v22 = vsel %vm1505_vm7, 1, %v8394_v46  ;;  %v4852_v59 = vadd.f32 %v4849_v51, %v509_v34 }
 0x14c   :  { %8404 = vst [vmem:[#allocation38_spill] sm:$0xff] %v4789_v32  ;;  %v397_v5 = vadd.f32 %v4849_v51, %v396_v21  ;;  %v4858_v8 = vsel %vm4797_vm13, 1, %v8394_v46  ;;  %v4863_v9 = vsel %vm4811_vm6, 1, %v8394_v46  ;;  %v4868_v4 = vsel %vm4815_vm5, 1, %v8394_v46  ;;  %v5403_v14 = vld [vmem:[#allocation2 + $0x90] sm:$0xf] }
 0x14d   :  { %8406 = vst [vmem:[#allocation34_spill] sm:$0xff] %v4793_v58  ;;  %v4874_v13 = vsel %vm2127_vm1, 1, %v8394_v46  ;;  %v4877_v3 = vsel %vm2470_vm10, 1, %v8394_v46  ;;  %v4880_v35 = vsel %vm1520_vm9, 1, %v8394_v46  ;;  %v4883_v39 = vmax.f32 %v4852_v59, 0.0 }
 0x14e   :  { %8410 = vst [vmem:[#allocation39_spill] sm:$0xff] %v4804_v2  ;;  %v4887_v45 = vadd.f32 %v4849_v51, %v436_v29  ;;  %vm4889_vm3 = vcmp.eq.f32.partialorder %v1799_v10, inf  ;;  %vm1535_vm15 = vcmp.ne.f32.partialorder %v8429_v16, %v8429_v16  ;;  %v549_v37 = vmax.f32 %v397_v5, 0.0  ;;  %v399_v10 = vpop.f32.mrf.mxu0  ;;  %v5381_v58 = vld [vmem:[#allocation2 + $0x78] sm:$0xf] }
 0x14f   :  { %8417 = vst [vmem:[#allocation35_spill] sm:$0xff] %v4828_v57  ;;  %v4896_v33 = vadd.f32 %v4849_v51, %v474_v25  ;;  %vm2142_vm11 = vcmp.ne.f32.partialorder %v8430_v44, %v8430_v44  ;;  %vm1491_vm2 = vcmp.ne.f32.partialorder %v397_v5, %v397_v5  ;;  %v1770_v48 = vand.u32 2147483647, %v397_v5  ;;  %v5386_v57 = vld [vmem:[#allocation2 + $0x7c] sm:$0xf] }
 0x150   :  { %707 = vst [vmem:[#allocation8 + $0x118] sm:$0xff] %v4807_v0  ;;  %v4902_v7 = vadd.f32 %v4849_v51, %v511_v23  ;;  %v2421_v38 = vand.u32 2147483647, %v8430_v44  ;;  %v1814_v61 = vand.u32 2147483647, %v8429_v16  ;;  %v4907_v19 = vsel %vm1491_vm2, 1, %v8394_v46 }
 0x151   :  { %8419 = vst [vmem:[#allocation40_spill] sm:$0xff] %v4838_v18  ;;  %vm2113_vm4 = vcmp.ne.f32.partialorder %v549_v37, %v549_v37  ;;  %v2436_v42 = vand.u32 2147483647, %v8432_v49  ;;  %v1785_v53 = vand.u32 2147483647, %v4753_v47  ;;  %vm1834_vm7 = vcmp.eq.f32.partialorder %v1770_v48, inf }
 0x152   :  { %8420 = vst [vmem:[#allocation42_spill] sm:$0xff] %v4844_v22  ;;  %v4918_v34 = vsel %vm1535_vm15, 1, %v8394_v46  ;;  %v4921_v62 = vsel %vm1834_vm7, 1, %v8394_v46  ;;  %v4924_v43 = vsel %vm2113_vm4, 1, %v8394_v46  ;;  %v2392_v24 = vand.u32 2147483647, %v549_v37 }
 0x153   :  { %8421 = vst [vmem:[#allocation43_spill] sm:$0xff] %v4858_v8  ;;  %v2407_v40 = vand.u32 2147483647, %v4763_v50  ;;  %v4933_v55 = vmax.f32 %v4887_v45, 0.0  ;;  %v4939_v56 = vsel %vm4889_vm3, 1, %v8394_v46  ;;  %v4943_v1 = vmax.f32 %v4896_v33, 0.0 }
 0x154   :  { %8422 = vst [vmem:[#allocation44_spill] sm:$0xff] %v4863_v9  ;;  %v1800_v60 = vand.u32 2147483647, %v4756_v30  ;;  %vm2456_vm1 = vcmp.eq.f32.partialorder %v2392_v24, inf  ;;  %v4949_v21 = vsel %vm2142_vm11, 1, %v8394_v46  ;;  %vm4951_vm10 = vcmp.eq.f32.partialorder %v2421_v38, inf }
 0x155   :  { %8423 = vst [vmem:[#allocation46_spill] sm:$0xff] %v4868_v4  ;;  %vm2157_vm9 = vcmp.ne.f32.partialorder %v8432_v49, %v8432_v49  ;;  %v4958_v12 = vsel %vm2456_vm1, 1, %v8394_v46  ;;  %vm1878_vm3 = vcmp.eq.f32.partialorder %v1814_v61, inf  ;;  %vm4961_vm15 = vcmp.eq.f32.partialorder %v2436_v42, inf  ;;  %v439_v49 = vpop.f32.mrf.mxu1  ;;  %v476_v42 = vpop.f32.mrf.mxu2  ;;  %v5359_v8 = vld [vmem:[#allocation2 + $0x60] sm:$0xf] }
 0x156   :  { %8424 = vst [vmem:[#allocation53_spill] sm:$0xff] %v4874_v13  ;;  %vm1506_vm11 = vcmp.ne.f32.partialorder %v4753_v47, %v4753_v47  ;;  %vm1849_vm4 = vcmp.eq.f32.partialorder %v1785_v53, inf  ;;  %vm2128_vm7 = vcmp.ne.f32.partialorder %v4763_v50, %v4763_v50  ;;  %vm4972_vm1 = vcmp.eq.f32.partialorder %v2407_v40, inf  ;;  %v5364_v9 = vld [vmem:[#allocation2 + $0x64] sm:$0xf] }
 0x157   :  { %8425 = vst [vmem:[#allocation54_spill] sm:$0xff] %v4877_v3  ;;  %vm1521_vm5 = vcmp.ne.f32.partialorder %v4756_v30, %v4756_v30  ;;  %vm4978_vm6 = vcmp.eq.f32.partialorder %v1800_v60, inf  ;;  %vm2143_vm2 = vcmp.ne.f32.partialorder %v4807_v0, %v4807_v0  ;;  %v2422_v23 = vand.u32 2147483647, %v4807_v0 }
 0x158   :  { %8426 = vst [vmem:[#allocation30_spill] sm:$0xff] %v4880_v35  ;;  %v4986_v25 = vmax.f32 %v4902_v7, 0.0  ;;  %v4991_v50 = vsel %vm4951_vm10, 1, %v8394_v46  ;;  %v4994_v11 = vsel %vm1878_vm3, 1, %v8394_v46  ;;  %v5000_v16 = vsel %vm2157_vm9, 1, %v8394_v46 }
 0x159   :  { %658 = vst [vmem:[#allocation7 + $0x190] sm:$0xff] %v4852_v59  ;;  %v5006_v44 = vsel %vm4961_vm15, 1, %v8394_v46  ;;  %v5012_v48 = vsel %vm1506_vm11, 1, %v8394_v46  ;;  %v5015_v38 = vsel %vm1849_vm4, 1, %v8394_v46  ;;  %v5018_v61 = vsel %vm2128_vm7, 1, %v8394_v46 }
 0x15a   :  { %613 = vst [vmem:[#allocation7 + $0x28] sm:$0xff] %v397_v5  ;;  %v5024_v53 = vsel %vm4972_vm1, 1, %v8394_v46  ;;  %v5030_v47 = vsel %vm1521_vm5, 1, %v8394_v46  ;;  %v5035_v24 = vsel %vm4978_vm6, 1, %v8394_v46  ;;  %v5041_v40 = vsel %vm2143_vm2, 1, %v8394_v46 }
 0x15b   :  { %722 = vst [vmem:[#allocation8 + $0x190] sm:$0xff] %v4883_v39  ;;  %vm5043_vm10 = vcmp.eq.f32.partialorder %v2422_v23, inf  ;;  %v5052_v5 = vadd.f32 %v4849_v51, %v439_v49  ;;  %v5055_v0 = vadd.f32 %v4849_v51, %v476_v42  ;;  %v2437_v23 = vand.u32 2147483647, %v4883_v39 }
 0x15c   :  { %677 = vst [vmem:[#allocation8 + $0x28] sm:$0xff] %v549_v37  ;;  %v400_v37 = vadd.f32 %v4849_v51, %v399_v10  ;;  %v1815_v10 = vand.u32 2147483647, %v4852_v59  ;;  %vm1536_vm15 = vcmp.ne.f32.partialorder %v4852_v59, %v4852_v59  ;;  %v1786_v42 = vand.u32 2147483647, %v4887_v45 }
 0x15d   :  { %8431 = vst [vmem:[#allocation31_spill] sm:$0xff] %v4907_v19  ;;  %v5067_v49 = vmax.f32 %v5052_v5, 0.0  ;;  %vm2158_vm7 = vcmp.ne.f32.partialorder %v4883_v39, %v4883_v39  ;;  %v5085_v27 = vsel %vm5043_vm10, 1, %v8394_v46  ;;  %v401_v39 = vpop.f32.mrf.mxu0  ;;  %vm1522_vm10 = vcmp.ne.f32.partialorder %v4896_v33, %v4896_v33 }
 0x15e   :  { %629 = vst [vmem:[#allocation7 + $0xa8] sm:$0xff] %v4887_v45  ;;  %v550_v41 = vmax.f32 %v400_v37, 0.0  ;;  %vm1492_vm9 = vcmp.ne.f32.partialorder %v400_v37, %v400_v37  ;;  %v1771_v30 = vand.u32 2147483647, %v400_v37  ;;  %vm1879_vm4 = vcmp.eq.f32.partialorder %v1815_v10, inf }
 0x15f   :  { %8434 = vst [vmem:[#allocation18_spill] sm:$0xff] %v4918_v34  ;;  %v5049_v29 = vsel %vm1492_vm9, 1, %v8394_v46  ;;  %vm5087_vm9 = vcmp.eq.f32.partialorder %v2437_v23, inf  ;;  %v5095_v10 = vmax.f32 %v5055_v0, 0.0  ;;  %v5109_v60 = vsel %vm1536_vm15, 1, %v8394_v46 }
 0x160   :  { %8435 = vst [vmem:[#allocation15_spill] sm:$0xff] %v4921_v62  ;;  %vm1835_vm5 = vcmp.eq.f32.partialorder %v1771_v30, inf  ;;  %vm2114_vm3 = vcmp.ne.f32.partialorder %v550_v41, %v550_v41  ;;  %v5112_v23 = vsel %vm1879_vm4, 1, %v8394_v46  ;;  %v402_v59 = vadd.f32 %v4849_v51, %v401_v39  ;;  %v5408_v30 = vld [vmem:[#allocation2 + $0x94] sm:$0xf] }
 0x161   :  { %8436 = vst [vmem:[#allocation64_spill] sm:$0xff] %v4924_v43  ;;  %v5064_v32 = vsel %vm2114_vm3, 1, %v8394_v46  ;;  %vm2129_vm3 = vcmp.ne.f32.partialorder %v4933_v55, %v4933_v55  ;;  %v2423_v39 = vand.u32 2147483647, %v4943_v1  ;;  %vm2144_vm15 = vcmp.ne.f32.partialorder %v4943_v1, %v4943_v1  ;;  %v5414_v43 = vld [vmem:[#allocation2 + $0x9c] sm:$0xf] }
 0x162   :  { %644 = vst [vmem:[#allocation7 + $0x120] sm:$0xff] %v4896_v33  ;;  %v551_v4 = vmax.f32 %v402_v59, 0.0  ;;  %v1816_v34 = vand.u32 2147483647, %v4902_v7  ;;  %v1787_v22 = vand.u32 2147483647, %v5052_v5 }
 0x163   :  { %659 = vst [vmem:[#allocation7 + $0x198] sm:$0xff] %v4902_v7  ;;  %v5421_v62 = vld [vmem:[#allocation2 + $0xa0] sm:$0xf]  ;;  %v1130_v36 = vand.u32 2147450879, %v3094_v52 }
 0x164   :  { %8439 = vst [vmem:[#allocation63_spill] sm:$0xff] %v4939_v56 }
 0x165   :  { %8440 = vst [vmem:[#allocation67_spill] sm:$0xff] %v4949_v21 }
 0x166   :  { %8443 = vst [vmem:[#allocation66_spill] sm:$0xff] %v4958_v12 }
 0x167   :  { %693 = vst [vmem:[#allocation8 + $0xa8] sm:$0xff] %v4933_v55 }
 0x168   :  { %708 = vst [vmem:[#allocation8 + $0x120] sm:$0xff] %v4943_v1 }
 0x169   :  { %8451 = vst [vmem:[#allocation75_spill] sm:$0xff] %v4991_v50  ;;  %v2438_v50 = vand.u32 2147483647, %v4986_v25 }
 0x16a   :  { %8452 = vst [vmem:[#allocation76_spill] sm:$0xff] %v4994_v11 }
 0x16b   :  { %8453 = vst [vmem:[#allocation17_spill] sm:$0xff] %v5000_v16  ;;  %v2393_v16 = vand.u32 2147483647, %v550_v41 }
 0x16c   :  { %8454 = vst [vmem:[#allocation19_spill] sm:$0xff] %v5006_v44 }
 0x16d   :  { %8455 = vst [vmem:[#allocation77_spill] sm:$0xff] %v5012_v48  ;;  %vm2457_vm1 = vcmp.eq.f32.partialorder %v2393_v16, inf }
 0x16e   :  { %8456 = vst [vmem:[#allocation78_spill] sm:$0xff] %v5015_v38  ;;  %v5353_v38 = vld [vmem:[#allocation2 + $0x58] sm:$0xf] }
 0x16f   :  { %8457 = vst [vmem:[#allocation79_spill] sm:$0xff] %v5018_v61  ;;  %v5337_v61 = vld [vmem:[#allocation2 + $0x48] sm:$0xf] }
 0x170   :  { %723 = vst [vmem:[#allocation8 + $0x198] sm:$0xff] %v4986_v25 }
 0x171   :  { %8458 = vst [vmem:[#allocation80_spill] sm:$0xff] %v5024_v53 }
 0x172   :  { %8459 = vst [vmem:[#allocation81_spill] sm:$0xff] %v5030_v47  ;;  %v5120_v47 = vadd.f32 %v4849_v51, %v514_v31 }
 0x173   :  { %8460 = vst [vmem:[#allocation82_spill] sm:$0xff] %v5035_v24  ;;  %v5092_v24 = vsel %vm2457_vm1, 1, %v8394_v46  ;;  %vm1850_vm1 = vcmp.eq.f32.partialorder %v1786_v42, inf  ;;  %v5132_v42 = vsel %vm2129_vm3, 1, %v8394_v46  ;;  %vm2145_vm3 = vcmp.ne.f32.partialorder %v5095_v10, %v5095_v10 }
 0x174   :  { %8461 = vst [vmem:[#allocation83_spill] sm:$0xff] %v5041_v40  ;;  %v5138_v31 = vsel %vm1850_vm1, 1, %v8394_v46 }
 0x175   :  { %614 = vst [vmem:[#allocation7 + $0x30] sm:$0xff] %v400_v37  ;;  %v5061_v37 = vsel %vm1835_vm5, 1, %v8394_v46  ;;  %vm1507_vm5 = vcmp.ne.f32.partialorder %v4887_v45, %v4887_v45  ;;  %v5115_v45 = vsel %vm2158_vm7, 1, %v8394_v46  ;;  %vm1493_vm7 = vcmp.ne.f32.partialorder %v402_v59, %v402_v59 }
 0x176   :  { %8464 = vst [vmem:[#allocation84_spill] sm:$0xff] %v5049_v29 }
 0x177   :  { %678 = vst [vmem:[#allocation8 + $0x30] sm:$0xff] %v550_v41  ;;  %v2408_v41 = vand.u32 2147483647, %v4933_v55  ;;  %v441_v55 = vpop.f32.mrf.mxu1 }
 0x178   :  { %8466 = vst [vmem:[#allocation85_spill] sm:$0xff] %v5061_v37  ;;  %v5146_v40 = vadd.f32 %v4849_v51, %v441_v55  ;;  %v1772_v55 = vand.u32 2147483647, %v402_v59  ;;  %v5392_v37 = vld [vmem:[#allocation2 + $0x84] sm:$0xf] }
 0x179   :  { %8467 = vst [vmem:[#allocation86_spill] sm:$0xff] %v5064_v32  ;;  %vm2472_vm11 = vcmp.eq.f32.partialorder %v2408_v41, inf  ;;  %v5135_v41 = vsel %vm1522_vm10, 1, %v8394_v46 }
 0x17a   :  { %630 = vst [vmem:[#allocation7 + $0xb0] sm:$0xff] %v5052_v5  ;;  %v5149_v3 = vsel %vm2472_vm11, 1, %v8394_v46  ;;  %vm1537_vm11 = vcmp.ne.f32.partialorder %v4902_v7, %v4902_v7  ;;  %vm1836_vm10 = vcmp.eq.f32.partialorder %v1772_v55, inf  ;;  %v5197_v55 = vsel %vm2144_vm15, 1, %v8394_v46 }
 0x17b   :  { %645 = vst [vmem:[#allocation7 + $0x128] sm:$0xff] %v5055_v0  ;;  %v5218_v56 = vsel %vm1537_vm11, 1, %v8394_v46  ;;  %vm1880_vm15 = vcmp.eq.f32.partialorder %v1816_v34, inf  ;;  %vm1508_vm11 = vcmp.ne.f32.partialorder %v5052_v5, %v5052_v5  ;;  %v2424_v7 = vand.u32 2147483647, %v5095_v10 }
 0x17c   :  { %694 = vst [vmem:[#allocation8 + $0xb0] sm:$0xff] %v5067_v49  ;;  %v1817_v34 = vand.u32 2147483647, %v5120_v47  ;;  %v1788_v5 = vand.u32 2147483647, %v5146_v40  ;;  %vm1509_vm2 = vcmp.ne.f32.partialorder %v5146_v40, %v5146_v40 }
 0x17d   :  { %8470 = vst [vmem:[#allocation87_spill] sm:$0xff] %v5085_v27  ;;  %v1801_v27 = vand.u32 2147483647, %v4896_v33  ;;  %v516_v33 = vpop.f32.mrf.mxu3 }
 0x17e   :  { %8473 = vst [vmem:[#allocation88_spill] sm:$0xff] %v5092_v24  ;;  %v5162_v11 = vadd.f32 %v4849_v51, %v516_v33  ;;  %v2394_v33 = vand.u32 2147483647, %v551_v4  ;;  %v5397_v24 = vld [vmem:[#allocation2 + $0x88] sm:$0xf] }
 0x17f   :  { %8475 = vst [vmem:[#allocation89_spill] sm:$0xff] %v5109_v60  ;;  %v5126_v60 = vsel %vm5087_vm9, 1, %v8394_v46  ;;  %vm5156_vm4 = vcmp.eq.f32.partialorder %v1801_v27, inf  ;;  %vm2115_vm9 = vcmp.ne.f32.partialorder %v551_v4, %v551_v4 }
 0x180   :  { %8476 = vst [vmem:[#allocation90_spill] sm:$0xff] %v5112_v23  ;;  %v5129_v23 = vsel %vm1507_vm5, 1, %v8394_v46  ;;  %vm5170_vm5 = vcmp.eq.f32.partialorder %v2423_v39, inf  ;;  %v5185_v39 = vmax.f32 %v5146_v40, 0.0  ;;  %v5191_v21 = vsel %vm5156_vm4, 1, %v8394_v46 }
 0x181   :  { %8477 = vst [vmem:[#allocation91_spill] sm:$0xff] %v5115_v45  ;;  %v5142_v45 = vmax.f32 %v5120_v47, 0.0  ;;  %vm2458_vm4 = vcmp.eq.f32.partialorder %v2394_v33, inf  ;;  %v5212_v1 = vsel %vm5170_vm5, 1, %v8394_v46  ;;  %v1802_v33 = vand.u32 2147483647, %v5055_v0 }
 0x182   :  { %709 = vst [vmem:[#allocation8 + $0x128] sm:$0xff] %v5095_v10 }
 0x183   :  { %8478 = vst [vmem:[#allocation92_spill] sm:$0xff] %v5126_v60  ;;  %v479_v60 = vpop.f32.mrf.mxu2  ;;  %vm1866_vm5 = vcmp.eq.f32.partialorder %v1802_v33, inf  ;;  %v5279_v33 = vsel %vm2145_vm3, 1, %v8394_v46 }
 0x184   :  { %8479 = vst [vmem:[#allocation93_spill] sm:$0xff] %v5129_v23  ;;  %v5154_v13 = vadd.f32 %v4849_v51, %v479_v60  ;;  %v5168_v60 = vsel %vm1493_vm7, 1, %v8394_v46  ;;  %v5179_v51 = vsel %vm1836_vm10, 1, %v8394_v46  ;;  %vm2502_vm10 = vcmp.eq.f32.partialorder %v2438_v50, inf  ;;  %v3050_v23 = vld [vmem:[#allocation2 + $0x1c] sm:$0xf] }
 0x185   :  { %8480 = vst [vmem:[#allocation94_spill] sm:$0xff] %v5132_v42  ;;  %vm1851_vm7 = vcmp.eq.f32.partialorder %v1787_v22, inf  ;;  %v5240_v50 = vmax.f32 %v5162_v11, 0.0  ;;  %v5276_v10 = vsel %vm1866_vm5, 1, %v8394_v46 }
 0x186   :  { %8481 = vst [vmem:[#allocation95_spill] sm:$0xff] %v5135_v41  ;;  %v5224_v35 = vmax.f32 %v5154_v13, 0.0  ;;  %v5312_v41 = vld [vmem:[#allocation2 + $0x2c] sm:$0xf] }
 0x187   :  { %8482 = vst [vmem:[#allocation96_spill] sm:$0xff] %v5138_v31  ;;  %v3049_v31 = vld [vmem:[#allocation2 + $0x18] sm:$0xf]  ;;  %v8523_v29 = vand.u32 2147450879, %v5312_v41 }
 0x188   :  { %8483 = vst [vmem:[#allocation97_spill] sm:$0xff] %v5142_v45  ;;  %v1085_v42 = vand.u32 2147450879, %v3049_v31  ;;  %v5437_v41 = vld [vmem:[#allocation2 + $0xb0] sm:$0xf] }
 0x189   :  { %660 = vst [vmem:[#allocation7 + $0x1a0] sm:$0xff] %v5120_v47  ;;  %v5419_v54 = vunpack.c.l.bf16 %v8523_v29 }
 0x18a   :  { %8484 = vst [vmem:[#allocation98_spill] sm:$0xff] %v5149_v3  ;;  %v3048_v3 = vld [vmem:[#allocation2 + $0x14] sm:$0xf] }
 0x18b   :  { %615 = vst [vmem:[#allocation7 + $0x38] sm:$0xff] %v402_v59  ;;  %v5182_v59 = vsel %vm2115_vm9, 1, %v8394_v46  ;;  %vm2159_vm9 = vcmp.ne.f32.partialorder %v4986_v25, %v4986_v25  ;;  %v5221_v25 = vsel %vm2458_vm4, 1, %v8394_v46  ;;  %vm2130_vm4 = vcmp.ne.f32.partialorder %v5067_v49, %v5067_v49 }
 0x18c   :  { %8485 = vst [vmem:[#allocation99_spill] sm:$0xff] %v5154_v13  ;;  %v5230_v27 = vsel %vm2159_vm9, 1, %v8394_v46  ;;  %vm1523_vm9 = vcmp.ne.f32.partialorder %v5055_v0, %v5055_v0  ;;  %v5255_v22 = vsel %vm2130_vm4, 1, %v8394_v46  ;;  %vm2160_vm4 = vcmp.ne.f32.partialorder %v5142_v45, %v5142_v45 }
 0x18d   :  { %724 = vst [vmem:[#allocation8 + $0x1a0] sm:$0xff] %v5142_v45  ;;  %v5269_v0 = vsel %vm1523_vm9, 1, %v8394_v46 }
 0x18e   :  { %8488 = vst [vmem:[#allocation100_spill] sm:$0xff] %v5162_v11 }
 0x18f   :  { %679 = vst [vmem:[#allocation8 + $0x38] sm:$0xff] %v551_v4  ;;  %v2409_v4 = vand.u32 2147483647, %v5067_v49  ;;  %v5252_v49 = vsel %vm1508_vm11, 1, %v8394_v46  ;;  %vm1881_vm11 = vcmp.eq.f32.partialorder %v1817_v34, inf }
 0x190   :  { %8489 = vst [vmem:[#allocation101_spill] sm:$0xff] %v5168_v60  ;;  %v5370_v60 = vld [vmem:[#allocation2 + $0x6c] sm:$0xf] }
 0x191   :  { %631 = vst [vmem:[#allocation7 + $0xb8] sm:$0xff] %v5146_v40  ;;  %vm2473_vm1 = vcmp.eq.f32.partialorder %v2409_v4, inf  ;;  %v5261_v4 = vsel %vm1851_vm7, 1, %v8394_v46  ;;  %vm2131_vm7 = vcmp.ne.f32.partialorder %v5185_v39, %v5185_v39 }
 0x192   :  { %8492 = vst [vmem:[#allocation102_spill] sm:$0xff] %v5179_v51  ;;  %v5362_v51 = vunpack.c.l.bf16 %v1085_v42  ;;  %v5378_v42 = vld [vmem:[#allocation2 + $0x74] sm:$0xf] }
 0x193   :  { %8493 = vst [vmem:[#allocation103_spill] sm:$0xff] %v5182_v59  ;;  %v5375_v59 = vld [vmem:[#allocation2 + $0x70] sm:$0xf] }
 0x194   :  { %8494 = vst [vmem:[#allocation104_spill] sm:$0xff] %v5185_v39 }
 0x195   :  { %646 = vst [vmem:[#allocation7 + $0x130] sm:$0xff] %v5154_v13 }
 0x196   :  { %8495 = vst [vmem:[#allocation105_spill] sm:$0xff] %v5191_v21 }
 0x197   :  { %8496 = vst [vmem:[#allocation106_spill] sm:$0xff] %v5197_v55  ;;  %v3052_v55 = vld [vmem:[#allocation2 + $0x24] sm:$0xf] }
 0x198   :  { %661 = vst [vmem:[#allocation7 + $0x1a8] sm:$0xff] %v5162_v11  ;;  %v5453_v11 = vld [vmem:[#allocation2 + $0xc0] sm:$0xf] }
 0x199   :  { %695 = vst [vmem:[#allocation8 + $0xb8] sm:$0xff] %v5185_v39 }
 0x19a   :  { %8497 = vst [vmem:[#allocation107_spill] sm:$0xff] %v5212_v1  ;;  %v3051_v1 = vld [vmem:[#allocation2 + $0x20] sm:$0xf] }
 0x19b   :  { %8498 = vst [vmem:[#allocation108_spill] sm:$0xff] %v5218_v56  ;;  %v5243_v56 = vsel %vm1880_vm15, 1, %v8394_v46  ;;  %vm2488_vm15 = vcmp.eq.f32.partialorder %v2424_v7, inf  ;;  %v1087_v34 = vand.u32 2147450879, %v3051_v1 }
 0x19c   :  { %8499 = vst [vmem:[#allocation109_spill] sm:$0xff] %v5221_v25  ;;  %v5323_v1 = vld [vmem:[#allocation2 + $0x38] sm:$0xf]  ;;  %v5348_v25 = vld [vmem:[#allocation2 + $0x54] sm:$0xf] }
 0x19d   :  { %8500 = vst [vmem:[#allocation110_spill] sm:$0xff] %v5224_v35  ;;  %v5384_v32 = vunpack.c.l.bf16 %v1087_v34  ;;  %v5400_v34 = vld [vmem:[#allocation2 + $0x8c] sm:$0xf]  ;;  %v8529_v17 = vand.u32 2147450879, %v5323_v1 }
 0x19e   :  { %8501 = vst [vmem:[#allocation111_spill] sm:$0xff] %v5230_v27  ;;  %v5246_v27 = vsel %vm2502_vm10, 1, %v8394_v46  ;;  %vm1538_vm10 = vcmp.ne.f32.partialorder %v5120_v47, %v5120_v47  ;;  %v5284_v47 = vsel %vm2488_vm15, 1, %v8394_v46  ;;  %v1132_v1 = vand.u32 2147450879, %v3096_v63 }
 0x19f   :  { %710 = vst [vmem:[#allocation8 + $0x130] sm:$0xff] %v5224_v35  ;;  %v5287_v7 = vsel %vm1538_vm10, 1, %v8394_v46  ;;  %v5440_v35 = vld [vmem:[#allocation2 + $0xb4] sm:$0xf]  ;;  %v5458_v2 = vunpack.c.l.bf16 %v8529_v17  ;;  %v3097_v17 = vld [vmem:[#allocation2 + $0xd8] sm:$0xf] }
 0x1a0   :  { %8502 = vst [vmem:[#allocation112_spill] sm:$0xff] %v5240_v50  ;;  %v1133_v26 = vand.u32 2147450879, %v3097_v17 }
 0x1a1   :  { %8503 = vst [vmem:[#allocation113_spill] sm:$0xff] %v5243_v56  ;;  %v3043_v56 = vld [vmem:[#allocation2] sm:$0xf] }
 0x1a2   :  { %8504 = vst [vmem:[#allocation114_spill] sm:$0xff] %v5246_v27  ;;  %v5264_v27 = vsel %vm2473_vm1, 1, %v8394_v46  ;;  %vm1852_vm1 = vcmp.eq.f32.partialorder %v1788_v5, inf  ;;  %v1079_v40 = vand.u32 2147450879, %v3043_v56  ;;  %v5297_v5 = vsel %vm1509_vm2, 1, %v8394_v46 }
 0x1a3   :  { %8505 = vst [vmem:[#allocation115_spill] sm:$0xff] %v5252_v49  ;;  %v3045_v56 = vld [vmem:[#allocation2 + $0x8] sm:$0xf] }
 0x1a4   :  { %8506 = vst [vmem:[#allocation116_spill] sm:$0xff] %v5255_v22  ;;  %v5294_v22 = vsel %vm2160_vm4, 1, %v8394_v46  ;;  %v1081_v45 = vand.u32 2147450879, %v3045_v56  ;;  %v1088_v56 = vand.u32 2147450879, %v3052_v55 }
 0x1a5   :  { %725 = vst [vmem:[#allocation8 + $0x1a8] sm:$0xff] %v5240_v50  ;;  %v5342_v55 = vld [vmem:[#allocation2 + $0x4c] sm:$0xf] }
 0x1a6   :  { %8507 = vst [vmem:[#allocation117_spill] sm:$0xff] %v5261_v4  ;;  %v3044_v4 = vld [vmem:[#allocation2 + $0x4] sm:$0xf]  ;;  %v5318_v31 = vunpack.c.l.bf16 %v1081_v45  ;;  %v5395_v44 = vunpack.c.l.bf16 %v1088_v56  ;;  %v5411_v56 = vld [vmem:[#allocation2 + $0x98] sm:$0xf] }
 0x1a7   :  { %8508 = vst [vmem:[#allocation118_spill] sm:$0xff] %v5264_v27  ;;  %v5291_v27 = vsel %vm1881_vm11, 1, %v8394_v46  ;;  %v1080_v49 = vand.u32 2147450879, %v3044_v4  ;;  %v1084_v4 = vand.u32 2147450879, %v3048_v3 }
 0x1a8   :  { %8509 = vst [vmem:[#allocation119_spill] sm:$0xff] %v5269_v0  ;;  %v3047_v0 = vld [vmem:[#allocation2 + $0x10] sm:$0xf]  ;;  %v5334_v45 = vld [vmem:[#allocation2 + $0x44] sm:$0xf]  ;;  %vm1209_vm5 = vcmp.eq.f32.partialorder %v5318_v31, inf }
 0x1a9   :  { %8510 = vst [vmem:[#allocation120_spill] sm:$0xff] %v5276_v10  ;;  %v5310_v21 = vunpack.c.l.bf16 %v1080_v49  ;;  %v5326_v49 = vld [vmem:[#allocation2 + $0x3c] sm:$0xf]  ;;  %v5351_v18 = vunpack.c.l.bf16 %v1084_v4  ;;  %v5367_v4 = vld [vmem:[#allocation2 + $0x68] sm:$0xf] }
 0x1aa   :  { %8511 = vst [vmem:[#allocation121_spill] sm:$0xff] %v5279_v33  ;;  %v5434_v3 = vld [vmem:[#allocation2 + $0xac] sm:$0xf]  ;;  %v8531_v29 = vand.u32 2147450879, %v5326_v49 }
 0x1ab   :  { %8512 = vst [vmem:[#allocation122_spill] sm:$0xff] %v5284_v47  ;;  %v5300_v47 = vsel %vm1852_vm1, 1, %v8394_v46  ;;  %v8535_v49 = vand.u32 2147450879, %v5334_v45  ;;  %v8538_v45 = vand.u32 2147450879, %v5342_v55 }
 0x1ac   :  { %8513 = vst [vmem:[#allocation123_spill] sm:$0xff] %v5287_v7  ;;  %v5303_v7 = vsel %vm2131_vm7, 1, %v8394_v46  ;;  %v5468_v20 = vunpack.c.l.bf16 %v8531_v29  ;;  %vm1208_vm3 = vcmp.eq.f32.partialorder %v5310_v21, inf  ;;  %vm1212_vm10 = vcmp.eq.f32.partialorder %v5351_v18, inf }
 0x1ad   :  { %8514 = vst [vmem:[#allocation124_spill] sm:$0xff] %v5291_v27  ;;  %v3053_v27 = vld [vmem:[#allocation2 + $0x28] sm:$0xf]  ;;  %v5476_v29 = vunpack.c.l.bf16 %v8535_v49  ;;  %v5484_v49 = vunpack.c.l.bf16 %v8538_v45 }
 0x1ae   :  { %8515 = vst [vmem:[#allocation125_spill] sm:$0xff] %v5294_v22  ;;  %v3046_v22 = vld [vmem:[#allocation2 + $0xc] sm:$0xf]  ;;  %v1089_v33 = vand.u32 2147450879, %v3053_v27 }
 0x1af   :  { %8516 = vst [vmem:[#allocation126_spill] sm:$0xff] %v5297_v5  ;;  %v1082_v10 = vand.u32 2147450879, %v3046_v22  ;;  %v1083_v5 = vand.u32 2147450879, %v3047_v0 }
 0x1b0   :  { %8517 = vst [vmem:[#allocation127_spill] sm:$0xff] %v5300_v47  ;;  %v5308_v47 = vunpack.c.l.bf16 %v1079_v40  ;;  %v5315_v0 = vld [vmem:[#allocation2 + $0x30] sm:$0xf]  ;;  %v5320_v40 = vld [vmem:[#allocation2 + $0x34] sm:$0xf]  ;;  %v5406_v12 = vunpack.c.l.bf16 %v1089_v33 }
 0x1b1   :  { %8518 = vst [vmem:[#allocation128_spill] sm:$0xff] %v5303_v7  ;;  %v1086_v7 = vand.u32 2147450879, %v3050_v23  ;;  %v5329_v53 = vunpack.c.l.bf16 %v1082_v10  ;;  %v5331_v22 = vld [vmem:[#allocation2 + $0x40] sm:$0xf]  ;;  %v5340_v48 = vunpack.c.l.bf16 %v1083_v5 }
 0x1b2   :  { %v5345_v10 = vld [vmem:[#allocation2 + $0x50] sm:$0xf]  ;;  %v5356_v5 = vld [vmem:[#allocation2 + $0x5c] sm:$0xf]  ;;  %8520 = vst [vmem:[#allocation130_spill] sm:$0xff] %v5384_v32  ;;  %vm1207_vm2 = vcmp.eq.f32.partialorder %v5308_v47, inf }
 0x1b3   :  { %v5373_v16 = vunpack.c.l.bf16 %v1086_v7  ;;  %v5389_v7 = vld [vmem:[#allocation2 + $0x80] sm:$0xf]  ;;  %8521 = vst [vmem:[#allocation131_spill] sm:$0xff] %v5395_v44  ;;  %v5424_v23 = vld [vmem:[#allocation2 + $0xa4] sm:$0xf]  ;;  %vm1210_vm9 = vcmp.eq.f32.partialorder %v5329_v53, inf }
 0x1b4   :  { %8522 = vst [vmem:[#allocation132_spill] sm:$0xff] %v5406_v12  ;;  %v8525_v19 = vand.u32 2147450879, %v5315_v0  ;;  %v8527_v13 = vand.u32 2147450879, %v5320_v40  ;;  %vm1211_vm15 = vcmp.eq.f32.partialorder %v5340_v48, inf }
 0x1b5   :  { %8519 = vst [vmem:[#allocation129_spill] sm:$0xff] %v5373_v16  ;;  %v5450_v0 = vld [vmem:[#allocation2 + $0xbc] sm:$0xf]  ;;  %v5460_v27 = vld [vmem:[#allocation2 + $0xc4] sm:$0xf] }
 0x1b6   :  { %8524 = vst [vmem:[#allocation133_spill] sm:$0xff] %v5419_v54  ;;  %v5432_v50 = vunpack.c.l.bf16 %v8525_v19  ;;  %v5445_v39 = vunpack.c.l.bf16 %v8527_v13  ;;  %v1128_v13 = vand.u32 2147450879, %v5460_v27  ;;  %v5463_v40 = vld [vmem:[#allocation2 + $0xc8] sm:$0xf] }
 0x1b7   :  { %8530 = vst [vmem:[#allocation136_spill] sm:$0xff] %v5458_v2  ;;  %v1129_v19 = vand.u32 2147450879, %v5463_v40  ;;  %v1131_v33 = vand.u32 2147450879, %v3095_v28 }
 0x1b8   :  { %8526 = vst [vmem:[#allocation134_spill] sm:$0xff] %v5432_v50  ;;  %v8533_v46 = vand.u32 2147450879, %v5331_v22  ;;  %v3098_v27 = vld [vmem:[#allocation2 + $0xdc] sm:$0xf] }
 0x1b9   :  { %8528 = vst [vmem:[#allocation135_spill] sm:$0xff] %v5445_v39  ;;  %v1134_v39 = vand.u32 2147450879, %v3098_v27  ;;  %v3099_v50 = vld [vmem:[#allocation2 + $0xe0] sm:$0xf] }
 0x1ba   :  { %8532 = vst [vmem:[#allocation137_spill] sm:$0xff] %v5468_v20  ;;  %v5472_v2 = vunpack.c.l.bf16 %v8533_v46  ;;  %v1135_v40 = vand.u32 2147450879, %v3099_v50  ;;  %v3100_v54 = vld [vmem:[#allocation2 + $0xe4] sm:$0xf] }
 0x1bb   :  { %v1136_v52 = vand.u32 2147450879, %v3100_v54  ;;  %8536 = vst [vmem:[#allocation139_spill] sm:$0xff] %v5476_v29  ;;  %v3101_v20 = vld [vmem:[#allocation2 + $0xe8] sm:$0xf] }
 0x1bc   :  { %8534 = vst [vmem:[#allocation138_spill] sm:$0xff] %v5472_v2  ;;  %v1137_v28 = vand.u32 2147450879, %v3101_v20  ;;  %v3102_v12 = vld [vmem:[#allocation2 + $0xec] sm:$0xf] }
 0x1bd   :  { %v1138_v63 = vand.u32 2147450879, %v3102_v12  ;;  %v3103_v44 = vld [vmem:[#allocation2 + $0xf0] sm:$0xf]  ;;  %v8537_v22 = vand.u32 2147450879, %v5337_v61 }
 0x1be   :  { %v1139_v17 = vand.u32 2147450879, %v3103_v44  ;;  %v3104_v2 = vld [vmem:[#allocation2 + $0xf4] sm:$0xf]  ;;  %v3105_v32 = vld [vmem:[#allocation2 + $0xf8] sm:$0xf] }
 0x1bf   :  { %v5480_v46 = vunpack.c.l.bf16 %v8537_v22  ;;  %v1140_v27 = vand.u32 2147450879, %v3104_v2  ;;  %v1141_v50 = vand.u32 2147450879, %v3105_v32  ;;  %v3106_v16 = vld [vmem:[#allocation2 + $0xfc] sm:$0xf] }
 0x1c0   :  { %v1142_v54 = vand.u32 2147450879, %v3106_v16  ;;  %v8539_v20 = vand.u32 2147450879, %v5345_v10  ;;  %v8540_v12 = vand.u32 2147450879, %v5348_v25 }
 0x1c1   :  { %v8541_v61 = vand.u32 2147450879, %v5353_v38  ;;  %v8542_v32 = vand.u32 2147450879, %v5356_v5  ;;  %v8543_v16 = vand.u32 2147450879, %v5359_v8 }
 0x1c2   :  { %v5488_v29 = vunpack.c.l.bf16 %v8539_v20  ;;  %v5492_v44 = vunpack.c.l.bf16 %v8540_v12  ;;  %v8544_v10 = vand.u32 2147450879, %v5364_v9  ;;  %v8545_v25 = vand.u32 2147450879, %v5367_v4 }
 0x1c3   :  { %v5496_v22 = vunpack.c.l.bf16 %v8541_v61  ;;  %v5500_v2 = vunpack.c.l.bf16 %v8542_v32  ;;  %v5504_v55 = vunpack.c.l.bf16 %v8543_v16  ;;  %v8546_v38 = vand.u32 2147450879, %v5370_v60 }
 0x1c4   :  { %v5508_v45 = vunpack.c.l.bf16 %v8544_v10  ;;  %v5512_v20 = vunpack.c.l.bf16 %v8545_v25  ;;  %v8547_v5 = vand.u32 2147450879, %v5375_v59  ;;  %v8548_v8 = vand.u32 2147450879, %v5378_v42 }
 0x1c5   :  { %v5516_v12 = vunpack.c.l.bf16 %v8546_v38  ;;  %v8549_v9 = vand.u32 2147450879, %v5381_v58  ;;  %v8550_v4 = vand.u32 2147450879, %v5386_v57  ;;  %v8551_v60 = vand.u32 2147450879, %v5389_v7 }
 0x1c6   :  { %v5520_v61 = vunpack.c.l.bf16 %v8547_v5  ;;  %v5524_v32 = vunpack.c.l.bf16 %v8548_v8  ;;  %v8552_v59 = vand.u32 2147450879, %v5392_v37  ;;  %v8553_v42 = vand.u32 2147450879, %v5397_v24 }
 0x1c7   :  { %v5528_v16 = vunpack.c.l.bf16 %v8549_v9  ;;  %v5532_v10 = vunpack.c.l.bf16 %v8550_v4  ;;  %v5536_v25 = vunpack.c.l.bf16 %v8551_v60  ;;  %v8554_v58 = vand.u32 2147450879, %v5400_v34 }
 0x1c8   :  { %v5540_v38 = vunpack.c.l.bf16 %v8552_v59  ;;  %v5544_v5 = vunpack.c.l.bf16 %v8553_v42  ;;  %v8555_v57 = vand.u32 2147450879, %v5403_v14  ;;  %v8556_v7 = vand.u32 2147450879, %v5408_v30 }
 0x1c9   :  { %v5548_v8 = vunpack.c.l.bf16 %v8554_v58  ;;  %v8558_v37 = vand.u32 2147450879, %v5411_v56  ;;  %v8559_v24 = vand.u32 2147450879, %v5414_v43  ;;  %v8561_v34 = vand.u32 2147450879, %v5421_v62 }
 0x1ca   :  { %v5552_v9 = vunpack.c.l.bf16 %v8555_v57  ;;  %v5556_v4 = vunpack.c.l.bf16 %v8556_v7  ;;  %v8562_v14 = vand.u32 2147450879, %v5424_v23  ;;  %v8564_v30 = vand.u32 2147450879, %v5427_v6 }
 0x1cb   :  { %v5560_v60 = vunpack.c.l.bf16 %v8558_v37  ;;  %v5564_v59 = vunpack.c.l.bf16 %v8559_v24  ;;  %v5568_v42 = vunpack.c.l.bf16 %v8561_v34  ;;  %v8565_v56 = vand.u32 2147450879, %v5434_v3 }
 0x1cc   :  { %8557 = vst [vmem:[#allocation140_spill] sm:$0xff] %v5556_v4  ;;  %v5572_v58 = vunpack.c.l.bf16 %v8562_v14  ;;  %v5576_v57 = vunpack.c.l.bf16 %v8564_v30  ;;  %v8566_v43 = vand.u32 2147450879, %v5437_v41  ;;  %v8568_v62 = vand.u32 2147450879, %v5440_v35 }
 0x1cd   :  { %8560 = vst [vmem:[#allocation141_spill] sm:$0xff] %v5564_v59  ;;  %v5580_v7 = vunpack.c.l.bf16 %v8565_v56  ;;  %v8569_v23 = vand.u32 2147450879, %v5447_v15  ;;  %v8571_v6 = vand.u32 2147450879, %v5450_v0  ;;  %v5602_v56 = vunpack.c.l.bf16 %v1128_v13 }
 0x1ce   :  { %8563 = vst [vmem:[#allocation142_spill] sm:$0xff] %v5572_v58  ;;  %v5584_v37 = vunpack.c.l.bf16 %v8566_v43  ;;  %v5588_v24 = vunpack.c.l.bf16 %v8568_v62  ;;  %v8572_v3 = vand.u32 2147450879, %v5453_v11  ;;  %v5604_v41 = vunpack.c.l.bf16 %v1129_v19 }
 0x1cf   :  { %v5592_v34 = vunpack.c.l.bf16 %v8569_v23  ;;  %v5596_v14 = vunpack.c.l.bf16 %v8571_v6  ;;  %v5606_v43 = vunpack.c.l.bf16 %v1130_v36  ;;  %v5608_v35 = vunpack.c.l.bf16 %v1131_v33 }
 0x1d0   :  { %8567 = vst [vmem:[#allocation143_spill] sm:$0xff] %v5584_v37  ;;  %v5600_v30 = vunpack.c.l.bf16 %v8572_v3  ;;  %v5610_v62 = vunpack.c.l.bf16 %v1132_v1  ;;  %v5612_v15 = vunpack.c.l.bf16 %v1133_v26  ;;  %v5614_v23 = vunpack.c.l.bf16 %v1134_v39  ;;  %v8573_v26 = vld [vmem:[#allocation129_spill] sm:$0xff]  ;;  %v8574_v39 = vld [vmem:[#allocation130_spill] sm:$0xff]  ;;  %v8583_v3 = vld [vmem:[#allocation139_spill] sm:$0xff] }
 0x1d1   :  { %8570 = vst [vmem:[#allocation144_spill] sm:$0xff] %v5592_v34  ;;  %v5616_v0 = vunpack.c.l.bf16 %v1135_v40  ;;  %v5618_v6 = vunpack.c.l.bf16 %v1136_v52  ;;  %v5620_v11 = vunpack.c.l.bf16 %v1137_v28  ;;  %v5622_v13 = vunpack.c.l.bf16 %v1138_v63  ;;  %v8575_v40 = vld [vmem:[#allocation131_spill] sm:$0xff]  ;;  %v8576_v52 = vld [vmem:[#allocation132_spill] sm:$0xff]  ;;  %v8577_v28 = vld [vmem:[#allocation133_spill] sm:$0xff] }
 0x1d2   :  { %v5624_v19 = vunpack.c.l.bf16 %v1139_v17  ;;  %v5626_v36 = vunpack.c.l.bf16 %v1140_v27  ;;  %v5628_v33 = vunpack.c.l.bf16 %v1141_v50  ;;  %v5630_v1 = vunpack.c.l.bf16 %v1142_v54  ;;  %v8578_v63 = vld [vmem:[#allocation134_spill] sm:$0xff]  ;;  %v8579_v17 = vld [vmem:[#allocation135_spill] sm:$0xff]  ;;  %v8580_v27 = vld [vmem:[#allocation136_spill] sm:$0xff] }
 0x1d3   :  { %v8581_v50 = vld [vmem:[#allocation137_spill] sm:$0xff]  ;;  %v8582_v54 = vld [vmem:[#allocation138_spill] sm:$0xff]  ;;  %vm1245_vm1 = vcmp.eq.f32.partialorder %v5560_v60, inf  ;;  %vm1246_vm7 = vcmp.eq.f32.partialorder %v5564_v59, inf  ;;  %vm1247_vm6 = vcmp.eq.f32.partialorder %v5568_v42, inf  ;;  %vm1248_vm13 = vcmp.eq.f32.partialorder %v5572_v58, inf }
 0x1d4   :  { %vm1249_vm8 = vcmp.eq.f32.partialorder %v5576_v57, inf  ;;  %vm1250_vm12 = vcmp.eq.f32.partialorder %v5580_v7, inf  ;;  %vm1251_vm14 = vcmp.eq.f32.partialorder %v5584_v37, inf  ;;  %v8584_v4 = vmov 0  }
 0x1d5   :  { %v5683_v59 = vsel %vm1207_vm2, 1, %v8584_v4  ;;  %v5688_v58 = vsel %vm1208_vm3, 1, %v8584_v4  ;;  %v5693_v37 = vsel %vm1209_vm5, 1, %v8584_v4  ;;  %v5698_v34 = vsel %vm1210_vm9, 1, %v8584_v4 }
 0x1d6   :  { %vm1255_vm4 = vcmp.eq.f32.partialorder %v5600_v30, inf  ;;  %vm1256_vm2 = vcmp.eq.f32.partialorder %v5602_v56, inf  ;;  %v5707_v21 = vsel %vm1211_vm15, 1, %v8584_v4  ;;  %v5712_v47 = vsel %vm1212_vm10, 1, %v8584_v4 }
 0x1d7   :  { %vm8585_vm3 = vcmp.eq.f32.partialorder %v5362_v51, inf  ;;  %vm8586_vm5 = vcmp.eq.f32.partialorder %v8573_v26, inf  ;;  %vm8587_vm10 = vcmp.eq.f32.partialorder %v8574_v39, inf  ;;  %vm8590_vm0 = vcmp.eq.f32.partialorder %v8577_v28, inf }
 0x1d8   :  { %v5717_v53 = vsel %vm8585_vm3, 1, %v8584_v4  ;;  %v5722_v31 = vsel %vm8586_vm5, 1, %v8584_v4  ;;  %v5731_v18 = vsel %vm8587_vm10, 1, %v8584_v4  ;;  %vm8588_vm3 = vcmp.eq.f32.partialorder %v8575_v40, inf }
 0x1d9   :  { %v5736_v48 = vsel %vm8588_vm3, 1, %v8584_v4  ;;  %vm8589_vm5 = vcmp.eq.f32.partialorder %v8576_v52, inf  ;;  %v5746_v26 = vsel %vm8590_vm0, 1, %v8584_v4  ;;  %vm8591_vm3 = vcmp.eq.f32.partialorder %v8578_v63, inf }
 0x1da   :  { %v5741_v51 = vsel %vm8589_vm5, 1, %v8584_v4  ;;  %v5755_v39 = vsel %vm8591_vm3, 1, %v8584_v4  ;;  %vm8592_vm5 = vcmp.eq.f32.partialorder %v8579_v17, inf  ;;  %vm8593_vm0 = vcmp.eq.f32.partialorder %v8580_v27, inf }
 0x1db   :  { %v5760_v40 = vsel %vm8592_vm5, 1, %v8584_v4  ;;  %v5765_v52 = vsel %vm8593_vm0, 1, %v8584_v4  ;;  %vm8594_vm15 = vcmp.eq.f32.partialorder %v8581_v50, inf  ;;  %vm1267_vm9 = vcmp.eq.f32.partialorder %v5624_v19, inf }
 0x1dc   :  { %v5770_v28 = vsel %vm8594_vm15, 1, %v8584_v4  ;;  %vm1268_vm3 = vcmp.eq.f32.partialorder %v5626_v36, inf  ;;  %vm8595_vm5 = vcmp.eq.f32.partialorder %v8582_v54, inf  ;;  %vm8596_vm0 = vcmp.eq.f32.partialorder %v8583_v3, inf }
 0x1dd   :  { %v5779_v63 = vsel %vm8595_vm5, 1, %v8584_v4  ;;  %v5784_v17 = vsel %vm8596_vm0, 1, %v8584_v4  ;;  %vm8597_vm15 = vcmp.eq.f32.partialorder %v5480_v46, inf  ;;  %vm8598_vm10 = vcmp.eq.f32.partialorder %v5484_v49, inf }
 0x1de   :  { %v5789_v27 = vsel %vm8597_vm15, 1, %v8584_v4  ;;  %v5794_v50 = vsel %vm8598_vm10, 1, %v8584_v4  ;;  %vm8599_vm11 = vcmp.eq.f32.partialorder %v5488_v29, inf  ;;  %vm8600_vm5 = vcmp.eq.f32.partialorder %v5492_v44, inf }
 0x1df   :  { %v5799_v54 = vsel %vm8599_vm11, 1, %v8584_v4  ;;  %v5804_v3 = vsel %vm8600_vm5, 1, %v8584_v4  ;;  %vm8601_vm0 = vcmp.eq.f32.partialorder %v5496_v22, inf  ;;  %vm8602_vm15 = vcmp.eq.f32.partialorder %v5500_v2, inf }
 0x1e0   :  { %v5809_v46 = vsel %vm8601_vm0, 1, %v8584_v4  ;;  %v5814_v49 = vsel %vm8602_vm15, 1, %v8584_v4  ;;  %vm8603_vm10 = vcmp.eq.f32.partialorder %v5504_v55, inf  ;;  %vm8604_vm11 = vcmp.eq.f32.partialorder %v5508_v45, inf }
 0x1e1   :  { %v5819_v29 = vsel %vm8603_vm10, 1, %v8584_v4  ;;  %v5824_v44 = vsel %vm8604_vm11, 1, %v8584_v4  ;;  %vm8605_vm5 = vcmp.eq.f32.partialorder %v5512_v20, inf  ;;  %vm8606_vm0 = vcmp.eq.f32.partialorder %v5516_v12, inf }
 0x1e2   :  { %v5829_v22 = vsel %vm8605_vm5, 1, %v8584_v4  ;;  %v5834_v2 = vsel %vm8606_vm0, 1, %v8584_v4  ;;  %vm8607_vm15 = vcmp.eq.f32.partialorder %v5520_v61, inf  ;;  %vm8608_vm10 = vcmp.eq.f32.partialorder %v5524_v32, inf }
 0x1e3   :  { %v5839_v55 = vsel %vm8607_vm15, 1, %v8584_v4  ;;  %v5844_v45 = vsel %vm8608_vm10, 1, %v8584_v4  ;;  %vm8609_vm11 = vcmp.eq.f32.partialorder %v5528_v16, inf  ;;  %vm8610_vm5 = vcmp.eq.f32.partialorder %v5532_v10, inf }
 0x1e4   :  { %v5849_v20 = vsel %vm8609_vm11, 1, %v8584_v4  ;;  %v5854_v12 = vsel %vm8610_vm5, 1, %v8584_v4  ;;  %vm8611_vm0 = vcmp.eq.f32.partialorder %v5536_v25, inf  ;;  %vm8613_vm15 = vcmp.eq.f32.partialorder %v5540_v38, inf }
 0x1e5   :  { %v5859_v61 = vsel %vm8611_vm0, 1, %v8584_v4  ;;  %v5864_v32 = vsel %vm8613_vm15, 1, %v8584_v4  ;;  %vm8614_vm10 = vcmp.eq.f32.partialorder %v5544_v5, inf  ;;  %vm8616_vm11 = vcmp.eq.f32.partialorder %v5548_v8, inf }
 0x1e6   :  { %8612 = vst [vmem:[#allocation129_spill] sm:$0xff] %v5859_v61  ;;  %v5869_v16 = vsel %vm8614_vm10, 1, %v8584_v4  ;;  %v5874_v10 = vsel %vm8616_vm11, 1, %v8584_v4  ;;  %vm8617_vm5 = vcmp.eq.f32.partialorder %v5552_v9, inf  ;;  %v8619_v61 = vld [vmem:[#allocation140_spill] sm:$0xff]  ;;  %v5889_v5 = vsel %vm1245_vm1, 1, %v8584_v4 }
 0x1e7   :  { %8615 = vst [vmem:[#allocation130_spill] sm:$0xff] %v5869_v16  ;;  %v5879_v25 = vsel %vm8617_vm5, 1, %v8584_v4  ;;  %vm8620_vm0 = vcmp.eq.f32.partialorder %v8619_v61, inf  ;;  %v5894_v8 = vsel %vm1246_vm7, 1, %v8584_v4  ;;  %v5899_v9 = vsel %vm1247_vm6, 1, %v8584_v4 }
 0x1e8   :  { %8618 = vst [vmem:[#allocation131_spill] sm:$0xff] %v5879_v25  ;;  %v5884_v38 = vsel %vm8620_vm0, 1, %v8584_v4  ;;  %v5904_v61 = vsel %vm1248_vm13, 1, %v8584_v4  ;;  %v5909_v60 = vsel %vm1249_vm8, 1, %v8584_v4  ;;  %v5914_v16 = vsel %vm1250_vm12, 1, %v8584_v4 }
 0x1e9   :  { %8622 = vst [vmem:[#allocation132_spill] sm:$0xff] %v5894_v8  ;;  %v5919_v42 = vsel %vm1251_vm14, 1, %v8584_v4  ;;  %vm8626_vm6 = vcmp.eq.f32.partialorder %v5588_v24, inf  ;;  %vm8629_vm8 = vcmp.eq.f32.partialorder %v5596_v14, inf  ;;  %v5939_v8 = vsel %vm1255_vm4, 1, %v8584_v4 }
 0x1ea   :  { %8624 = vst [vmem:[#allocation133_spill] sm:$0xff] %v5904_v61  ;;  %v5924_v25 = vsel %vm8626_vm6, 1, %v8584_v4  ;;  %v8627_v61 = vld [vmem:[#allocation144_spill] sm:$0xff]  ;;  %v5934_v7 = vsel %vm8629_vm8, 1, %v8584_v4  ;;  %v5944_v24 = vsel %vm1256_vm2, 1, %v8584_v4  ;;  %vm8630_vm14 = vcmp.eq.f32.partialorder %v5604_v41, inf }
 0x1eb   :  { %vm8628_vm13 = vcmp.eq.f32.partialorder %v8627_v61, inf  ;;  %v5949_v61 = vsel %vm8630_vm14, 1, %v8584_v4  ;;  %vm8631_vm12 = vcmp.eq.f32.partialorder %v5606_v43, inf  ;;  %vm8632_vm1 = vcmp.eq.f32.partialorder %v5608_v35, inf }
 0x1ec   :  { %v5929_v57 = vsel %vm8628_vm13, 1, %v8584_v4  ;;  %v5954_v14 = vsel %vm8631_vm12, 1, %v8584_v4  ;;  %v5959_v30 = vsel %vm8632_vm1, 1, %v8584_v4  ;;  %vm8633_vm4 = vcmp.eq.f32.partialorder %v5610_v62, inf }
 0x1ed   :  { %v5964_v56 = vsel %vm8633_vm4, 1, %v8584_v4  ;;  %vm8634_vm7 = vcmp.eq.f32.partialorder %v5612_v15, inf  ;;  %vm8635_vm2 = vcmp.eq.f32.partialorder %v5614_v23, inf  ;;  %vm8636_vm15 = vcmp.eq.f32.partialorder %v5616_v0, inf }
 0x1ee   :  { %v5969_v41 = vsel %vm8634_vm7, 1, %v8584_v4  ;;  %v5974_v43 = vsel %vm8635_vm2, 1, %v8584_v4  ;;  %v5979_v35 = vsel %vm8636_vm15, 1, %v8584_v4  ;;  %vm8637_vm10 = vcmp.eq.f32.partialorder %v5618_v6, inf }
 0x1ef   :  { %v5984_v62 = vsel %vm8637_vm10, 1, %v8584_v4  ;;  %vm8638_vm11 = vcmp.eq.f32.partialorder %v5620_v11, inf  ;;  %vm8639_vm5 = vcmp.eq.f32.partialorder %v5622_v13, inf  ;;  %v5999_v0 = vsel %vm1267_vm9, 1, %v8584_v4 }
 0x1f0   :  { %v5989_v15 = vsel %vm8638_vm11, 1, %v8584_v4  ;;  %v5994_v23 = vsel %vm8639_vm5, 1, %v8584_v4  ;;  %v6004_v6 = vsel %vm1268_vm3, 1, %v8584_v4  ;;  %vm8640_vm0 = vcmp.eq.f32.partialorder %v5628_v33, inf }
 0x1f1   :  { %v6009_v11 = vsel %vm8640_vm0, 1, %v8584_v4  ;;  %vm8641_vm6 = vcmp.eq.f32.partialorder %v5630_v1, inf  ;;  %vm1335_vm13 = vcmp.gt.s32.totalorder %v5683_v59, %v5707_v21  ;;  %vm1337_vm9 = vcmp.gt.s32.totalorder %v5688_v58, %v5712_v47 }
 0x1f2   :  { %v6014_v13 = vsel %vm8641_vm6, 1, %v8584_v4  ;;  %vm1339_vm3 = vcmp.gt.s32.totalorder %v5693_v37, %v5717_v53  ;;  %vm1341_vm8 = vcmp.gt.s32.totalorder %v5698_v34, %v5722_v31  ;;  %v1336_v19 = vsel %vm1335_vm13, %v5683_v59, %v5707_v21 }
 0x1f3   :  { %v1338_v36 = vsel %vm1337_vm9, %v5688_v58, %v5712_v47  ;;  %v1340_v33 = vsel %vm1339_vm3, %v5693_v37, %v5717_v53  ;;  %v1342_v1 = vsel %vm1341_vm8, %v5698_v34, %v5722_v31  ;;  %vm1343_vm14 = vcmp.gt.s32.totalorder %v1336_v19, %v5731_v18 }
 0x1f4   :  { %vm1345_vm12 = vcmp.gt.s32.totalorder %v1338_v36, %v5736_v48  ;;  %vm1347_vm1 = vcmp.gt.s32.totalorder %v1340_v33, %v5741_v51  ;;  %vm1349_vm4 = vcmp.gt.s32.totalorder %v1342_v1, %v5746_v26  ;;  %v1344_v4 = vsel %vm1343_vm14, %v1336_v19, %v5731_v18 }
 0x1f5   :  { %v1346_v59 = vsel %vm1345_vm12, %v1338_v36, %v5736_v48  ;;  %v1348_v58 = vsel %vm1347_vm1, %v1340_v33, %v5741_v51  ;;  %v1350_v21 = vsel %vm1349_vm4, %v1342_v1, %v5746_v26  ;;  %vm1351_vm7 = vcmp.gt.s32.totalorder %v1344_v4, %v5755_v39  ;;  %v8646_v36 = vld [vmem:[#allocation133_spill] sm:$0xff] }
 0x1f6   :  { %vm1353_vm2 = vcmp.gt.s32.totalorder %v1346_v59, %v5760_v40  ;;  %vm1355_vm15 = vcmp.gt.s32.totalorder %v1348_v58, %v5765_v52  ;;  %vm1357_vm10 = vcmp.gt.s32.totalorder %v1350_v21, %v5770_v28  ;;  %v1352_v37 = vsel %vm1351_vm7, %v1344_v4, %v5755_v39 }
 0x1f7   :  { %v1354_v34 = vsel %vm1353_vm2, %v1346_v59, %v5760_v40  ;;  %v1356_v47 = vsel %vm1355_vm15, %v1348_v58, %v5765_v52  ;;  %v1358_v53 = vsel %vm1357_vm10, %v1350_v21, %v5770_v28  ;;  %vm1359_vm11 = vcmp.gt.s32.totalorder %v1352_v37, %v5779_v63  ;;  %v404_v21 = vpop.f32.mrf.mxu0 }
 0x1f8   :  { %vm1361_vm5 = vcmp.gt.s32.totalorder %v1354_v34, %v5784_v17  ;;  %vm1363_vm0 = vcmp.gt.s32.totalorder %v1356_v47, %v5789_v27  ;;  %vm1365_vm6 = vcmp.gt.s32.totalorder %v1358_v53, %v5794_v50  ;;  %v1360_v31 = vsel %vm1359_vm11, %v1352_v37, %v5779_v63  ;;  %v8647_v37 = vld [vmem:[#allocation36_spill] sm:$0xff] }
 0x1f9   :  { %v1362_v18 = vsel %vm1361_vm5, %v1354_v34, %v5784_v17  ;;  %v1364_v4 = vsel %vm1363_vm0, %v1356_v47, %v5789_v27  ;;  %v1366_v48 = vsel %vm1365_vm6, %v1358_v53, %v5794_v50  ;;  %vm1367_vm13 = vcmp.gt.s32.totalorder %v1360_v31, %v5799_v54  ;;  %v8648_v34 = vld [vmem:[#allocation41_spill] sm:$0xff] }
 0x1fa   :  { %vm1369_vm9 = vcmp.gt.s32.totalorder %v1362_v18, %v5804_v3  ;;  %vm1371_vm3 = vcmp.gt.s32.totalorder %v1364_v4, %v5809_v46  ;;  %vm1373_vm8 = vcmp.gt.s32.totalorder %v1366_v48, %v5814_v49  ;;  %v1368_v51 = vsel %vm1367_vm13, %v1360_v31, %v5799_v54  ;;  %v8650_v47 = vld [vmem:[#allocation37_spill] sm:$0xff] }
 0x1fb   :  { %v1370_v26 = vsel %vm1369_vm9, %v1362_v18, %v5804_v3  ;;  %v1372_v39 = vsel %vm1371_vm3, %v1364_v4, %v5809_v46  ;;  %v1374_v40 = vsel %vm1373_vm8, %v1366_v48, %v5814_v49  ;;  %vm1375_vm14 = vcmp.gt.s32.totalorder %v1368_v51, %v5819_v29  ;;  %v8642_v46 = vld [vmem:[#allocation129_spill] sm:$0xff]  ;;  %v8643_v49 = vld [vmem:[#allocation130_spill] sm:$0xff]  ;;  %v8654_v18 = vld [vmem:[#allocation48_spill] sm:$0xff] }
 0x1fc   :  { %vm1377_vm12 = vcmp.gt.s32.totalorder %v1370_v26, %v5824_v44  ;;  %vm1379_vm1 = vcmp.gt.s32.totalorder %v1372_v39, %v5829_v22  ;;  %vm1381_vm4 = vcmp.gt.s32.totalorder %v1374_v40, %v5834_v2  ;;  %v1376_v52 = vsel %vm1375_vm14, %v1368_v51, %v5819_v29  ;;  %v8653_v31 = vld [vmem:[#allocation33_spill] sm:$0xff] }
 0x1fd   :  { %v1378_v28 = vsel %vm1377_vm12, %v1370_v26, %v5824_v44  ;;  %v1380_v63 = vsel %vm1379_vm1, %v1372_v39, %v5829_v22  ;;  %v1382_v17 = vsel %vm1381_vm4, %v1374_v40, %v5834_v2  ;;  %vm1383_vm7 = vcmp.gt.s32.totalorder %v1376_v52, %v5839_v55  ;;  %v444_v26 = vpop.f32.mrf.mxu1 }
 0x1fe   :  { %vm1385_vm2 = vcmp.gt.s32.totalorder %v1378_v28, %v5844_v45  ;;  %vm1387_vm15 = vcmp.gt.s32.totalorder %v1380_v63, %v5849_v20  ;;  %vm1389_vm10 = vcmp.gt.s32.totalorder %v1382_v17, %v5854_v12  ;;  %v1384_v27 = vsel %vm1383_vm7, %v1376_v52, %v5839_v55  ;;  %v8644_v55 = vld [vmem:[#allocation131_spill] sm:$0xff] }
 0x1ff   :  { %v1386_v50 = vsel %vm1385_vm2, %v1378_v28, %v5844_v45  ;;  %v1388_v54 = vsel %vm1387_vm15, %v1380_v63, %v5849_v20  ;;  %v1390_v3 = vsel %vm1389_vm10, %v1382_v17, %v5854_v12  ;;  %vm1391_vm11 = vcmp.gt.s32.totalorder %v1384_v27, %v8642_v46  ;;  %v8645_v45 = vld [vmem:[#allocation132_spill] sm:$0xff]  ;;  %v8658_v28 = vld [vmem:[#allocation39_spill] sm:$0xff] }
 0x200   :  { %vm1393_vm5 = vcmp.gt.s32.totalorder %v1386_v50, %v5864_v32  ;;  %vm1395_vm0 = vcmp.gt.s32.totalorder %v1388_v54, %v8643_v49  ;;  %vm1397_vm6 = vcmp.gt.s32.totalorder %v1390_v3, %v5874_v10  ;;  %v1392_v29 = vsel %vm1391_vm11, %v1384_v27, %v8642_v46  ;;  %v8659_v63 = vld [vmem:[#allocation51_spill] sm:$0xff] }
 0x201   :  { %v1394_v44 = vsel %vm1393_vm5, %v1386_v50, %v5864_v32  ;;  %v1396_v22 = vsel %vm1395_vm0, %v1388_v54, %v8643_v49  ;;  %v1398_v2 = vsel %vm1397_vm6, %v1390_v3, %v5874_v10  ;;  %vm1399_vm13 = vcmp.gt.s32.totalorder %v1392_v29, %v8644_v55 }
 0x202   :  { %vm1401_vm9 = vcmp.gt.s32.totalorder %v1394_v44, %v5884_v38  ;;  %vm1403_vm3 = vcmp.gt.s32.totalorder %v1396_v22, %v5889_v5  ;;  %vm1405_vm8 = vcmp.gt.s32.totalorder %v1398_v2, %v8645_v45  ;;  %v1400_v20 = vsel %vm1399_vm13, %v1392_v29, %v8644_v55  ;;  %v481_v29 = vpop.f32.mrf.mxu2  ;;  %v8663_v55 = vld [vmem:[#allocation104_spill] sm:$0xff] }
 0x203   :  { %v1402_v12 = vsel %vm1401_vm9, %v1394_v44, %v5884_v38  ;;  %v1404_v19 = vsel %vm1403_vm3, %v1396_v22, %v5889_v5  ;;  %v1406_v32 = vsel %vm1405_vm8, %v1398_v2, %v8645_v45  ;;  %vm1407_vm14 = vcmp.gt.s32.totalorder %v1400_v20, %v5899_v9  ;;  %v8661_v44 = vld [vmem:[#allocation100_spill] sm:$0xff] }
 0x204   :  { %vm1409_vm12 = vcmp.gt.s32.totalorder %v1402_v12, %v8646_v36  ;;  %vm1411_vm1 = vcmp.gt.s32.totalorder %v1404_v19, %v5909_v60  ;;  %vm1413_vm4 = vcmp.gt.s32.totalorder %v1406_v32, %v5914_v16  ;;  %v1408_v10 = vsel %vm1407_vm14, %v1400_v20, %v5899_v9  ;;  %v8699_v20 = vld [vmem:[#allocation60_spill] sm:$0xff] }
 0x205   :  { %v1410_v33 = vsel %vm1409_vm12, %v1402_v12, %v8646_v36  ;;  %v1412_v1 = vsel %vm1411_vm1, %v1404_v19, %v5909_v60  ;;  %v1414_v38 = vsel %vm1413_vm4, %v1406_v32, %v5914_v16  ;;  %vm1415_vm7 = vcmp.gt.s32.totalorder %v1408_v10, %v5919_v42  ;;  %v8667_v12 = vld [vmem:[#allocation99_spill] sm:$0xff]  ;;  %v8668_v19 = vld [vmem:[#allocation110_spill] sm:$0xff]  ;;  %v406_v32 = vpop.f32.mrf.mxu0 }
 0x206   :  { %vm1417_vm2 = vcmp.gt.s32.totalorder %v1410_v33, %v5924_v25  ;;  %vm1419_vm15 = vcmp.gt.s32.totalorder %v1412_v1, %v5929_v57  ;;  %vm1421_vm10 = vcmp.gt.s32.totalorder %v1414_v38, %v5934_v7  ;;  %v1416_v5 = vsel %vm1415_vm7, %v1408_v10, %v5919_v42 }
 0x207   :  { %v1418_v59 = vsel %vm1417_vm2, %v1410_v33, %v5924_v25  ;;  %v1420_v9 = vsel %vm1419_vm15, %v1412_v1, %v5929_v57  ;;  %v1422_v58 = vsel %vm1421_vm10, %v1414_v38, %v5934_v7  ;;  %vm1423_vm11 = vcmp.gt.s32.totalorder %v1416_v5, %v5939_v8  ;;  %v519_v38 = vpop.f32.mrf.mxu3 }
 0x208   :  { %vm1425_vm5 = vcmp.gt.s32.totalorder %v1418_v59, %v5944_v24  ;;  %vm1427_vm0 = vcmp.gt.s32.totalorder %v1420_v9, %v5949_v61  ;;  %vm1429_vm6 = vcmp.gt.s32.totalorder %v1422_v58, %v5954_v14  ;;  %v1424_v60 = vsel %vm1423_vm11, %v1416_v5, %v5939_v8 }
 0x209   :  { %v1426_v16 = vsel %vm1425_vm5, %v1418_v59, %v5944_v24  ;;  %v1428_v42 = vsel %vm1427_vm0, %v1420_v9, %v5949_v61  ;;  %v1430_v25 = vsel %vm1429_vm6, %v1422_v58, %v5954_v14  ;;  %vm1431_vm13 = vcmp.gt.s32.totalorder %v1424_v60, %v5959_v30  ;;  %v8675_v9 = vld [vmem:[#allocation112_spill] sm:$0xff] }
 0x20a   :  { %vm1433_vm9 = vcmp.gt.s32.totalorder %v1426_v16, %v5964_v56  ;;  %vm1435_vm3 = vcmp.gt.s32.totalorder %v1428_v42, %v5969_v41  ;;  %vm1437_vm8 = vcmp.gt.s32.totalorder %v1430_v25, %v5974_v43  ;;  %v1432_v57 = vsel %vm1431_vm13, %v1424_v60, %v5959_v30 }
 0x20b   :  { %v1434_v7 = vsel %vm1433_vm9, %v1426_v16, %v5964_v56  ;;  %v1436_v8 = vsel %vm1435_vm3, %v1428_v42, %v5969_v41  ;;  %v1438_v24 = vsel %vm1437_vm8, %v1430_v25, %v5974_v43  ;;  %vm1439_vm14 = vcmp.gt.s32.totalorder %v1432_v57, %v5979_v35 }
 0x20c   :  { %vm1441_vm12 = vcmp.gt.s32.totalorder %v1434_v7, %v5984_v62  ;;  %vm1443_vm1 = vcmp.gt.s32.totalorder %v1436_v8, %v5989_v15  ;;  %vm1445_vm4 = vcmp.gt.s32.totalorder %v1438_v24, %v5994_v23  ;;  %v1440_v61 = vsel %vm1439_vm14, %v1432_v57, %v5979_v35 }
 0x20d   :  { %v1442_v14 = vsel %vm1441_vm12, %v1434_v7, %v5984_v62  ;;  %v1444_v30 = vsel %vm1443_vm1, %v1436_v8, %v5989_v15  ;;  %v1446_v56 = vsel %vm1445_vm4, %v1438_v24, %v5994_v23  ;;  %vm1447_vm7 = vcmp.gt.s32.totalorder %v1440_v61, %v5999_v0  ;;  %v6147_v15 = vld [vmem:[%s7760_s2] ss:$0 sm:$0xff] }
 0x20e   :  { %vm1449_vm2 = vcmp.gt.s32.totalorder %v1442_v14, %v6004_v6  ;;  %vm1451_vm15 = vcmp.gt.s32.totalorder %v1444_v30, %v6009_v11  ;;  %vm1453_vm10 = vcmp.gt.s32.totalorder %v1446_v56, %v6014_v13  ;;  %v1448_v41 = vsel %vm1447_vm7, %v1440_v61, %v5999_v0 }
 0x20f   :  { %v1450_v43 = vsel %vm1449_vm2, %v1442_v14, %v6004_v6  ;;  %v1452_v35 = vsel %vm1451_vm15, %v1444_v30, %v6009_v11  ;;  %v1454_v62 = vsel %vm1453_vm10, %v1446_v56, %v6014_v13  ;;  %v405_v23 = vadd.f32 %v6147_v15, %v404_v21  ;;  %v8651_v13 = vld [vmem:[#allocation47_spill] sm:$0xff] }
 0x210   :  { %vm1455_vm11 = vcmp.gt.s32.totalorder %v1448_v41, %v1450_v43  ;;  %vm1457_vm5 = vcmp.gt.s32.totalorder %v1452_v35, %v1454_v62  ;;  %vm8649_vm0 = vcmp.gt.s32.totalorder %v8648_v34, %v8647_v37  ;;  %vm8652_vm6 = vcmp.gt.s32.totalorder %v8651_v13, %v8650_v47 }
 0x211   :  { %v6155_v0 = vsel %vm8649_vm0, %v8648_v34, %v8647_v37  ;;  %v1456_v6 = vsel %vm1455_vm11, %v1448_v41, %v1450_v43  ;;  %v1458_v11 = vsel %vm1457_vm5, %v1452_v35, %v1454_v62  ;;  %v6162_v53 = vsel %vm8652_vm6, %v8651_v13, %v8650_v47  ;;  %616 = vst [vmem:[#allocation7 + $0x40] sm:$0xff] %v405_v23  ;;  %v8690_v47 = vld [vmem:[#allocation55_spill] sm:$0xff]  ;;  %v8718_v41 = vld [vmem:[#allocation88_spill] sm:$0xff] }
 0x212   :  { %vm8655_vm13 = vcmp.gt.s32.totalorder %v8654_v18, %v8653_v31  ;;  %vm1459_vm9 = vcmp.gt.s32.totalorder %v1456_v6, %v1458_v11  ;;  %v552_v48 = vmax.f32 %v405_v23, 0.0  ;;  %vm1494_vm3 = vcmp.ne.f32.partialorder %v405_v23, %v405_v23 }
 0x213   :  { %v6169_v4 = vsel %vm8655_vm13, %v8654_v18, %v8653_v31  ;;  %v1773_v51 = vand.u32 2147483647, %v405_v23  ;;  %v6171_v39 = vsel %vm1459_vm9, %v1456_v6, %v1458_v11  ;;  %v8657_v40 = vmov 0   ;;  %v8689_v11 = vld [vmem:[#allocation31_spill] sm:$0xff] }
 0x214   :  { %8656 = vst [vmem:[#allocation134_spill] sm:$0xff] %v6171_v39  ;;  %v6174_v52 = vsel %vm1494_vm3, 1, %v8657_v40  ;;  %vm8660_vm8 = vcmp.gt.s32.totalorder %v8659_v63, %v8658_v28  ;;  %v445_v27 = vadd.f32 %v6147_v15, %v444_v26  ;;  %v1462_v50 = vshra.s32 %v6171_v39, 16  ;;  %v8692_v18 = vld [vmem:[#allocation15_spill] sm:$0xff]  ;;  %v446_v26 = vpop.f32.mrf.mxu1 }
 0x215   :  { %v6181_v17 = vsel %vm8660_vm8, %v8659_v63, %v8658_v28  ;;  %680 = vst [vmem:[#allocation8 + $0x40] sm:$0xff] %v552_v48  ;;  %vm1622_vm14 = vcmp.gt.s32.totalorder %v6155_v0, %v6174_v52  ;;  %vm1837_vm12 = vcmp.eq.f32.partialorder %v1773_v51, inf  ;;  %vm2116_vm1 = vcmp.ne.f32.partialorder %v552_v48, %v552_v48 }
 0x216   :  { %v6188_v54 = vsel %vm1837_vm12, 1, %v8657_v40  ;;  %v6191_v3 = vsel %vm2116_vm1, 1, %v8657_v40  ;;  %v2395_v46 = vand.u32 2147483647, %v552_v48  ;;  %v568_v49 = vmax.f32 %v445_v27, 0.0  ;;  %632 = vst [vmem:[#allocation7 + $0xc0] sm:$0xff] %v445_v27 }
 0x217   :  { %v1818_v22 = vand.u32 2147483647, %v8661_v44  ;;  %v6194_v2 = vcvt.s32.f32 %v1462_v50  ;;  %vm1965_vm4 = vcmp.gt.s32.totalorder %v6162_v53, %v6188_v54  ;;  %vm2244_vm7 = vcmp.gt.s32.totalorder %v6169_v4, %v6191_v3  ;;  %v8693_v48 = vld [vmem:[#allocation58_spill] sm:$0xff]  ;;  %v8696_v50 = vld [vmem:[#allocation59_spill] sm:$0xff] }
 0x218   :  { %v8664_v45 = vand.u32 2147483647, %v8663_v55  ;;  %vm1524_vm15 = vcmp.ne.f32.partialorder %v8667_v12, %v8667_v12  ;;  %vm2146_vm10 = vcmp.ne.f32.partialorder %v8668_v19, %v8668_v19  ;;  %vm2459_vm11 = vcmp.eq.f32.partialorder %v2395_v46, inf  ;;  %696 = vst [vmem:[#allocation8 + $0xc0] sm:$0xff] %v568_v49 }
 0x219   :  { %8662 = vst [vmem:[#allocation135_spill] sm:$0xff] %v6194_v2  ;;  %v8669_v36 = vand.u32 2147483647, %v8667_v12  ;;  %vm1539_vm0 = vcmp.ne.f32.partialorder %v8661_v44, %v8661_v44  ;;  %1465 = vmax.xlane.f32.xlu0 %v6194_v2  ;;  %v6220_v33 = vsel %vm2459_vm11, 1, %v8657_v40  ;;  %v6223_v1 = vadd.f32 %v6147_v15, %v481_v29  ;;  %v484_v44 = vpop.f32.mrf.mxu2 }
 0x21a   :  { %vm6202_vm2 = vcmp.eq.f32.partialorder %v8664_v45, inf  ;;  %v8672_v5 = vand.u32 2147483647, %v8668_v19  ;;  %vm2161_vm13 = vcmp.ne.f32.partialorder %v8675_v9, %v8675_v9  ;;  %vm2587_vm9 = vcmp.gt.s32.totalorder %v6181_v17, %v6220_v33  ;;  %v8698_v45 = vld [vmem:[#allocation66_spill] sm:$0xff] }
 0x21b   :  { %vm6212_vm5 = vcmp.eq.f32.partialorder %v8669_v36, inf  ;;  %v6236_v58 = vadd.f32 %v6147_v15, %v519_v38  ;;  %vm6238_vm3 = vcmp.eq.f32.partialorder %v1818_v22, inf  ;;  %v1789_v16 = vand.u32 2147483647, %v445_v27  ;;  %647 = vst [vmem:[#allocation7 + $0x138] sm:$0xff] %v6223_v1  ;;  %v521_v22 = vpop.f32.mrf.mxu3 }
 0x21c   :  { %vm6227_vm6 = vcmp.eq.f32.partialorder %v8672_v5, inf  ;;  %v6243_v42 = vmax.f32 %v6223_v1, 0.0  ;;  %v407_v25 = vadd.f32 %v6147_v15, %v406_v32  ;;  %vm1510_vm8 = vcmp.ne.f32.partialorder %v445_v27, %v445_v27  ;;  %v8695_v27 = vld [vmem:[#allocation64_spill] sm:$0xff] }
 0x21d   :  { %vm2132_vm12 = vcmp.ne.f32.partialorder %v568_v49, %v568_v49  ;;  %v2411_v57 = vand.u32 2147483647, %v568_v49  ;;  %v6248_v7 = vmax.f32 %v6236_v58, 0.0  ;;  %662 = vst [vmem:[#allocation7 + $0x1b0] sm:$0xff] %v6236_v58  ;;  %v6254_v8 = vsel %vm6202_vm2, 1, %v8657_v40 }
 0x21e   :  { %8679 = vst [vmem:[#allocation137_spill] sm:$0xff] %v6254_v8  ;;  %v6260_v24 = vsel %vm1524_vm15, 1, %v8657_v40  ;;  %v6266_v61 = vsel %vm2146_vm10, 1, %v8657_v40  ;;  %v6272_v14 = vsel %vm1539_vm0, 1, %v8657_v40  ;;  %v6278_v30 = vsel %vm6212_vm5, 1, %v8657_v40  ;;  %v8744_v8 = vld [vmem:[#allocation40_spill] sm:$0xff] }
 0x21f   :  { %8678 = vst [vmem:[#allocation136_spill] sm:$0xff] %v6248_v7  ;;  %v6283_v56 = vsel %vm6227_vm6, 1, %v8657_v40  ;;  %v6289_v21 = vsel %vm2161_vm13, 1, %v8657_v40  ;;  %v6296_v43 = vsel %vm6238_vm3, 1, %v8657_v40  ;;  %v6300_v35 = vsel %vm1510_vm8, 1, %v8657_v40 }
 0x220   :  { %8680 = vst [vmem:[#allocation138_spill] sm:$0xff] %v6266_v61  ;;  %vm6302_vm1 = vcmp.eq.f32.partialorder %v1789_v16, inf  ;;  %v6308_v23 = vsel %vm2132_vm12, 1, %v8657_v40  ;;  %vm6310_vm2 = vcmp.eq.f32.partialorder %v2411_v57, inf  ;;  %vm1525_vm15 = vcmp.ne.f32.partialorder %v6223_v1, %v6223_v1 }
 0x221   :  { %8681 = vst [vmem:[#allocation139_spill] sm:$0xff] %v6272_v14  ;;  %v1804_v34 = vand.u32 2147483647, %v6223_v1  ;;  %v553_v6 = vmax.f32 %v407_v25, 0.0  ;;  %vm1495_vm10 = vcmp.ne.f32.partialorder %v407_v25, %v407_v25  ;;  %vm8691_vm11 = vcmp.gt.s32.totalorder %v8690_v47, %v8689_v11  ;;  %v8738_v14 = vld [vmem:[#allocation43_spill] sm:$0xff] }
 0x222   :  { %711 = vst [vmem:[#allocation8 + $0x138] sm:$0xff] %v6243_v42  ;;  %v6322_v13 = vsel %vm8691_vm11, %v8690_v47, %v8689_v11  ;;  %v1774_v31 = vand.u32 2147483647, %v407_v25  ;;  %vm8694_vm5 = vcmp.gt.s32.totalorder %v8693_v48, %v8692_v18  ;;  %v2426_v28 = vand.u32 2147483647, %v6243_v42  ;;  %v8716_v47 = vld [vmem:[#allocation74_spill] sm:$0xff] }
 0x223   :  { %8682 = vst [vmem:[#allocation140_spill] sm:$0xff] %v6283_v56  ;;  %v6329_v51 = vsel %vm8694_vm5, %v8693_v48, %v8692_v18  ;;  %v6333_v63 = vsel %vm1495_vm10, 1, %v8657_v40  ;;  %vm2117_vm0 = vcmp.ne.f32.partialorder %v553_v6, %v553_v6  ;;  %vm8697_vm6 = vcmp.gt.s32.totalorder %v8696_v50, %v8695_v27 }
 0x224   :  { %8683 = vst [vmem:[#allocation141_spill] sm:$0xff] %v6289_v21  ;;  %v6340_v46 = vsel %vm8697_vm6, %v8696_v50, %v8695_v27  ;;  %vm1624_vm13 = vcmp.gt.s32.totalorder %v6322_v13, %v6333_v63  ;;  %vm1838_vm3 = vcmp.eq.f32.partialorder %v1774_v31, inf  ;;  %v6345_v49 = vsel %vm2117_vm0, 1, %v8657_v40  ;;  %v486_v27 = vpop.f32.mrf.mxu2  ;;  %v8728_v21 = vld [vmem:[#allocation101_spill] sm:$0xff] }
 0x225   :  { %726 = vst [vmem:[#allocation8 + $0x1b0] sm:$0xff] %v6248_v7  ;;  %v2396_v29 = vand.u32 2147483647, %v553_v6  ;;  %v6348_v55 = vsel %vm1838_vm3, 1, %v8657_v40  ;;  %vm8700_vm12 = vcmp.gt.s32.totalorder %v8699_v20, %v8698_v45  ;;  %v447_v19 = vadd.f32 %v6147_v15, %v446_v26 }
 0x226   :  { %8684 = vst [vmem:[#allocation142_spill] sm:$0xff] %v6296_v43  ;;  %v6357_v12 = vsel %vm8700_vm12, %v8699_v20, %v8698_v45  ;;  %v1819_v32 = vand.u32 2147483647, %v6236_v58  ;;  %v6364_v36 = vadd.f32 %v6147_v15, %v484_v44  ;;  %v6372_v59 = vadd.f32 %v6147_v15, %v521_v22  ;;  %v8709_v44 = vld [vmem:[#allocation84_spill] sm:$0xff]  ;;  %v8710_v22 = vld [vmem:[#allocation71_spill] sm:$0xff]  ;;  %v8712_v20 = vld [vmem:[#allocation85_spill] sm:$0xff] }
 0x227   :  { %617 = vst [vmem:[#allocation7 + $0x48] sm:$0xff] %v407_v25  ;;  %vm2460_vm11 = vcmp.eq.f32.partialorder %v2396_v29, inf  ;;  %v6369_v38 = vmax.f32 %v447_v19, 0.0  ;;  %v1790_v5 = vand.u32 2147483647, %v447_v19  ;;  %v6377_v60 = vsel %vm6302_vm1, 1, %v8657_v40 }
 0x228   :  { %681 = vst [vmem:[#allocation8 + $0x48] sm:$0xff] %v553_v6  ;;  %v6367_v10 = vsel %vm2460_vm11, 1, %v8657_v40  ;;  %v6382_v16 = vsel %vm6310_vm2, 1, %v8657_v40  ;;  %v6387_v25 = vmax.f32 %v6364_v36, 0.0  ;;  %vm1868_vm0 = vcmp.eq.f32.partialorder %v1804_v34, inf  ;;  %v409_v34 = vpop.f32.mrf.mxu0 }
 0x229   :  { %633 = vst [vmem:[#allocation7 + $0xc8] sm:$0xff] %v447_v19  ;;  %vm2147_vm6 = vcmp.ne.f32.partialorder %v6243_v42, %v6243_v42  ;;  %vm1540_vm1 = vcmp.ne.f32.partialorder %v6236_v58, %v6236_v58  ;;  %vm2162_vm3 = vcmp.ne.f32.partialorder %v6248_v7, %v6248_v7  ;;  %v6401_v57 = vsel %vm1525_vm15, 1, %v8657_v40 }
 0x22a   :  { %648 = vst [vmem:[#allocation7 + $0x140] sm:$0xff] %v6364_v36  ;;  %vm2490_vm2 = vcmp.eq.f32.partialorder %v2426_v28, inf  ;;  %vm1883_vm12 = vcmp.eq.f32.partialorder %v1819_v32, inf  ;;  %vm1511_vm11 = vcmp.ne.f32.partialorder %v447_v19, %v447_v19  ;;  %vm1854_vm5 = vcmp.eq.f32.partialorder %v1790_v5, inf  ;;  %v8713_v19 = vld [vmem:[#allocation72_spill] sm:$0xff] }
 0x22b   :  { %697 = vst [vmem:[#allocation8 + $0xc8] sm:$0xff] %v6369_v38  ;;  %vm2133_vm8 = vcmp.ne.f32.partialorder %v6369_v38, %v6369_v38  ;;  %vm1526_vm10 = vcmp.ne.f32.partialorder %v6364_v36, %v6364_v36  ;;  %v6409_v58 = vmax.f32 %v6372_v59, 0.0  ;;  %v6413_v1 = vsel %vm1868_vm0, 1, %v8657_v40 }
 0x22c   :  { %8701 = vst [vmem:[#allocation143_spill] sm:$0xff] %v6401_v57  ;;  %v6416_v42 = vsel %vm2147_vm6, 1, %v8657_v40  ;;  %v6419_v62 = vsel %vm1540_vm1, 1, %v8657_v40  ;;  %v6422_v37 = vsel %vm2162_vm3, 1, %v8657_v40  ;;  %v6425_v6 = vsel %vm2490_vm2, 1, %v8657_v40  ;;  %v8743_v57 = vld [vmem:[#allocation103_spill] sm:$0xff] }
 0x22d   :  { %712 = vst [vmem:[#allocation8 + $0x140] sm:$0xff] %v6387_v25  ;;  %v6428_v11 = vsel %vm1883_vm12, 1, %v8657_v40  ;;  %v6432_v31 = vsel %vm1511_vm11, 1, %v8657_v40  ;;  %v6436_v18 = vsel %vm1854_vm5, 1, %v8657_v40  ;;  %v6439_v48 = vsel %vm2133_vm8, 1, %v8657_v40 }
 0x22e   :  { %8702 = vst [vmem:[#allocation144_spill] sm:$0xff] %v6409_v58  ;;  %v2412_v26 = vand.u32 2147483647, %v6369_v38  ;;  %v6446_v28 = vsel %vm1526_vm10, 1, %v8657_v40  ;;  %v1805_v50 = vand.u32 2147483647, %v6364_v36  ;;  %v410_v29 = vadd.f32 %v6147_v15, %v409_v34  ;;  %v449_v38 = vpop.f32.mrf.mxu1 }
 0x22f   :  { %663 = vst [vmem:[#allocation7 + $0x1b8] sm:$0xff] %v6372_v59  ;;  %vm8711_vm15 = vcmp.gt.s32.totalorder %v8710_v22, %v8709_v44  ;;  %vm8714_vm8 = vcmp.gt.s32.totalorder %v8713_v19, %v8712_v20  ;;  %v2427_v5 = vand.u32 2147483647, %v6387_v25  ;;  %v8715_v36 = vld [vmem:[#allocation86_spill] sm:$0xff]  ;;  %v6481_v39 = vadd.f32 %v6147_v15, %v486_v27 }
 0x230   :  { %8703 = vst [vmem:[#allocation129_spill] sm:$0xff] %v6413_v1  ;;  %v6455_v45 = vsel %vm8711_vm15, %v8710_v22, %v8709_v44  ;;  %v6462_v32 = vsel %vm8714_vm8, %v8713_v19, %v8712_v20  ;;  %vm8717_vm10 = vcmp.gt.s32.totalorder %v8716_v47, %v8715_v36  ;;  %v8719_v44 = vld [vmem:[#allocation20_spill] sm:$0xff]  ;;  %v450_v20 = vadd.f32 %v6147_v15, %v449_v38 }
 0x231   :  { %8704 = vst [vmem:[#allocation130_spill] sm:$0xff] %v6416_v42  ;;  %v6470_v34 = vsel %vm8717_vm10, %v8716_v47, %v8715_v36  ;;  %vm8720_vm5 = vcmp.gt.s32.totalorder %v8719_v44, %v8718_v41  ;;  %v554_v19 = vmax.f32 %v410_v29, 0.0  ;;  %vm1496_vm0 = vcmp.ne.f32.partialorder %v410_v29, %v410_v29 }
 0x232   :  { %8705 = vst [vmem:[#allocation131_spill] sm:$0xff] %v6419_v62  ;;  %v6477_v22 = vsel %vm8720_vm5, %v8719_v44, %v8718_v41  ;;  %v1775_v2 = vand.u32 2147483647, %v410_v29  ;;  %vm2148_vm6 = vcmp.ne.f32.partialorder %v6387_v25, %v6387_v25  ;;  %v1820_v47 = vand.u32 2147483647, %v6372_v59 }
 0x233   :  { %8706 = vst [vmem:[#allocation132_spill] sm:$0xff] %v6422_v37  ;;  %v6487_v36 = vsel %vm1496_vm0, 1, %v8657_v40  ;;  %vm2118_vm2 = vcmp.ne.f32.partialorder %v554_v19, %v554_v19  ;;  %v2397_v41 = vand.u32 2147483647, %v554_v19  ;;  %vm6493_vm12 = vcmp.eq.f32.partialorder %v2412_v26, inf }
 0x234   :  { %8707 = vst [vmem:[#allocation133_spill] sm:$0xff] %v6425_v6  ;;  %vm1626_vm1 = vcmp.gt.s32.totalorder %v6455_v45, %v6487_v36  ;;  %vm1839_vm3 = vcmp.eq.f32.partialorder %v1775_v2, inf  ;;  %vm6497_vm11 = vcmp.eq.f32.partialorder %v1805_v50, inf  ;;  %v6505_v44 = vsel %vm2118_vm2, 1, %v8657_v40  ;;  %v524_v2 = vpop.f32.mrf.mxu3 }
 0x235   :  { %8708 = vst [vmem:[#allocation36_spill] sm:$0xff] %v6428_v11  ;;  %v6489_v11 = vmax.f32 %v450_v20, 0.0  ;;  %v6502_v38 = vsel %vm1839_vm3, 1, %v8657_v40  ;;  %vm1541_vm15 = vcmp.ne.f32.partialorder %v6372_v59, %v6372_v59  ;;  %vm2461_vm5 = vcmp.eq.f32.partialorder %v2397_v41, inf }
 0x236   :  { %727 = vst [vmem:[#allocation8 + $0x1b8] sm:$0xff] %v6409_v58  ;;  %vm1969_vm8 = vcmp.gt.s32.totalorder %v6462_v32, %v6502_v38  ;;  %vm2491_vm0 = vcmp.eq.f32.partialorder %v2427_v5, inf  ;;  %vm2163_vm3 = vcmp.ne.f32.partialorder %v6409_v58, %v6409_v58  ;;  %v6518_v26 = vsel %vm2461_vm5, 1, %v8657_v40  ;;  %v8737_v58 = vld [vmem:[#allocation102_spill] sm:$0xff]  ;;  %v451_v42 = vpop.f32.mrf.mxu1 }
 0x237   :  { %618 = vst [vmem:[#allocation7 + $0x50] sm:$0xff] %v410_v29  ;;  %v6521_v50 = vmax.f32 %v6481_v39, 0.0  ;;  %v6527_v7 = vsel %vm2148_vm6, 1, %v8657_v40  ;;  %vm1884_vm2 = vcmp.eq.f32.partialorder %v1820_v47, inf  ;;  %v1791_v5 = vand.u32 2147483647, %v450_v20 }
 0x238   :  { %634 = vst [vmem:[#allocation7 + $0xd0] sm:$0xff] %v450_v20  ;;  %v6534_v41 = vsel %vm6493_vm12, 1, %v8657_v40  ;;  %v6539_v43 = vsel %vm6497_vm11, 1, %v8657_v40  ;;  %v6545_v25 = vsel %vm1541_vm15, 1, %v8657_v40  ;;  %vm1512_vm6 = vcmp.ne.f32.partialorder %v450_v20, %v450_v20 }
 0x239   :  { %682 = vst [vmem:[#allocation8 + $0x50] sm:$0xff] %v554_v19  ;;  %v411_v19 = vpop.f32.mrf.mxu0  ;;  %v6549_v47 = vsel %vm2491_vm0, 1, %v8657_v40  ;;  %v6552_v27 = vsel %vm2163_vm3, 1, %v8657_v40  ;;  %v2413_v9 = vand.u32 2147483647, %v6489_v11  ;;  %v6556_v29 = vadd.f32 %v6147_v15, %v524_v2 }
 0x23a   :  { %698 = vst [vmem:[#allocation8 + $0xd0] sm:$0xff] %v6489_v11  ;;  %v6559_v37 = vsel %vm1884_vm2, 1, %v8657_v40  ;;  %v412_v20 = vadd.f32 %v6147_v15, %v411_v19  ;;  %vm6573_vm11 = vcmp.eq.f32.partialorder %v1791_v5, inf  ;;  %vm2134_vm15 = vcmp.ne.f32.partialorder %v6489_v11, %v6489_v11 }
 0x23b   :  { %649 = vst [vmem:[#allocation7 + $0x148] sm:$0xff] %v6481_v39  ;;  %v600_v59 = vmax.f32 %v6556_v29, 0.0  ;;  %vm1527_vm5 = vcmp.ne.f32.partialorder %v6481_v39, %v6481_v39  ;;  %vm6583_vm3 = vcmp.eq.f32.partialorder %v2413_v9, inf  ;;  %v1806_v5 = vand.u32 2147483647, %v6481_v39 }
 0x23c   :  { %8725 = vst [vmem:[#allocation41_spill] sm:$0xff] %v6545_v25  ;;  %v8729_v25 = vld [vmem:[#allocation35_spill] sm:$0xff]  ;;  %v555_v19 = vmax.f32 %v412_v20, 0.0  ;;  %vm1497_vm0 = vcmp.ne.f32.partialorder %v412_v20, %v412_v20  ;;  %vm8739_vm2 = vcmp.gt.s32.totalorder %v8738_v14, %v8737_v58  ;;  %v526_v56 = vpop.f32.mrf.mxu3  ;;  %v6626_v61 = vadd.f32 %v6147_v15, %v451_v42 }
 0x23d   :  { %713 = vst [vmem:[#allocation8 + $0x148] sm:$0xff] %v6521_v50  ;;  %vm8730_vm12 = vcmp.gt.s32.totalorder %v8729_v25, %v8728_v21  ;;  %v6596_v6 = vsel %vm8739_vm2, %v8738_v14, %v8737_v58  ;;  %v6682_v2 = vsel %vm6583_vm3, 1, %v8657_v40 }
 0x23e   :  { %8726 = vst [vmem:[#allocation37_spill] sm:$0xff] %v6552_v27  ;;  %v6568_v62 = vsel %vm8730_vm12, %v8729_v25, %v8728_v21  ;;  %v6571_v27 = vsel %vm1512_vm6, 1, %v8657_v40  ;;  %v1776_v21 = vand.u32 2147483647, %v412_v20  ;;  %vm2119_vm10 = vcmp.ne.f32.partialorder %v555_v19, %v555_v19 }
 0x23f   :  { %8727 = vst [vmem:[#allocation47_spill] sm:$0xff] %v6559_v37  ;;  %v6589_v37 = vsel %vm1497_vm0, 1, %v8657_v40  ;;  %v6605_v1 = vsel %vm2119_vm10, 1, %v8657_v40  ;;  %vm8745_vm0 = vcmp.gt.s32.totalorder %v8744_v8, %v8743_v57  ;;  %v2398_v58 = vand.u32 2147483647, %v555_v19 }
 0x240   :  { %8731 = vst [vmem:[#allocation33_spill] sm:$0xff] %v6568_v62  ;;  %vm1840_vm12 = vcmp.eq.f32.partialorder %v1776_v21, inf  ;;  %v6612_v14 = vsel %vm8745_vm0, %v8744_v8, %v8743_v57  ;;  %v8747_v21 = vld [vmem:[#allocation109_spill] sm:$0xff]  ;;  %v8748_v62 = vld [vmem:[#allocation44_spill] sm:$0xff]  ;;  %v489_v8 = vpop.f32.mrf.mxu2  ;;  %vm6634_vm6 = vcmp.eq.f32.partialorder %v1806_v5, inf  ;;  %v6642_v42 = vmax.f32 %v6626_v61, 0.0 }
 0x241   :  { %664 = vst [vmem:[#allocation7 + $0x1c0] sm:$0xff] %v6556_v29  ;;  %v6602_v9 = vsel %vm1840_vm12, 1, %v8657_v40  ;;  %vm8749_vm10 = vcmp.gt.s32.totalorder %v8748_v62, %v8747_v21  ;;  %v414_v57 = vpop.f32.mrf.mxu0  ;;  %vm2149_vm12 = vcmp.ne.f32.partialorder %v6521_v50, %v6521_v50  ;;  %vm2462_vm0 = vcmp.eq.f32.partialorder %v2398_v58, inf }
 0x242   :  { %619 = vst [vmem:[#allocation7 + $0x58] sm:$0xff] %v412_v20  ;;  %v2428_v20 = vand.u32 2147483647, %v6521_v50  ;;  %v6692_v39 = vsel %vm6634_vm6, 1, %v8657_v40  ;;  %v6698_v11 = vsel %vm2149_vm12, 1, %v8657_v40 }
 0x243   :  { %728 = vst [vmem:[#allocation8 + $0x1c0] sm:$0xff] %v600_v59  ;;  %v2414_v58 = vand.u32 2147483647, %v6642_v42 }
 0x244   :  { %8736 = vst [vmem:[#allocation48_spill] sm:$0xff] %v6589_v37  ;;  %v6623_v37 = vsel %vm8749_vm10, %v8748_v62, %v8747_v21  ;;  %v6639_v62 = vsel %vm2462_vm0, 1, %v8657_v40  ;;  %v6646_v21 = vadd.f32 %v6147_v15, %v526_v56  ;;  %vm6648_vm10 = vcmp.eq.f32.partialorder %v2428_v20, inf }
 0x245   :  { %8740 = vst [vmem:[#allocation39_spill] sm:$0xff] %v6596_v6  ;;  %v6662_v6 = vsel %vm6573_vm11, 1, %v8657_v40  ;;  %v6668_v56 = vsel %vm2134_vm15, 1, %v8657_v40  ;;  %v6674_v20 = vsel %vm1527_vm5, 1, %v8657_v40  ;;  %vm1542_vm0 = vcmp.ne.f32.partialorder %v6556_v29, %v6556_v29 }
 0x246   :  { %683 = vst [vmem:[#allocation8 + $0x58] sm:$0xff] %v555_v19  ;;  %v1821_v19 = vand.u32 2147483647, %v6556_v29  ;;  %vm1513_vm15 = vcmp.ne.f32.partialorder %v6626_v61, %v6626_v61  ;;  %v6703_v29 = vsel %vm6648_vm10, 1, %v8657_v40 }
 0x247   :  { %8741 = vst [vmem:[#allocation51_spill] sm:$0xff] %v6602_v9  ;;  %v8766_v9 = vld [vmem:[#allocation49_spill] sm:$0xff] }
 0x248   :  { %8742 = vst [vmem:[#allocation100_spill] sm:$0xff] %v6605_v1  ;;  %vm1885_vm11 = vcmp.eq.f32.partialorder %v1821_v19, inf  ;;  %v6710_v1 = vand.u32 2147483647, %v600_v59  ;;  %v1792_v19 = vand.u32 2147483647, %v6626_v61 }
 0x249   :  { %8746 = vst [vmem:[#allocation104_spill] sm:$0xff] %v6612_v14  ;;  %v6632_v14 = vadd.f32 %v6147_v15, %v489_v8  ;;  %v415_v8 = vadd.f32 %v6147_v15, %v414_v57  ;;  %v6708_v57 = vsel %vm1542_vm0, 1, %v8657_v40  ;;  %v6714_v50 = vsel %vm1885_vm11, 1, %v8657_v40 }
 0x24a   :  { %8750 = vst [vmem:[#allocation99_spill] sm:$0xff] %v6623_v37  ;;  %v6717_v37 = vsel %vm1513_vm15, 1, %v8657_v40 }
 0x24b   :  { %8753 = vst [vmem:[#allocation110_spill] sm:$0xff] %v6639_v62  ;;  %v6655_v5 = vmax.f32 %v6632_v14, 0.0  ;;  %vm1528_vm5 = vcmp.ne.f32.partialorder %v6632_v14, %v6632_v14  ;;  %v8762_v62 = vmax.f32 %v6646_v21, 0.0  ;;  %vm1498_vm3 = vcmp.ne.f32.partialorder %v415_v8, %v415_v8 }
 0x24c   :  { %635 = vst [vmem:[#allocation7 + $0xd8] sm:$0xff] %v6626_v61  ;;  %v6721_v25 = vsel %vm1528_vm5, 1, %v8657_v40  ;;  %v556_v61 = vmax.f32 %v415_v8, 0.0 }
 0x24d   :  { %650 = vst [vmem:[#allocation7 + $0x150] sm:$0xff] %v6632_v14 }
 0x24e   :  { %699 = vst [vmem:[#allocation8 + $0xd8] sm:$0xff] %v6642_v42  ;;  %vm2120_vm12 = vcmp.ne.f32.partialorder %v556_v61, %v556_v61 }
 0x24f   :  { %714 = vst [vmem:[#allocation8 + $0x150] sm:$0xff] %v6655_v5 }
 0x250   :  { %8756 = vst [vmem:[#allocation31_spill] sm:$0xff] %v6703_v29 }
 0x251   :  { %665 = vst [vmem:[#allocation7 + $0x1c8] sm:$0xff] %v6646_v21 }
 0x252   :  { %8757 = vst [vmem:[#allocation55_spill] sm:$0xff] %v6708_v57  ;;  %v2245_v57 = vsel %vm2244_vm7, %v6169_v4, %v6191_v3  ;;  %v8764_v3 = vld [vmem:[#allocation77_spill] sm:$0xff] }
 0x253   :  { %8758 = vst [vmem:[#allocation15_spill] sm:$0xff] %v6710_v1 }
 0x254   :  { %620 = vst [vmem:[#allocation7 + $0x60] sm:$0xff] %v415_v8 }
 0x255   :  { %8759 = vst [vmem:[#allocation58_spill] sm:$0xff] %v6714_v50  ;;  %v1562_v50 = vsel %vm1498_vm3, 1, %v8657_v40 }
 0x256   :  { %8760 = vst [vmem:[#allocation64_spill] sm:$0xff] %v6717_v37  ;;  %v1623_v37 = vsel %vm1622_vm14, %v6155_v0, %v6174_v52  ;;  %v2184_v0 = vsel %vm2120_vm12, 1, %v8657_v40  ;;  %v2399_v52 = vand.u32 2147483647, %v556_v61 }
 0x257   :  { %8761 = vst [vmem:[#allocation59_spill] sm:$0xff] %v6721_v25  ;;  %v1777_v25 = vand.u32 2147483647, %v415_v8  ;;  %vm1630_vm6 = vcmp.gt.s32.totalorder %v1623_v37, %v1562_v50  ;;  %v8763_v8 = vld [vmem:[#allocation45_spill] sm:$0xff]  ;;  %vm2252_vm0 = vcmp.gt.s32.totalorder %v2245_v57, %v2184_v0 }
 0x258   :  { %729 = vst [vmem:[#allocation8 + $0x1c8] sm:$0xff] %v8762_v62  ;;  %v1966_v62 = vsel %vm1965_vm4, %v6162_v53, %v6188_v54  ;;  %v1631_v1 = vsel %vm1630_vm6, %v1623_v37, %v1562_v50  ;;  %v2588_v53 = vsel %vm2587_vm9, %v6181_v17, %v6220_v33  ;;  %v2253_v4 = vsel %vm2252_vm0, %v2245_v57, %v2184_v0 }
 0x259   :  { %684 = vst [vmem:[#allocation8 + $0x60] sm:$0xff] %v556_v61  ;;  %vm1841_vm10 = vcmp.eq.f32.partialorder %v1777_v25, inf  ;;  %vm1638_vm14 = vcmp.gt.s32.totalorder %v1631_v1, %v8763_v8  ;;  %vm2463_vm7 = vcmp.eq.f32.partialorder %v2399_v52, inf  ;;  %v8765_v25 = vld [vmem:[#allocation50_spill] sm:$0xff]  ;;  %v454_v61 = vpop.f32.mrf.mxu1  ;;  %vm6767_vm0 = vcmp.eq.f32.partialorder %v1792_v19, inf }
 0x25a   :  { %v1905_v59 = vsel %vm1841_vm10, 1, %v8657_v40  ;;  %v1639_v54 = vsel %vm1638_vm14, %v1631_v1, %v8763_v8  ;;  %vm2260_vm15 = vcmp.gt.s32.totalorder %v2253_v4, %v8765_v25  ;;  %v2527_v50 = vsel %vm2463_vm7, 1, %v8657_v40  ;;  %v8767_v1 = vld [vmem:[#allocation79_spill] sm:$0xff] }
 0x25b   :  { %vm1973_vm4 = vcmp.gt.s32.totalorder %v1966_v62, %v1905_v59  ;;  %vm1646_vm11 = vcmp.gt.s32.totalorder %v1639_v54, %v8764_v3  ;;  %v2261_v29 = vsel %vm2260_vm15, %v2253_v4, %v8765_v25  ;;  %vm2595_vm3 = vcmp.gt.s32.totalorder %v2588_v53, %v2527_v50 }
 0x25c   :  { %v1974_v37 = vsel %vm1973_vm4, %v1966_v62, %v1905_v59  ;;  %v455_v17 = vadd.f32 %v6147_v15, %v454_v61  ;;  %vm2268_vm9 = vcmp.gt.s32.totalorder %v2261_v29, %v8767_v1  ;;  %v2596_v57 = vsel %vm2595_vm3, %v2588_v53, %v2527_v50  ;;  %v8768_v59 = vld [vmem:[#allocation78_spill] sm:$0xff]  ;;  %v8769_v62 = vld [vmem:[#allocation52_spill] sm:$0xff] }
 0x25d   :  { %vm1981_vm5 = vcmp.gt.s32.totalorder %v1974_v37, %v8766_v9  ;;  %v1647_v0 = vsel %vm1646_vm11, %v1639_v54, %v8764_v3  ;;  %vm2603_vm12 = vcmp.gt.s32.totalorder %v2596_v57, %v8769_v62  ;;  %vm2135_vm4 = vcmp.ne.f32.partialorder %v6642_v42, %v6642_v42  ;;  %v8772_v53 = vld [vmem:[#allocation80_spill] sm:$0xff] }
 0x25e   :  { %v1982_v33 = vsel %vm1981_vm5, %v1974_v37, %v8766_v9  ;;  %v572_v52 = vmax.f32 %v455_v17, 0.0  ;;  %636 = vst [vmem:[#allocation7 + $0xe0] sm:$0xff] %v455_v17  ;;  %vm1514_vm10 = vcmp.ne.f32.partialorder %v455_v17, %v455_v17  ;;  %v2604_v8 = vsel %vm2603_vm12, %v2596_v57, %v8769_v62  ;;  %v491_v62 = vpop.f32.mrf.mxu2 }
 0x25f   :  { %vm1989_vm6 = vcmp.gt.s32.totalorder %v1982_v33, %v8768_v59  ;;  %v1578_v4 = vsel %vm1514_vm10, 1, %v8657_v40  ;;  %vm1654_vm14 = vcmp.gt.s32.totalorder %v1647_v0, %v6300_v35  ;;  %v1793_v25 = vand.u32 2147483647, %v455_v17  ;;  %v8775_v17 = vld [vmem:[#allocation57_spill] sm:$0xff] }
 0x260   :  { %vm2611_vm7 = vcmp.gt.s32.totalorder %v2604_v8, %v8772_v53  ;;  %700 = vst [vmem:[#allocation8 + $0xe0] sm:$0xff] %v572_v52  ;;  %v1655_v54 = vsel %vm1654_vm14, %v1647_v0, %v6300_v35  ;;  %v1990_v3 = vsel %vm1989_vm6, %v1982_v33, %v8768_v59  ;;  %vm2136_vm11 = vcmp.ne.f32.partialorder %v572_v52, %v572_v52 }
 0x261   :  { %vm6776_vm15 = vcmp.eq.f32.partialorder %v2414_v58, inf  ;;  %vm2150_vm5 = vcmp.ne.f32.partialorder %v6655_v5, %v6655_v5  ;;  %vm1662_vm3 = vcmp.gt.s32.totalorder %v1655_v54, %v1578_v4  ;;  %vm1857_vm12 = vcmp.eq.f32.partialorder %v1793_v25, inf }
 0x262   :  { %vm1997_vm10 = vcmp.gt.s32.totalorder %v1990_v3, %v6377_v60  ;;  %v2200_v19 = vsel %vm2136_vm11, 1, %v8657_v40  ;;  %v1663_v50 = vsel %vm1662_vm3, %v1655_v54, %v1578_v4  ;;  %v1921_v61 = vsel %vm1857_vm12, 1, %v8657_v40  ;;  %v8776_v4 = vld [vmem:[#allocation95_spill] sm:$0xff] }
 0x263   :  { %v1998_v35 = vsel %vm1997_vm10, %v1990_v3, %v6377_v60  ;;  %v2269_v58 = vsel %vm2268_vm9, %v2261_v29, %v8767_v1  ;;  %vm1670_vm6 = vcmp.gt.s32.totalorder %v1663_v50, %v8775_v17  ;;  %v2415_v33 = vand.u32 2147483647, %v572_v52  ;;  %v8777_v29 = vld [vmem:[#allocation65_spill] sm:$0xff]  ;;  %v529_v3 = vpop.f32.mrf.mxu3 }
 0x264   :  { %vm2005_vm14 = vcmp.gt.s32.totalorder %v1998_v35, %v1921_v61  ;;  %vm2276_vm2 = vcmp.gt.s32.totalorder %v2269_v58, %v6308_v23  ;;  %v6792_v57 = vsel %vm1670_vm6, %v1663_v50, %v8775_v17  ;;  %v2612_v60 = vsel %vm2611_vm7, %v2604_v8, %v8772_v53  ;;  %v8779_v8 = vld [vmem:[#allocation69_spill] sm:$0xff]  ;;  %v416_v50 = vpop.f32.mrf.mxu0 }
 0x265   :  { %v2006_v0 = vsel %vm2005_vm14, %v1998_v35, %v1921_v61  ;;  %v2277_v59 = vsel %vm2276_vm2, %v2269_v58, %v6308_v23  ;;  %vm1678_vm9 = vcmp.gt.s32.totalorder %v6792_v57, %v8776_v4  ;;  %vm2479_vm12 = vcmp.eq.f32.partialorder %v2415_v33, inf  ;;  %v8778_v23 = vld [vmem:[#allocation105_spill] sm:$0xff] }
 0x266   :  { %vm2013_vm11 = vcmp.gt.s32.totalorder %v2006_v0, %v8777_v29  ;;  %vm2284_vm3 = vcmp.gt.s32.totalorder %v2277_v59, %v2200_v19  ;;  %v2543_v25 = vsel %vm2479_vm12, 1, %v8657_v40  ;;  %vm2619_vm2 = vcmp.gt.s32.totalorder %v2612_v60, %v6382_v16 }
 0x267   :  { %v6802_v1 = vsel %vm2013_vm11, %v2006_v0, %v8777_v29  ;;  %v2285_v52 = vsel %vm2284_vm3, %v2277_v59, %v2200_v19  ;;  %v2620_v53 = vsel %vm2619_vm2, %v2612_v60, %v6382_v16  ;;  %v6811_v54 = vadd.f32 %v6147_v15, %v491_v62  ;;  %v8783_v16 = vld [vmem:[#allocation106_spill] sm:$0xff] }
 0x268   :  { %vm2021_vm10 = vcmp.gt.s32.totalorder %v6802_v1, %v8778_v23  ;;  %vm2292_vm7 = vcmp.gt.s32.totalorder %v2285_v52, %v8779_v8  ;;  %v8780_v61 = vand.u32 2147483647, %v6632_v14  ;;  %vm2627_vm14 = vcmp.gt.s32.totalorder %v2620_v53, %v2543_v25  ;;  %v8787_v59 = vld [vmem:[#allocation70_spill] sm:$0xff] }
 0x269   :  { %v6820_v35 = vsel %vm2292_vm7, %v2285_v52, %v8779_v8  ;;  %v6823_v58 = vadd.f32 %v6147_v15, %v529_v3  ;;  %vm1543_vm11 = vcmp.ne.f32.partialorder %v6646_v21, %v6646_v21  ;;  %v2628_v17 = vsel %vm2627_vm14, %v2620_v53, %v2543_v25  ;;  %651 = vst [vmem:[#allocation7 + $0x158] sm:$0xff] %v6811_v54  ;;  %v8789_v53 = vld [vmem:[#allocation107_spill] sm:$0xff] }
 0x26a   :  { %vm6815_vm6 = vcmp.eq.f32.partialorder %v8780_v61, inf  ;;  %vm2300_vm3 = vcmp.gt.s32.totalorder %v6820_v35, %v8783_v16  ;;  %v6830_v14 = vmax.f32 %v6811_v54, 0.0  ;;  %v8784_v33 = vand.u32 2147483647, %v6655_v5 }
 0x26b   :  { %vm2635_vm2 = vcmp.gt.s32.totalorder %v2628_v17, %v8787_v59  ;;  %v6841_v60 = vmax.f32 %v6823_v58, 0.0  ;;  %666 = vst [vmem:[#allocation7 + $0x1d0] sm:$0xff] %v6823_v58  ;;  %v417_v62 = vadd.f32 %v6147_v15, %v416_v50  ;;  %v6848_v29 = vsel %vm6767_vm0, 1, %v8657_v40 }
 0x26c   :  { %vm6835_vm12 = vcmp.eq.f32.partialorder %v8784_v33, inf  ;;  %v6854_v52 = vsel %vm2135_vm4, 1, %v8657_v40  ;;  %v8788_v25 = vand.u32 2147483647, %v6646_v21  ;;  %v6859_v8 = vsel %vm2635_vm2, %v2628_v17, %v8787_v59  ;;  %715 = vst [vmem:[#allocation8 + $0x158] sm:$0xff] %v6830_v14 }
 0x26d   :  { %v6865_v9 = vsel %vm6776_vm15, 1, %v8657_v40  ;;  %v6871_v42 = vsel %vm2150_vm5, 1, %v8657_v40  ;;  %vm2643_vm0 = vcmp.gt.s32.totalorder %v6859_v8, %v8789_v53  ;;  %vm1529_vm4 = vcmp.ne.f32.partialorder %v6811_v54, %v6811_v54  ;;  %730 = vst [vmem:[#allocation8 + $0x1d0] sm:$0xff] %v6841_v60 }
 0x26e   :  { %vm1886_vm7 = vcmp.eq.f32.partialorder %v8788_v25, inf  ;;  %v6881_v37 = vsel %vm6815_vm6, 1, %v8657_v40  ;;  %v6886_v3 = vsel %vm6835_vm12, 1, %v8657_v40  ;;  %v6892_v5 = vsel %vm1543_vm11, 1, %v8657_v40  ;;  %621 = vst [vmem:[#allocation7 + $0x68] sm:$0xff] %v417_v62 }
 0x26f   :  { %8790 = vst [vmem:[#allocation66_spill] sm:$0xff] %v6892_v5  ;;  %v8791_v50 = vmax.f32 %v6646_v21, 0.0  ;;  %v6899_v17 = vsel %vm1886_vm7, 1, %v8657_v40  ;;  %v557_v19 = vmax.f32 %v417_v62, 0.0  ;;  %vm1499_vm15 = vcmp.ne.f32.partialorder %v417_v62, %v417_v62 }
 0x270   :  { %8793 = vst [vmem:[#allocation84_spill] sm:$0xff] %v6899_v17  ;;  %v1625_v33 = vsel %vm1624_vm13, %v6322_v13, %v6333_v63  ;;  %v6907_v0 = vsel %vm1529_vm4, 1, %v8657_v40  ;;  %v1563_v59 = vsel %vm1499_vm15, 1, %v8657_v40  ;;  %v1778_v21 = vand.u32 2147483647, %v417_v62  ;;  %v8797_v17 = vld [vmem:[#allocation56_spill] sm:$0xff] }
 0x271   :  { %v6896_v61 = vand.u32 2147483647, %v8791_v50  ;;  %8794 = vst [vmem:[#allocation71_spill] sm:$0xff] %v6907_v0  ;;  %vm8795_vm5 = vcmp.gt.s32.totalorder %v6329_v51, %v6348_v55  ;;  %vm1632_vm6 = vcmp.gt.s32.totalorder %v1625_v33, %v1563_v59  ;;  %vm2121_vm14 = vcmp.ne.f32.partialorder %v557_v19, %v557_v19  ;;  %v456_v50 = vpop.f32.mrf.mxu1 }
 0x272   :  { %v1968_v25 = vsel %vm8795_vm5, %v6329_v51, %v6348_v55  ;;  %685 = vst [vmem:[#allocation8 + $0x68] sm:$0xff] %v557_v19  ;;  %vm8796_vm13 = vcmp.gt.s32.totalorder %v6340_v46, %v6345_v49  ;;  %v1633_v63 = vsel %vm1632_vm6, %v1625_v33, %v1563_v59  ;;  %vm1842_vm11 = vcmp.eq.f32.partialorder %v1778_v21, inf  ;;  %v8800_v33 = vld [vmem:[#allocation62_spill] sm:$0xff]  ;;  %v8801_v21 = vld [vmem:[#allocation61_spill] sm:$0xff] }
 0x273   :  { %8792 = vst [vmem:[#allocation60_spill] sm:$0xff] %v6896_v61  ;;  %v2247_v13 = vsel %vm8796_vm13, %v6340_v46, %v6345_v49  ;;  %v2185_v62 = vsel %vm2121_vm14, 1, %v8657_v40  ;;  %v2400_v61 = vand.u32 2147483647, %v557_v19  ;;  %vm1640_vm12 = vcmp.gt.s32.totalorder %v1633_v63, %v8797_v17  ;;  %v8799_v49 = vld [vmem:[#allocation93_spill] sm:$0xff] }
 0x274   :  { %v1906_v51 = vsel %vm1842_vm11, 1, %v8657_v40  ;;  %vm2254_vm2 = vcmp.gt.s32.totalorder %v2247_v13, %v2185_v62  ;;  %vm8798_vm7 = vcmp.gt.s32.totalorder %v6357_v12, %v6367_v10  ;;  %v1641_v5 = vsel %vm1640_vm12, %v1633_v63, %v8797_v17  ;;  %v8802_v17 = vld [vmem:[#allocation94_spill] sm:$0xff]  ;;  %v8803_v63 = vld [vmem:[#allocation96_spill] sm:$0xff] }
 0x275   :  { %v2590_v55 = vsel %vm8798_vm7, %v6357_v12, %v6367_v10  ;;  %vm1975_vm4 = vcmp.gt.s32.totalorder %v1968_v25, %v1906_v51  ;;  %v2255_v46 = vsel %vm2254_vm2, %v2247_v13, %v2185_v62  ;;  %vm2464_vm15 = vcmp.eq.f32.partialorder %v2400_v61, inf }
 0x276   :  { %vm1648_vm5 = vcmp.gt.s32.totalorder %v1641_v5, %v8799_v49  ;;  %v1976_v19 = vsel %vm1975_vm4, %v1968_v25, %v1906_v51  ;;  %vm2262_vm6 = vcmp.gt.s32.totalorder %v2255_v46, %v8800_v33  ;;  %v2528_v59 = vsel %vm2464_vm15, 1, %v8657_v40  ;;  %v8804_v25 = vld [vmem:[#allocation68_spill] sm:$0xff] }
 0x277   :  { %vm1983_vm14 = vcmp.gt.s32.totalorder %v1976_v19, %v8801_v21  ;;  %v2263_v0 = vsel %vm2262_vm6, %v2255_v46, %v8800_v33  ;;  %vm2597_vm13 = vcmp.gt.s32.totalorder %v2590_v55, %v2528_v59  ;;  %v457_v12 = vadd.f32 %v6147_v15, %v456_v50 }
 0x278   :  { %v1984_v10 = vsel %vm1983_vm14, %v1976_v19, %v8801_v21  ;;  %vm2270_vm11 = vcmp.gt.s32.totalorder %v2263_v0, %v8802_v17  ;;  %v2598_v13 = vsel %vm2597_vm13, %v2590_v55, %v2528_v59  ;;  %v1649_v61 = vsel %vm1648_vm5, %v1641_v5, %v8799_v49  ;;  %v8805_v19 = vld [vmem:[#allocation98_spill] sm:$0xff] }
 0x279   :  { %vm1991_vm12 = vcmp.gt.s32.totalorder %v1984_v10, %v8803_v63  ;;  %vm2605_vm2 = vcmp.gt.s32.totalorder %v2598_v13, %v8804_v25  ;;  %v573_v62 = vmax.f32 %v457_v12, 0.0  ;;  %637 = vst [vmem:[#allocation7 + $0xe8] sm:$0xff] %v457_v12  ;;  %vm1515_vm7 = vcmp.ne.f32.partialorder %v457_v12, %v457_v12 }
 0x27a   :  { %v2606_v51 = vsel %vm2605_vm2, %v2598_v13, %v8804_v25  ;;  %v1579_v46 = vsel %vm1515_vm7, 1, %v8657_v40  ;;  %vm1656_vm4 = vcmp.gt.s32.totalorder %v1649_v61, %v6432_v31  ;;  %v1794_v50 = vand.u32 2147483647, %v457_v12  ;;  %v8806_v13 = vld [vmem:[#allocation23_spill] sm:$0xff] }
 0x27b   :  { %vm2613_vm15 = vcmp.gt.s32.totalorder %v2606_v51, %v8805_v19  ;;  %701 = vst [vmem:[#allocation8 + $0xe8] sm:$0xff] %v573_v62  ;;  %v1657_v55 = vsel %vm1656_vm4, %v1649_v61, %v6432_v31  ;;  %v1992_v5 = vsel %vm1991_vm12, %v1984_v10, %v8803_v63  ;;  %vm2137_vm5 = vcmp.ne.f32.partialorder %v573_v62, %v573_v62  ;;  %v8807_v25 = vld [vmem:[#allocation119_spill] sm:$0xff] }
 0x27c   :  { %vm1664_vm6 = vcmp.gt.s32.totalorder %v1657_v55, %v1579_v46  ;;  %vm1858_vm14 = vcmp.eq.f32.partialorder %v1794_v50, inf  ;;  %vm1999_vm13 = vcmp.gt.s32.totalorder %v1992_v5, %v6436_v18  ;;  %v2201_v49 = vsel %vm2137_vm5, 1, %v8657_v40  ;;  %v8809_v50 = vld [vmem:[#allocation120_spill] sm:$0xff] }
 0x27d   :  { %v1665_v33 = vsel %vm1664_vm6, %v1657_v55, %v1579_v46  ;;  %v1922_v59 = vsel %vm1858_vm14, 1, %v8657_v40  ;;  %v2000_v21 = vsel %vm1999_vm13, %v1992_v5, %v6436_v18  ;;  %v2271_v12 = vsel %vm2270_vm11, %v2263_v0, %v8802_v17  ;;  %v8808_v0 = vld [vmem:[#allocation24_spill] sm:$0xff] }
 0x27e   :  { %vm1672_vm2 = vcmp.gt.s32.totalorder %v1665_v33, %v8806_v13  ;;  %vm2007_vm7 = vcmp.gt.s32.totalorder %v2000_v21, %v1922_v59  ;;  %vm2278_vm12 = vcmp.gt.s32.totalorder %v2271_v12, %v6439_v48  ;;  %v2416_v31 = vand.u32 2147483647, %v573_v62 }
 0x27f   :  { %v6957_v10 = vsel %vm1672_vm2, %v1665_v33, %v8806_v13  ;;  %v2008_v61 = vsel %vm2007_vm7, %v2000_v21, %v1922_v59  ;;  %v2279_v63 = vsel %vm2278_vm12, %v2271_v12, %v6439_v48  ;;  %v2614_v18 = vsel %vm2613_vm15, %v2606_v51, %v8805_v19  ;;  %v494_v48 = vpop.f32.mrf.mxu2  ;;  %v8810_v51 = vld [vmem:[#allocation25_spill] sm:$0xff] }
 0x280   :  { %vm1680_vm4 = vcmp.gt.s32.totalorder %v6957_v10, %v8807_v25  ;;  %vm2015_vm11 = vcmp.gt.s32.totalorder %v2008_v61, %v8808_v0  ;;  %vm2286_vm5 = vcmp.gt.s32.totalorder %v2279_v63, %v2201_v49  ;;  %vm2480_vm6 = vcmp.eq.f32.partialorder %v2416_v31, inf  ;;  %v8811_v33 = vld [vmem:[#allocation121_spill] sm:$0xff] }
 0x281   :  { %v6967_v17 = vsel %vm2015_vm11, %v2008_v61, %v8808_v0  ;;  %v2287_v62 = vsel %vm2286_vm5, %v2279_v63, %v2201_v49  ;;  %v2544_v46 = vsel %vm2480_vm6, 1, %v8657_v40  ;;  %vm2621_vm14 = vcmp.gt.s32.totalorder %v2614_v18, %v6534_v41 }
 0x282   :  { %vm2294_vm15 = vcmp.gt.s32.totalorder %v2287_v62, %v8810_v51  ;;  %v2622_v19 = vsel %vm2621_vm14, %v2614_v18, %v6534_v41  ;;  %v495_v55 = vadd.f32 %v6147_v15, %v494_v48  ;;  %vm2151_vm2 = vcmp.ne.f32.partialorder %v6830_v14, %v6830_v14  ;;  %v531_v48 = vpop.f32.mrf.mxu3 }
 0x283   :  { %v6979_v5 = vsel %vm2294_vm15, %v2287_v62, %v8810_v51  ;;  %vm2629_vm7 = vcmp.gt.s32.totalorder %v2622_v19, %v2544_v46  ;;  %v1679_v49 = vsel %vm1678_vm9, %v6792_v57, %v8776_v4  ;;  %v2022_v41 = vsel %vm2021_vm10, %v6802_v1, %v8778_v23  ;;  %v8815_v4 = vld [vmem:[#allocation27_spill] sm:$0xff]  ;;  %v8817_v62 = vld [vmem:[#allocation26_spill] sm:$0xff] }
 0x284   :  { %vm1544_vm12 = vcmp.ne.f32.partialorder %v6823_v58, %v6823_v58  ;;  %v2630_v59 = vsel %vm2629_vm7, %v2622_v19, %v2544_v46  ;;  %v588_v21 = vmax.f32 %v495_v55, 0.0  ;;  %652 = vst [vmem:[#allocation7 + $0x160] sm:$0xff] %v495_v55  ;;  %vm1530_vm5 = vcmp.ne.f32.partialorder %v495_v55, %v495_v55 }
 0x285   :  { %v8812_v12 = vand.u32 2147483647, %v6811_v54  ;;  %vm2637_vm9 = vcmp.gt.s32.totalorder %v2630_v59, %v8815_v4  ;;  %v1594_v1 = vsel %vm1530_vm5, 1, %v8657_v40  ;;  %vm1686_vm10 = vcmp.gt.s32.totalorder %v1679_v49, %v6446_v28  ;;  %v8816_v54 = vld [vmem:[#allocation122_spill] sm:$0xff] }
 0x286   :  { %v1809_v23 = vand.u32 2147483647, %v495_v55  ;;  %v7005_v13 = vsel %vm2637_vm9, %v2630_v59, %v8815_v4  ;;  %716 = vst [vmem:[#allocation8 + $0x160] sm:$0xff] %v588_v21  ;;  %v1687_v31 = vsel %vm1686_vm10, %v1679_v49, %v6446_v28  ;;  %vm2029_vm14 = vcmp.gt.s32.totalorder %v2022_v41, %v6539_v43  ;;  %v8818_v55 = vld [vmem:[#allocation28_spill] sm:$0xff] }
 0x287   :  { %vm6997_vm6 = vcmp.eq.f32.partialorder %v8812_v12, inf  ;;  %vm2152_vm15 = vcmp.ne.f32.partialorder %v588_v21, %v588_v21  ;;  %vm2645_vm7 = vcmp.gt.s32.totalorder %v7005_v13, %v8816_v54  ;;  %vm1694_vm11 = vcmp.gt.s32.totalorder %v1687_v31, %v1594_v1 }
 0x288   :  { %vm1873_vm13 = vcmp.eq.f32.partialorder %v1809_v23, inf  ;;  %v2030_v61 = vsel %vm2029_vm14, %v2022_v41, %v6539_v43  ;;  %v1695_v63 = vsel %vm1694_vm11, %v1687_v31, %v1594_v1  ;;  %v2216_v0 = vsel %vm2152_vm15, 1, %v8657_v40 }
 0x289   :  { %v1937_v18 = vsel %vm1873_vm13, 1, %v8657_v40  ;;  %v2301_v28 = vsel %vm2300_vm3, %v6820_v35, %v8783_v16  ;;  %vm1702_vm5 = vcmp.gt.s32.totalorder %v1695_v63, %v8817_v62  ;;  %v2431_v46 = vand.u32 2147483647, %v588_v21  ;;  %v419_v16 = vpop.f32.mrf.mxu0 }
 0x28a   :  { %vm2037_vm9 = vcmp.gt.s32.totalorder %v2030_v61, %v1937_v18  ;;  %vm2308_vm10 = vcmp.gt.s32.totalorder %v2301_v28, %v6527_v7  ;;  %v7022_v43 = vsel %vm1702_vm5, %v1695_v63, %v8817_v62  ;;  %v2644_v35 = vsel %vm2643_vm0, %v6859_v8, %v8789_v53  ;;  %v7051_v8 = vld [vmem:[%s7760_s2] ss:$0 sm:$0xff] }
 0x28b   :  { %v7024_v51 = vsel %vm2037_vm9, %v2030_v61, %v1937_v18  ;;  %v2309_v19 = vsel %vm2308_vm10, %v2301_v28, %v6527_v7  ;;  %vm2495_vm11 = vcmp.eq.f32.partialorder %v2431_v46, inf  ;;  %vm2651_vm14 = vcmp.gt.s32.totalorder %v2644_v35, %v6549_v47  ;;  %v459_v18 = vpop.f32.mrf.mxu1  ;;  %v8822_v46 = vld [vmem:[#allocation115_spill] sm:$0xff] }
 0x28c   :  { %vm2316_vm13 = vcmp.gt.s32.totalorder %v2309_v19, %v2216_v0  ;;  %v7038_v41 = vsel %vm2495_vm11, 1, %v8657_v40  ;;  %v7041_v7 = vsel %vm2651_vm14, %v2644_v35, %v6549_v47  ;;  %v7044_v59 = vadd.f32 %v6147_v15, %v531_v48  ;;  %v8823_v48 = vld [vmem:[#allocation16_spill] sm:$0xff] }
 0x28d   :  { %v7035_v49 = vsel %vm2316_vm13, %v2309_v19, %v2216_v0  ;;  %v420_v53 = vadd.f32 %v7051_v8, %v419_v16  ;;  %v1627_v47 = vsel %vm1626_vm1, %v6455_v45, %v6487_v36  ;;  %v1970_v15 = vsel %vm1969_vm8, %v6462_v32, %v6502_v38  ;;  %v8821_v0 = vld [vmem:[#allocation73_spill] sm:$0xff] }
 0x28e   :  { %v7068_v21 = vsel %vm2151_vm2, 1, %v8657_v40  ;;  %v2430_v12 = vand.u32 2147483647, %v6830_v14  ;;  %v7072_v4 = vmax.f32 %v7044_v59, 0.0  ;;  %667 = vst [vmem:[#allocation7 + $0x1d8] sm:$0xff] %v7044_v59  ;;  %vm8819_vm1 = vcmp.gt.s32.totalorder %v6470_v34, %v6505_v44  ;;  %v8824_v19 = vld [vmem:[#allocation21_spill] sm:$0xff] }
 0x28f   :  { %v2249_v45 = vsel %vm8819_vm1, %v6470_v34, %v6505_v44  ;;  %v7084_v32 = vsel %vm1544_vm12, 1, %v8657_v40  ;;  %v558_v36 = vmax.f32 %v420_v53, 0.0  ;;  %622 = vst [vmem:[#allocation7 + $0x70] sm:$0xff] %v420_v53  ;;  %vm1500_vm8 = vcmp.ne.f32.partialorder %v420_v53, %v420_v53 }
 0x290   :  { %v1779_v38 = vand.u32 2147483647, %v420_v53  ;;  %v7089_v14 = vsel %vm6997_vm6, 1, %v8657_v40  ;;  %v1823_v1 = vand.u32 2147483647, %v6823_v58  ;;  %731 = vst [vmem:[#allocation8 + $0x1d8] sm:$0xff] %v7072_v4  ;;  %vm8820_vm2 = vcmp.gt.s32.totalorder %v6477_v22, %v6518_v26 }
 0x291   :  { %v1564_v34 = vsel %vm1500_vm8, 1, %v8657_v40  ;;  %v2592_v44 = vsel %vm8820_vm2, %v6477_v22, %v6518_v26  ;;  %v2445_v23 = vand.u32 2147483647, %v6841_v60  ;;  %686 = vst [vmem:[#allocation8 + $0x70] sm:$0xff] %v558_v36  ;;  %vm2122_vm5 = vcmp.ne.f32.partialorder %v558_v36, %v558_v36 }
 0x292   :  { %vm1634_vm12 = vcmp.gt.s32.totalorder %v1627_v47, %v1564_v34  ;;  %vm1843_vm15 = vcmp.eq.f32.partialorder %v1779_v38, inf  ;;  %v2186_v61 = vsel %vm2122_vm5, 1, %v8657_v40  ;;  %v2401_v63 = vand.u32 2147483647, %v558_v36  ;;  %v8825_v36 = vld [vmem:[#allocation117_spill] sm:$0xff]  ;;  %v8827_v38 = vld [vmem:[#allocation22_spill] sm:$0xff] }
 0x293   :  { %v1635_v57 = vsel %vm1634_vm12, %v1627_v47, %v1564_v34  ;;  %v1907_v31 = vsel %vm1843_vm15, 1, %v8657_v40  ;;  %vm2256_vm10 = vcmp.gt.s32.totalorder %v2249_v45, %v2186_v61  ;;  %v460_v28 = vadd.f32 %v7051_v8, %v459_v18  ;;  %v8830_v18 = vld [vmem:[#allocation118_spill] sm:$0xff] }
 0x294   :  { %vm1642_vm6 = vcmp.gt.s32.totalorder %v1635_v57, %v8821_v0  ;;  %vm1977_vm9 = vcmp.gt.s32.totalorder %v1970_v15, %v1907_v31  ;;  %v2257_v62 = vsel %vm2256_vm10, %v2249_v45, %v2186_v61  ;;  %vm2465_vm13 = vcmp.eq.f32.partialorder %v2401_v63, inf }
 0x295   :  { %v1643_v22 = vsel %vm1642_vm6, %v1635_v57, %v8821_v0  ;;  %v1978_v26 = vsel %vm1977_vm9, %v1970_v15, %v1907_v31  ;;  %vm2264_vm1 = vcmp.gt.s32.totalorder %v2257_v62, %v8824_v19  ;;  %v2529_v35 = vsel %vm2465_vm13, 1, %v8657_v40  ;;  %638 = vst [vmem:[#allocation7 + $0xf0] sm:$0xff] %v460_v28  ;;  %v8826_v15 = vld [vmem:[#allocation116_spill] sm:$0xff] }
 0x296   :  { %vm1650_vm11 = vcmp.gt.s32.totalorder %v1643_v22, %v8822_v46  ;;  %vm1985_vm14 = vcmp.gt.s32.totalorder %v1978_v26, %v8823_v48  ;;  %v2265_v53 = vsel %vm2264_vm1, %v2257_v62, %v8824_v19  ;;  %vm2599_vm8 = vcmp.gt.s32.totalorder %v2592_v44, %v2529_v35 }
 0x297   :  { %v1986_v16 = vsel %vm1985_vm14, %v1978_v26, %v8823_v48  ;;  %v574_v47 = vmax.f32 %v460_v28, 0.0  ;;  %vm2272_vm12 = vcmp.gt.s32.totalorder %v2265_v53, %v8826_v15  ;;  %v2600_v45 = vsel %vm2599_vm8, %v2592_v44, %v2529_v35  ;;  %v8831_v48 = vld [vmem:[#allocation30_spill] sm:$0xff]  ;;  %v496_v35 = vpop.f32.mrf.mxu2 }
 0x298   :  { %vm1993_vm2 = vcmp.gt.s32.totalorder %v1986_v16, %v8825_v36  ;;  %vm1516_vm15 = vcmp.ne.f32.partialorder %v460_v28, %v460_v28  ;;  %vm2607_vm5 = vcmp.gt.s32.totalorder %v2600_v45, %v8827_v38  ;;  %v1651_v57 = vsel %vm1650_vm11, %v1643_v22, %v8822_v46  ;;  %v8840_v44 = vld [vmem:[#allocation18_spill] sm:$0xff] }
 0x299   :  { %702 = vst [vmem:[#allocation8 + $0xf0] sm:$0xff] %v574_v47  ;;  %v1580_v34 = vsel %vm1516_vm15, 1, %v8657_v40  ;;  %v1795_v31 = vand.u32 2147483647, %v460_v28  ;;  %v2608_v61 = vsel %vm2607_vm5, %v2600_v45, %v8827_v38  ;;  %vm1658_vm6 = vcmp.gt.s32.totalorder %v1651_v57, %v6571_v27  ;;  %v8833_v38 = vld [vmem:[#allocation67_spill] sm:$0xff] }
 0x29a   :  { %v1994_v63 = vsel %vm1993_vm2, %v1986_v16, %v8825_v36  ;;  %vm2138_vm9 = vcmp.ne.f32.partialorder %v574_v47, %v574_v47  ;;  %vm7121_vm10 = vcmp.eq.f32.partialorder %v2430_v12, inf  ;;  %vm2615_vm13 = vcmp.gt.s32.totalorder %v2608_v61, %v8830_v18 }
 0x29b   :  { %v1659_v0 = vsel %vm1658_vm6, %v1651_v57, %v6571_v27  ;;  %vm1859_vm14 = vcmp.eq.f32.partialorder %v1795_v31, inf  ;;  %vm2001_vm1 = vcmp.gt.s32.totalorder %v1994_v63, %v6662_v6  ;;  %v2202_v26 = vsel %vm2138_vm9, 1, %v8657_v40 }
 0x29c   :  { %vm1666_vm11 = vcmp.gt.s32.totalorder %v1659_v0, %v1580_v34  ;;  %v1923_v28 = vsel %vm1859_vm14, 1, %v8657_v40  ;;  %v2002_v22 = vsel %vm2001_vm1, %v1994_v63, %v6662_v6  ;;  %v2273_v12 = vsel %vm2272_vm12, %v2265_v53, %v8826_v15  ;;  %v8832_v6 = vld [vmem:[#allocation63_spill] sm:$0xff] }
 0x29d   :  { %v1667_v62 = vsel %vm1666_vm11, %v1659_v0, %v1580_v34  ;;  %vm2009_vm8 = vcmp.gt.s32.totalorder %v2002_v22, %v1923_v28  ;;  %v2417_v46 = vand.u32 2147483647, %v574_v47  ;;  %vm2280_vm15 = vcmp.gt.s32.totalorder %v2273_v12, %v6668_v56 }
 0x29e   :  { %vm1674_vm2 = vcmp.gt.s32.totalorder %v1667_v62, %v8831_v48  ;;  %v2010_v27 = vsel %vm2009_vm8, %v2002_v22, %v1923_v28  ;;  %v2616_v19 = vsel %vm2615_vm13, %v2608_v61, %v8830_v18  ;;  %v2281_v36 = vsel %vm2280_vm15, %v2273_v12, %v6668_v56 }
 0x29f   :  { %v7138_v16 = vsel %vm1674_vm2, %v1667_v62, %v8831_v48  ;;  %vm2017_vm5 = vcmp.gt.s32.totalorder %v2010_v27, %v8832_v6  ;;  %vm2481_vm6 = vcmp.eq.f32.partialorder %v2417_v46, inf  ;;  %vm2288_vm9 = vcmp.gt.s32.totalorder %v2281_v36, %v2202_v26  ;;  %v421_v46 = vpop.f32.mrf.mxu0 }
 0x2a0   :  { %vm1682_vm12 = vcmp.gt.s32.totalorder %v7138_v16, %v6260_v24  ;;  %v7145_v53 = vsel %vm2017_vm5, %v2010_v27, %v8832_v6  ;;  %v2545_v47 = vsel %vm2481_vm6, 1, %v8657_v40  ;;  %v2289_v15 = vsel %vm2288_vm9, %v2281_v36, %v2202_v26  ;;  %v461_v6 = vpop.f32.mrf.mxu1  ;;  %v8844_v36 = vld [vmem:[#allocation48_spill] sm:$0xff] }
 0x2a1   :  { %vm2025_vm13 = vcmp.gt.s32.totalorder %v7145_v53, %v6278_v30  ;;  %vm2623_vm14 = vcmp.gt.s32.totalorder %v2616_v19, %v6682_v2  ;;  %v497_v45 = vadd.f32 %v7051_v8, %v496_v35  ;;  %vm2296_vm1 = vcmp.gt.s32.totalorder %v2289_v15, %v8833_v38 }
 0x2a2   :  { %v2624_v56 = vsel %vm2623_vm14, %v2616_v19, %v6682_v2  ;;  %v1681_v34 = vsel %vm1680_vm4, %v6957_v10, %v8807_v25  ;;  %vm8834_vm11 = vcmp.gt.s32.totalorder %v6967_v17, %v8809_v50  ;;  %v7165_v31 = vsel %vm2296_vm1, %v2289_v15, %v8833_v38  ;;  %v8835_v2 = vld [vmem:[#allocation138_spill] sm:$0xff]  ;;  %v8836_v10 = vld [vmem:[#allocation75_spill] sm:$0xff] }
 0x2a3   :  { %v2024_v57 = vsel %vm8834_vm11, %v6967_v17, %v8809_v50  ;;  %vm2631_vm8 = vcmp.gt.s32.totalorder %v2624_v56, %v2545_v47  ;;  %v589_v61 = vmax.f32 %v497_v45, 0.0  ;;  %653 = vst [vmem:[#allocation7 + $0x168] sm:$0xff] %v497_v45  ;;  %vm1531_vm2 = vcmp.ne.f32.partialorder %v497_v45, %v497_v45  ;;  %v8848_v38 = vld [vmem:[#allocation39_spill] sm:$0xff] }
 0x2a4   :  { %vm2304_vm15 = vcmp.gt.s32.totalorder %v7165_v31, %v8835_v2  ;;  %v2632_v63 = vsel %vm2631_vm8, %v2624_v56, %v2545_v47  ;;  %v1595_v18 = vsel %vm1531_vm2, 1, %v8657_v40  ;;  %vm1688_vm4 = vcmp.gt.s32.totalorder %v1681_v34, %v6674_v20  ;;  %v8845_v47 = vld [vmem:[#allocation33_spill] sm:$0xff] }
 0x2a5   :  { %vm2639_vm5 = vcmp.gt.s32.totalorder %v2632_v63, %v8836_v10  ;;  %717 = vst [vmem:[#allocation8 + $0x168] sm:$0xff] %v589_v61  ;;  %v1689_v25 = vsel %vm1688_vm4, %v1681_v34, %v6674_v20  ;;  %v1810_v17 = vand.u32 2147483647, %v497_v45  ;;  %vm2031_vm6 = vcmp.gt.s32.totalorder %v2024_v57, %v6692_v39  ;;  %v8839_v20 = vld [vmem:[#allocation140_spill] sm:$0xff]  ;;  %v8847_v45 = vld [vmem:[#allocation51_spill] sm:$0xff] }
 0x2a6   :  { %v7177_v50 = vsel %vm7121_vm10, 1, %v8657_v40  ;;  %v7180_v0 = vsel %vm2639_vm5, %v2632_v63, %v8836_v10  ;;  %vm1696_vm9 = vcmp.gt.s32.totalorder %v1689_v25, %v1595_v18  ;;  %v2032_v28 = vsel %vm2031_vm6, %v2024_v57, %v6692_v39  ;;  %v8850_v34 = vld [vmem:[#allocation100_spill] sm:$0xff]  ;;  %v8854_v10 = vld [vmem:[#allocation99_spill] sm:$0xff] }
 0x2a7   :  { %vm7185_vm14 = vcmp.eq.f32.partialorder %v1823_v1, inf  ;;  %vm2647_vm1 = vcmp.gt.s32.totalorder %v7180_v0, %v8839_v20  ;;  %v1697_v26 = vsel %vm1696_vm9, %v1689_v25, %v1595_v18  ;;  %vm1874_vm11 = vcmp.eq.f32.partialorder %v1810_v17, inf  ;;  %v8851_v57 = vld [vmem:[#allocation104_spill] sm:$0xff]  ;;  %v8853_v18 = vld [vmem:[#allocation110_spill] sm:$0xff] }
 0x2a8   :  { %vm1704_vm10 = vcmp.gt.s32.totalorder %v1697_v26, %v8840_v44  ;;  %v1938_v62 = vsel %vm1874_vm11, 1, %v8657_v40  ;;  %vm8841_vm8 = vcmp.gt.s32.totalorder %v6979_v5, %v8811_v33  ;;  %v2432_v58 = vand.u32 2147483647, %v589_v61 }
 0x2a9   :  { %v2303_v39 = vsel %vm8841_vm8, %v6979_v5, %v8811_v33  ;;  %v7199_v1 = vsel %vm1704_vm10, %v1697_v26, %v8840_v44  ;;  %vm2039_vm2 = vcmp.gt.s32.totalorder %v2032_v28, %v1938_v62  ;;  %v2646_v12 = vsel %vm2645_vm7, %v7005_v13, %v8816_v54  ;;  %v8842_v5 = vld [vmem:[#allocation31_spill] sm:$0xff]  ;;  %v8843_v33 = vld [vmem:[#allocation76_spill] sm:$0xff]  ;;  %v534_v54 = vpop.f32.mrf.mxu3 }
 0x2aa   :  { %vm2310_vm4 = vcmp.gt.s32.totalorder %v2303_v39, %v6698_v11  ;;  %v7207_v48 = vsel %vm2039_vm2, %v2032_v28, %v1938_v62  ;;  %vm2496_vm5 = vcmp.eq.f32.partialorder %v2432_v58, inf  ;;  %vm2653_vm6 = vcmp.gt.s32.totalorder %v2646_v12, %v8842_v5 }
 0x2ab   :  { %v7210_v27 = vsel %vm2310_vm4, %v2303_v39, %v6698_v11  ;;  %vm1545_vm9 = vcmp.ne.f32.partialorder %v7044_v59, %v7044_v59  ;;  %v7218_v19 = vsel %vm2496_vm5, 1, %v8657_v40  ;;  %v7221_v13 = vsel %vm2653_vm6, %v2646_v12, %v8842_v5 }
 0x2ac   :  { %vm2153_vm7 = vcmp.ne.f32.partialorder %v589_v61, %v589_v61  ;;  %v7226_v11 = vadd.f32 %v7051_v8, %v534_v54  ;;  %v422_v35 = vadd.f32 %v7051_v8, %v421_v46  ;;  %vm8846_vm8 = vcmp.gt.s32.totalorder %v8845_v47, %v8844_v36  ;;  %v8856_v61 = vld [vmem:[#allocation42_spill] sm:$0xff] }
 0x2ad   :  { %v1629_v15 = vsel %vm8846_vm8, %v8845_v47, %v8844_v36  ;;  %vm8849_vm2 = vcmp.gt.s32.totalorder %v8848_v38, %v8847_v45  ;;  %vm8852_vm4 = vcmp.gt.s32.totalorder %v8851_v57, %v8850_v34  ;;  %vm8855_vm5 = vcmp.gt.s32.totalorder %v8854_v10, %v8853_v18 }
 0x2ae   :  { %v1972_v56 = vsel %vm8849_vm2, %v8848_v38, %v8847_v45  ;;  %v2251_v63 = vsel %vm8852_vm4, %v8851_v57, %v8850_v34  ;;  %v2594_v25 = vsel %vm8855_vm5, %v8854_v10, %v8853_v18  ;;  %v7252_v17 = vsel %vm7185_vm14, 1, %v8657_v40  ;;  %668 = vst [vmem:[#allocation7 + $0x1e0] sm:$0xff] %v7226_v11  ;;  %v8857_v34 = vld [vmem:[#allocation53_spill] sm:$0xff]  ;;  %v8858_v57 = vld [vmem:[#allocation126_spill] sm:$0xff] }
 0x2af   :  { %v1824_v28 = vand.u32 2147483647, %v7044_v59  ;;  %v7256_v26 = vmax.f32 %v7226_v11, 0.0  ;;  %v559_v44 = vmax.f32 %v422_v35, 0.0  ;;  %v7263_v62 = vsel %vm1545_vm9, 1, %v8657_v40  ;;  %623 = vst [vmem:[#allocation7 + $0x78] sm:$0xff] %v422_v35 }
 0x2b0   :  { %vm1501_vm6 = vcmp.ne.f32.partialorder %v422_v35, %v422_v35  ;;  %v1780_v39 = vand.u32 2147483647, %v422_v35  ;;  %v462_v22 = vadd.f32 %v7051_v8, %v461_v6  ;;  %v7268_v58 = vsel %vm2153_vm7, 1, %v8657_v40 }
 0x2b1   :  { %732 = vst [vmem:[#allocation8 + $0x1e0] sm:$0xff] %v7256_v26  ;;  %v1565_v12 = vsel %vm1501_vm6, 1, %v8657_v40  ;;  %vm2123_vm14 = vcmp.ne.f32.partialorder %v559_v44, %v559_v44  ;;  %v2402_v46 = vand.u32 2147483647, %v559_v44 }
 0x2b2   :  { %687 = vst [vmem:[#allocation8 + $0x78] sm:$0xff] %v559_v44  ;;  %vm1636_vm8 = vcmp.gt.s32.totalorder %v1629_v15, %v1565_v12  ;;  %vm1844_vm2 = vcmp.eq.f32.partialorder %v1780_v39, inf  ;;  %v2187_v5 = vsel %vm2123_vm14, 1, %v8657_v40  ;;  %v575_v54 = vmax.f32 %v462_v22, 0.0  ;;  %v8860_v39 = vld [vmem:[#allocation128_spill] sm:$0xff] }
 0x2b3   :  { %v1637_v36 = vsel %vm1636_vm8, %v1629_v15, %v1565_v12  ;;  %v1908_v35 = vsel %vm1844_vm2, 1, %v8657_v40  ;;  %vm2258_vm9 = vcmp.gt.s32.totalorder %v2251_v63, %v2187_v5  ;;  %vm2466_vm4 = vcmp.eq.f32.partialorder %v2402_v46, inf  ;;  %639 = vst [vmem:[#allocation7 + $0xf8] sm:$0xff] %v462_v22  ;;  %v8859_v15 = vld [vmem:[#allocation46_spill] sm:$0xff]  ;;  %v8862_v12 = vld [vmem:[#allocation127_spill] sm:$0xff] }
 0x2b4   :  { %vm1644_vm7 = vcmp.gt.s32.totalorder %v1637_v36, %v8856_v61  ;;  %vm1979_vm5 = vcmp.gt.s32.totalorder %v1972_v56, %v1908_v35  ;;  %v2259_v6 = vsel %vm2258_vm9, %v2251_v63, %v2187_v5  ;;  %v2530_v47 = vsel %vm2466_vm4, 1, %v8657_v40  ;;  %703 = vst [vmem:[#allocation8 + $0xf8] sm:$0xff] %v575_v54  ;;  %v8861_v63 = vld [vmem:[#allocation54_spill] sm:$0xff] }
 0x2b5   :  { %v1645_v45 = vsel %vm1644_vm7, %v1637_v36, %v8856_v61  ;;  %v1980_v38 = vsel %vm1979_vm5, %v1972_v56, %v1908_v35  ;;  %vm2266_vm6 = vcmp.gt.s32.totalorder %v2259_v6, %v8857_v34  ;;  %vm2601_vm14 = vcmp.gt.s32.totalorder %v2594_v25, %v2530_v47  ;;  %v8863_v36 = vld [vmem:[#allocation137_spill] sm:$0xff]  ;;  %v8864_v35 = vld [vmem:[#allocation64_spill] sm:$0xff] }
 0x2b6   :  { %vm1652_vm8 = vcmp.gt.s32.totalorder %v1645_v45, %v8858_v57  ;;  %vm1987_vm2 = vcmp.gt.s32.totalorder %v1980_v38, %v8859_v15  ;;  %v2267_v18 = vsel %vm2266_vm6, %v2259_v6, %v8857_v34  ;;  %v2602_v10 = vsel %vm2601_vm14, %v2594_v25, %v2530_v47 }
 0x2b7   :  { %v1988_v44 = vsel %vm1987_vm2, %v1980_v38, %v8859_v15  ;;  %vm2274_vm9 = vcmp.gt.s32.totalorder %v2267_v18, %v8860_v39  ;;  %vm2609_vm4 = vcmp.gt.s32.totalorder %v2602_v10, %v8861_v63  ;;  %vm1517_vm10 = vcmp.ne.f32.partialorder %v462_v22, %v462_v22  ;;  %v8865_v15 = vld [vmem:[#allocation81_spill] sm:$0xff] }
 0x2b8   :  { %vm1995_vm7 = vcmp.gt.s32.totalorder %v1988_v44, %v8862_v12  ;;  %v2610_v56 = vsel %vm2609_vm4, %v2602_v10, %v8861_v63  ;;  %v1581_v46 = vsel %vm1517_vm10, 1, %v8657_v40  ;;  %v1653_v5 = vsel %vm1652_vm8, %v1645_v45, %v8858_v57  ;;  %v536_v63 = vpop.f32.mrf.mxu3 }
 0x2b9   :  { %vm2617_vm5 = vcmp.gt.s32.totalorder %v2610_v56, %v8863_v36  ;;  %vm1660_vm6 = vcmp.gt.s32.totalorder %v1653_v5, %v8864_v35  ;;  %v1796_v25 = vand.u32 2147483647, %v462_v22  ;;  %v1996_v61 = vsel %vm1995_vm7, %v1988_v44, %v8862_v12  ;;  %v499_v44 = vpop.f32.mrf.mxu2  ;;  %v8866_v12 = vld [vmem:[#allocation143_spill] sm:$0xff] }
 0x2ba   :  { %v1661_v6 = vsel %vm1660_vm6, %v1653_v5, %v8864_v35  ;;  %vm2003_vm14 = vcmp.gt.s32.totalorder %v1996_v61, %v6848_v29  ;;  %vm2139_vm2 = vcmp.ne.f32.partialorder %v575_v54, %v575_v54  ;;  %v2275_v47 = vsel %vm2274_vm9, %v2267_v18, %v8860_v39 }
 0x2bb   :  { %vm1668_vm0 = vcmp.gt.s32.totalorder %v1661_v6, %v1581_v46  ;;  %vm1860_vm4 = vcmp.eq.f32.partialorder %v1796_v25, inf  ;;  %v2004_v38 = vsel %vm2003_vm14, %v1996_v61, %v6848_v29  ;;  %v2203_v45 = vsel %vm2139_vm2, 1, %v8657_v40  ;;  %v8871_v25 = vld [vmem:[#allocation129_spill] sm:$0xff] }
 0x2bc   :  { %v1669_v34 = vsel %vm1668_vm0, %v1661_v6, %v1581_v46  ;;  %v1924_v57 = vsel %vm1860_vm4, 1, %v8657_v40  ;;  %vm2282_vm10 = vcmp.gt.s32.totalorder %v2275_v47, %v6854_v52  ;;  %v2418_v22 = vand.u32 2147483647, %v575_v54  ;;  %v8867_v54 = vld [vmem:[#allocation82_spill] sm:$0xff] }
 0x2bd   :  { %vm1676_vm8 = vcmp.gt.s32.totalorder %v1669_v34, %v8865_v15  ;;  %vm2011_vm7 = vcmp.gt.s32.totalorder %v2004_v38, %v1924_v57  ;;  %v2283_v10 = vsel %vm2282_vm10, %v2275_v47, %v6854_v52  ;;  %v2618_v18 = vsel %vm2617_vm5, %v2610_v56, %v8863_v36  ;;  %v8868_v56 = vld [vmem:[#allocation83_spill] sm:$0xff] }
 0x2be   :  { %v7304_v29 = vsel %vm1676_vm8, %v1669_v34, %v8865_v15  ;;  %v2012_v39 = vsel %vm2011_vm7, %v2004_v38, %v1924_v57  ;;  %vm2290_vm0 = vcmp.gt.s32.totalorder %v2283_v10, %v2203_v45  ;;  %vm2482_vm9 = vcmp.eq.f32.partialorder %v2418_v22, inf  ;;  %v8872_v38 = vld [vmem:[#allocation130_spill] sm:$0xff]  ;;  %v8873_v34 = vld [vmem:[#allocation59_spill] sm:$0xff]  ;;  %v8875_v15 = vld [vmem:[#allocation133_spill] sm:$0xff] }
 0x2bf   :  { %vm1684_vm6 = vcmp.gt.s32.totalorder %v7304_v29, %v8866_v12  ;;  %vm2019_vm14 = vcmp.gt.s32.totalorder %v2012_v39, %v8867_v54  ;;  %v2291_v46 = vsel %vm2290_vm0, %v2283_v10, %v2203_v45  ;;  %v2546_v52 = vsel %vm2482_vm9, 1, %v8657_v40 }
 0x2c0   :  { %v7311_v5 = vsel %vm2019_vm14, %v2012_v39, %v8867_v54  ;;  %vm2298_vm5 = vcmp.gt.s32.totalorder %v2291_v46, %v8868_v56  ;;  %vm2625_vm2 = vcmp.gt.s32.totalorder %v2618_v18, %v6865_v9  ;;  %v500_v36 = vadd.f32 %v7051_v8, %v499_v44  ;;  %v8876_v39 = vld [vmem:[#allocation89_spill] sm:$0xff] }
 0x2c1   :  { %vm7318_vm4 = vcmp.eq.f32.partialorder %v1824_v28, inf  ;;  %vm2027_vm10 = vcmp.gt.s32.totalorder %v7311_v5, %v8871_v25  ;;  %v7325_v61 = vsel %vm2298_vm5, %v2291_v46, %v8868_v56  ;;  %v2626_v6 = vsel %vm2625_vm2, %v2618_v18, %v6865_v9  ;;  %v8874_v9 = vld [vmem:[#allocation87_spill] sm:$0xff]  ;;  %v8877_v56 = vld [vmem:[#allocation90_spill] sm:$0xff] }
 0x2c2   :  { %v1683_v47 = vsel %vm1682_vm12, %v7138_v16, %v6260_v24  ;;  %vm2306_vm8 = vcmp.gt.s32.totalorder %v7325_v61, %v8872_v38  ;;  %vm2633_vm7 = vcmp.gt.s32.totalorder %v2626_v6, %v2546_v52  ;;  %v590_v59 = vmax.f32 %v500_v36, 0.0  ;;  %654 = vst [vmem:[#allocation7 + $0x170] sm:$0xff] %v500_v36 }
 0x2c3   :  { %vm1532_vm0 = vcmp.ne.f32.partialorder %v500_v36, %v500_v36  ;;  %v2634_v28 = vsel %vm2633_vm7, %v2626_v6, %v2546_v52  ;;  %vm1690_vm9 = vcmp.gt.s32.totalorder %v1683_v47, %v8873_v34  ;;  %v1811_v57 = vand.u32 2147483647, %v500_v36  ;;  %v539_v52 = vpop.f32.mrf.mxu3 }
 0x2c4   :  { %v1596_v45 = vsel %vm1532_vm0, 1, %v8657_v40  ;;  %vm2641_vm14 = vcmp.gt.s32.totalorder %v2634_v28, %v8874_v9  ;;  %718 = vst [vmem:[#allocation8 + $0x170] sm:$0xff] %v590_v59  ;;  %v1691_v22 = vsel %vm1690_vm9, %v1683_v47, %v8873_v34  ;;  %v2026_v24 = vsel %vm2025_vm13, %v7145_v53, %v6278_v30  ;;  %v501_v53 = vpop.f32.mrf.mxu2 }
 0x2c5   :  { %vm2154_vm12 = vcmp.ne.f32.partialorder %v590_v59, %v590_v59  ;;  %v2642_v16 = vsel %vm2641_vm14, %v2634_v28, %v8874_v9  ;;  %vm1698_vm5 = vcmp.gt.s32.totalorder %v1691_v22, %v1596_v45  ;;  %vm1875_vm2 = vcmp.eq.f32.partialorder %v1811_v57, inf }
 0x2c6   :  { %vm2033_vm7 = vcmp.gt.s32.totalorder %v2026_v24, %v6881_v37  ;;  %vm2649_vm0 = vcmp.gt.s32.totalorder %v2642_v16, %v8875_v15  ;;  %v1699_v10 = vsel %vm1698_vm5, %v1691_v22, %v1596_v45  ;;  %v1939_v18 = vsel %vm1875_vm2, 1, %v8657_v40 }
 0x2c7   :  { %v2034_v44 = vsel %vm2033_vm7, %v2026_v24, %v6881_v37  ;;  %vm2318_vm9 = vcmp.gt.s32.totalorder %v7210_v27, %v7268_v58  ;;  %vm1706_vm11 = vcmp.gt.s32.totalorder %v1699_v10, %v8876_v39  ;;  %v2305_v30 = vsel %vm2304_vm15, %v7165_v31, %v8835_v2 }
 0x2c8   :  { %vm2041_vm13 = vcmp.gt.s32.totalorder %v2034_v44, %v1939_v18  ;;  %v7358_v54 = vsel %vm1706_vm11, %v1699_v10, %v8876_v39  ;;  %v2218_v37 = vsel %vm2154_vm12, 1, %v8657_v40  ;;  %vm2312_vm14 = vcmp.gt.s32.totalorder %v2305_v30, %v6871_v42 }
 0x2c9   :  { %v7360_v46 = vsel %vm2041_vm13, %v2034_v44, %v1939_v18  ;;  %v2313_v36 = vsel %vm2312_vm14, %v2305_v30, %v6871_v42  ;;  %v2648_v31 = vsel %vm2647_vm1, %v7180_v0, %v8839_v20  ;;  %v7374_v2 = vadd.f32 %v7051_v8, %v536_v63  ;;  %v8881_v18 = vld [vmem:[#allocation108_spill] sm:$0xff] }
 0x2ca   :  { %vm1546_vm15 = vcmp.ne.f32.partialorder %v7226_v11, %v7226_v11  ;;  %v2433_v6 = vand.u32 2147483647, %v590_v59  ;;  %vm2655_vm11 = vcmp.gt.s32.totalorder %v2648_v31, %v6886_v3  ;;  %v502_v47 = vadd.f32 %v7051_v8, %v501_v53  ;;  %v8882_v53 = vld [vmem:[#allocation113_spill] sm:$0xff] }
 0x2cb   :  { %v2446_v28 = vand.u32 2147483647, %v7072_v4  ;;  %vm2320_vm12 = vcmp.gt.s32.totalorder %v2313_v36, %v2218_v37  ;;  %v7382_v42 = vsel %vm2655_vm11, %v2648_v31, %v6886_v3  ;;  %v7385_v45 = vmax.f32 %v7374_v2, 0.0  ;;  %669 = vst [vmem:[#allocation7 + $0x1e8] sm:$0xff] %v7374_v2  ;;  %v541_v39 = vpop.f32.mrf.mxu3 }
 0x2cc   :  { %v7391_v0 = vsel %vm7318_vm4, 1, %v8657_v40  ;;  %v7398_v20 = vsel %vm2318_vm9, %v7210_v27, %v7268_v58  ;;  %v1825_v3 = vand.u32 2147483647, %v7226_v11  ;;  %v591_v63 = vmax.f32 %v502_v47, 0.0  ;;  %655 = vst [vmem:[#allocation7 + $0x178] sm:$0xff] %v502_v47  ;;  %v8880_v58 = vld [vmem:[#allocation71_spill] sm:$0xff] }
 0x2cd   :  { %v7402_v59 = vsel %vm1546_vm15, 1, %v8657_v40  ;;  %733 = vst [vmem:[#allocation8 + $0x1e8] sm:$0xff] %v7385_v45  ;;  %vm1533_vm1 = vcmp.ne.f32.partialorder %v502_v47, %v502_v47  ;;  %v1685_v35 = vsel %vm1684_vm6, %v7304_v29, %v8866_v12  ;;  %v1812_v34 = vand.u32 2147483647, %v502_v47  ;;  %v8910_v11 = vld [vmem:[#allocation97_spill] sm:$0xff] }
 0x2ce   :  { %v7410_v57 = vsel %vm2320_vm12, %v2313_v36, %v2218_v37  ;;  %vm7412_vm4 = vcmp.eq.f32.partialorder %v2433_v6, inf  ;;  %719 = vst [vmem:[#allocation8 + $0x178] sm:$0xff] %v591_v63  ;;  %vm1692_vm2 = vcmp.gt.s32.totalorder %v1685_v35, %v8880_v58  ;;  %v2028_v9 = vsel %vm2027_vm10, %v7311_v5, %v8871_v25 }
 0x2cf   :  { %v1597_v22 = vsel %vm1533_vm1, 1, %v8657_v40  ;;  %v1693_v29 = vsel %vm1692_vm2, %v1685_v35, %v8880_v58  ;;  %vm1876_vm6 = vcmp.eq.f32.partialorder %v1812_v34, inf  ;;  %vm2035_vm7 = vcmp.gt.s32.totalorder %v2028_v9, %v7089_v14  ;;  %v8883_v34 = vld [vmem:[#allocation32_spill] sm:$0xff] }
 0x2d0   :  { %vm1700_vm9 = vcmp.gt.s32.totalorder %v1693_v29, %v1597_v22  ;;  %v1940_v12 = vsel %vm1876_vm6, 1, %v8657_v40  ;;  %v2036_v24 = vsel %vm2035_vm7, %v2028_v9, %v7089_v14  ;;  %vm2155_vm13 = vcmp.ne.f32.partialorder %v591_v63, %v591_v63  ;;  %v8884_v9 = vld [vmem:[#allocation34_spill] sm:$0xff] }
 0x2d1   :  { %v1701_v10 = vsel %vm1700_vm9, %v1693_v29, %v1597_v22  ;;  %vm2043_vm14 = vcmp.gt.s32.totalorder %v2036_v24, %v1940_v12  ;;  %v2307_v5 = vsel %vm2306_vm8, %v7325_v61, %v8872_v38  ;;  %v2434_v25 = vand.u32 2147483647, %v591_v63  ;;  %v8885_v22 = vld [vmem:[#allocation123_spill] sm:$0xff] }
 0x2d2   :  { %vm1708_vm10 = vcmp.gt.s32.totalorder %v1701_v10, %v8881_v18  ;;  %v7433_v44 = vsel %vm2043_vm14, %v2036_v24, %v1940_v12  ;;  %vm2314_vm15 = vcmp.gt.s32.totalorder %v2307_v5, %v7068_v21  ;;  %v2650_v14 = vsel %vm2649_vm0, %v2642_v16, %v8875_v15  ;;  %v8886_v29 = vld [vmem:[#allocation139_spill] sm:$0xff] }
 0x2d3   :  { %vm1547_vm11 = vcmp.ne.f32.partialorder %v7374_v2, %v7374_v2  ;;  %v1709_v30 = vsel %vm1708_vm10, %v1701_v10, %v8881_v18  ;;  %v2315_v61 = vsel %vm2314_vm15, %v2307_v5, %v7068_v21  ;;  %v2219_v38 = vsel %vm2155_vm13, 1, %v8657_v40  ;;  %v8887_v5 = vld [vmem:[#allocation131_spill] sm:$0xff]  ;;  %v8888_v18 = vld [vmem:[#allocation41_spill] sm:$0xff] }
 0x2d4   :  { %vm2498_vm12 = vcmp.eq.f32.partialorder %v2434_v25, inf  ;;  %vm2657_vm1 = vcmp.gt.s32.totalorder %v2650_v14, %v7177_v50  ;;  %v7448_v37 = vadd.f32 %v7051_v8, %v539_v52  ;;  %v7453_v16 = vsel %vm7412_vm4, 1, %v8657_v40  ;;  %v7469_v52 = vpop.xlane.xlu0 %1058 }
 0x2d5   :  { %vm2322_vm0 = vcmp.gt.s32.totalorder %v2315_v61, %v2219_v38  ;;  %v7456_v15 = vsel %vm2657_vm1, %v2650_v14, %v7177_v50  ;;  %v7459_v36 = vadd.f32 %v7051_v8, %v541_v39  ;;  %v1611_v21 = vsel %vm1547_vm11, 1, %v8657_v40  ;;  %v8889_v14 = vld [vmem:[#allocation55_spill] sm:$0xff]  ;;  %v8890_v39 = vld [vmem:[#allocation66_spill] sm:$0xff] }
 0x2d6   :  { %v1826_v31 = vand.u32 2147483647, %v7374_v2  ;;  %v7464_v6 = vmax.f32 %v7448_v37, 0.0  ;;  %670 = vst [vmem:[#allocation7 + $0x1f0] sm:$0xff] %v7448_v37  ;;  %vm1548_vm4 = vcmp.ne.f32.partialorder %v7448_v37, %v7448_v37  ;;  %v7472_v50 = vsel %vm2498_vm12, 1, %v8657_v40 }
 0x2d7   :  { %v1827_v8 = vand.u32 2147483647, %v7448_v37  ;;  %v7476_v47 = vmax.f32 %v7459_v36, 0.0  ;;  %671 = vst [vmem:[#allocation7 + $0x1f8] sm:$0xff] %v7459_v36  ;;  %vm1549_vm2 = vcmp.ne.f32.partialorder %v7459_v36, %v7459_v36  ;;  %v7481_v2 = vsel %vm2322_vm0, %v2315_v61, %v2219_v38 }
 0x2d8   :  { %734 = vst [vmem:[#allocation8 + $0x1f0] sm:$0xff] %v7464_v6  ;;  %v1612_v63 = vsel %vm1548_vm4, 1, %v8657_v40  ;;  %v1828_v35 = vand.u32 2147483647, %v7459_v36  ;;  %v1054_v27 = vand.u32 65535, %v8883_v34  ;;  %v1613_v58 = vsel %vm1549_vm2, 1, %v8657_v40 }
 0x2d9   :  { %735 = vst [vmem:[#allocation8 + $0x1f8] sm:$0xff] %v7476_v47  ;;  %vm1060_vm6 = vcmp.eq.f32.partialorder %v8884_v9, %v7469_v52  ;;  %vm1710_vm7 = vcmp.gt.s32.totalorder %v7022_v43, %v8885_v22  ;;  %vm1712_vm9 = vcmp.gt.s32.totalorder %v7199_v1, %v8886_v29  ;;  %vm1714_vm13 = vcmp.gt.s32.totalorder %v7358_v54, %v8887_v5  ;;  %2754 = dma.vmem_to_hbm [thread:$0]  %s2747_s21, 8192, %s2749_s17, [#allocation4], %s3245_s18, %s3245_s18, %s3246_s19  }
 0x2da   :  { %v1056_v12 = vcvt.s32.f32 %v1054_v27  ;;  %v1711_v24 = vsel %vm1710_vm7, %v7022_v43, %v8885_v22  ;;  %v1713_v10 = vsel %vm1712_vm9, %v7199_v1, %v8886_v29  ;;  %v1715_v25 = vsel %vm1714_vm13, %v7358_v54, %v8887_v5  ;;  %v3110_v29 = vld [vmem:[#allocation8 + $0x1c8] sm:$0xff]  ;;  %2767 = dma.vmem_to_hbm [thread:$0]  %s2760_s14, 8192, %s2762_s12, [#allocation9], %s3245_s18, %s3245_s18, %s3246_s19  }
 0x2db   :  { %vm1716_vm14 = vcmp.gt.s32.totalorder %v1709_v30, %v8888_v18  ;;  %vm1718_vm10 = vcmp.gt.s32.totalorder %v1711_v24, %v8889_v14  ;;  %vm1720_vm15 = vcmp.gt.s32.totalorder %v1713_v10, %v8890_v39  ;;  %vm1722_vm11 = vcmp.gt.s32.totalorder %v1715_v25, %v7084_v32 }
 0x2dc   :  { %v1061_v61 = vsel %vm1060_vm6, %v1056_v12, -inf  ;;  %v1717_v38 = vsel %vm1716_vm14, %v1709_v30, %v8888_v18  ;;  %v1719_v43 = vsel %vm1718_vm10, %v1711_v24, %v8889_v14  ;;  %v1721_v37 = vsel %vm1720_vm15, %v1713_v10, %v8890_v39  ;;  %v3109_v30 = vld [vmem:[#allocation8 + $0x1c0] sm:$0xff]  ;;  %v8899_v18 = vld [vmem:[#allocation29_spill] sm:$0xff] }
 0x2dd   :  { %1062 = vmax.xlane.f32.xlu0 %v1061_v61  ;;  %vm1724_vm12 = vcmp.gt.s32.totalorder %v1717_v38, %v7263_v62  ;;  %vm1726_vm1 = vcmp.gt.s32.totalorder %v1719_v43, %v7402_v59  ;;  %vm1728_vm0 = vcmp.gt.s32.totalorder %v1721_v37, %v1611_v21  ;;  %v1723_v1 = vsel %vm1722_vm11, %v1715_v25, %v7084_v32  ;;  %v8900_v14 = vld [vmem:[#allocation17_spill] sm:$0xff]  ;;  %v8901_v39 = vld [vmem:[#allocation91_spill] sm:$0xff] }
 0x2de   :  { %v1725_v54 = vsel %vm1724_vm12, %v1717_v38, %v7263_v62  ;;  %v1727_v36 = vsel %vm1726_vm1, %v1719_v43, %v7402_v59  ;;  %v1729_v34 = vsel %vm1728_vm0, %v1721_v37, %v1611_v21  ;;  %vm1730_vm4 = vcmp.gt.s32.totalorder %v1723_v1, %v1612_v63  ;;  %v8902_v61 = vld [vmem:[#allocation111_spill] sm:$0xff] }
 0x2df   :  { %vm1732_vm2 = vcmp.gt.s32.totalorder %v1725_v54, %v1613_v58  ;;  %vm1734_vm6 = vcmp.gt.s32.totalorder %v1727_v36, %v1729_v34  ;;  %vm2164_vm7 = vcmp.ne.f32.partialorder %v3109_v30, %v3109_v30  ;;  %v1731_v27 = vsel %vm1730_vm4, %v1723_v1, %v1612_v63  ;;  %v8903_v1 = vld [vmem:[#allocation125_spill] sm:$0xff] }
 0x2e0   :  { %v1733_v9 = vsel %vm1732_vm2, %v1725_v54, %v1613_v58  ;;  %v1735_v22 = vsel %vm1734_vm6, %v1727_v36, %v1729_v34  ;;  %vm2165_vm9 = vcmp.ne.f32.partialorder %v3110_v29, %v3110_v29  ;;  %vm2166_vm14 = vcmp.ne.f32.partialorder %v6841_v60, %v6841_v60  ;;  %v8904_v54 = vld [vmem:[#allocation141_spill] sm:$0xff]  ;;  %v8905_v36 = vld [vmem:[#allocation132_spill] sm:$0xff] }
 0x2e1   :  { %vm1736_vm13 = vcmp.gt.s32.totalorder %v1731_v27, %v1733_v9  ;;  %vm2167_vm10 = vcmp.ne.f32.partialorder %v7072_v4, %v7072_v4  ;;  %vm2168_vm15 = vcmp.ne.f32.partialorder %v7256_v26, %v7256_v26  ;;  %vm2169_vm11 = vcmp.ne.f32.partialorder %v7385_v45, %v7385_v45  ;;  %v8906_v34 = vld [vmem:[#allocation37_spill] sm:$0xff] }
 0x2e2   :  { %v1737_v32 = vsel %vm1736_vm13, %v1731_v27, %v1733_v9  ;;  %vm2170_vm12 = vcmp.ne.f32.partialorder %v7464_v6, %v7464_v6  ;;  %vm2171_vm1 = vcmp.ne.f32.partialorder %v7476_v47, %v7476_v47  ;;  %vm7529_vm0 = vcmp.eq.f32.partialorder %v1825_v3, inf }
 0x2e3   :  { %vm7533_vm4 = vcmp.eq.f32.partialorder %v1826_v31, inf  ;;  %vm1738_vm2 = vcmp.gt.s32.totalorder %v1735_v22, %v1737_v32  ;;  %v2228_v21 = vsel %vm2164_vm7, 1, %v8657_v40  ;;  %v2229_v63 = vsel %vm2165_vm9, 1, %v8657_v40 }
 0x2e4   :  { %v2230_v58 = vsel %vm2166_vm14, 1, %v8657_v40  ;;  %vm7541_vm6 = vcmp.eq.f32.partialorder %v1827_v8, inf  ;;  %vm7545_vm13 = vcmp.eq.f32.partialorder %v1828_v35, inf  ;;  %v7549_v3 = vsel %vm1738_vm2, %v1735_v22, %v1737_v32 }
 0x2e5   :  { %v2231_v31 = vsel %vm2167_vm10, 1, %v8657_v40  ;;  %v2232_v24 = vsel %vm2168_vm15, 1, %v8657_v40  ;;  %v2233_v10 = vsel %vm2169_vm11, 1, %v8657_v40  ;;  %v1741_v5 = vshra.s32 %v7549_v3, 16 }
 0x2e6   :  { %v2234_v25 = vsel %vm2170_vm12, 1, %v8657_v40  ;;  %v2235_v8 = vsel %vm2171_vm1, 1, %v8657_v40  ;;  %vm2324_vm7 = vcmp.gt.s32.totalorder %v7035_v49, %v8899_v18  ;;  %vm2326_vm9 = vcmp.gt.s32.totalorder %v7398_v20, %v8900_v14 }
 0x2e7   :  { %v2325_v35 = vsel %vm2324_vm7, %v7035_v49, %v8899_v18  ;;  %vm2328_vm14 = vcmp.gt.s32.totalorder %v7410_v57, %v8901_v39  ;;  %vm2330_vm10 = vcmp.gt.s32.totalorder %v7481_v2, %v8902_v61  ;;  %v7567_v38 = vcvt.s32.f32 %v1741_v5 }
 0x2e8   :  { %v2327_v43 = vsel %vm2326_vm9, %v7398_v20, %v8900_v14  ;;  %v2329_v37 = vsel %vm2328_vm14, %v7410_v57, %v8901_v39  ;;  %v2331_v49 = vsel %vm2330_vm10, %v7481_v2, %v8902_v61  ;;  %vm2332_vm15 = vcmp.gt.s32.totalorder %v2325_v35, %v8903_v1 }
 0x2e9   :  { %vm2334_vm11 = vcmp.gt.s32.totalorder %v2327_v43, %v8904_v54  ;;  %vm2336_vm12 = vcmp.gt.s32.totalorder %v2329_v37, %v8905_v36  ;;  %vm2338_vm1 = vcmp.gt.s32.totalorder %v2331_v49, %v8906_v34  ;;  %1744 = vmax.xlane.f32.xlu1 %v7567_v38  ;;  %v2333_v30 = vsel %vm2332_vm15, %v2325_v35, %v8903_v1 }
 0x2ea   :  { %v2335_v20 = vsel %vm2334_vm11, %v2327_v43, %v8904_v54  ;;  %v2337_v27 = vsel %vm2336_vm12, %v2329_v37, %v8905_v36  ;;  %v2339_v57 = vsel %vm2338_vm1, %v2331_v49, %v8906_v34  ;;  %vm2340_vm2 = vcmp.gt.s32.totalorder %v2333_v30, %v2228_v21  ;;  %v8925_v37 = vld [vmem:[#allocation144_spill] sm:$0xff] }
 0x2eb   :  { %vm2342_vm7 = vcmp.gt.s32.totalorder %v2335_v20, %v2229_v63  ;;  %vm2344_vm9 = vcmp.gt.s32.totalorder %v2337_v27, %v2230_v58  ;;  %vm2346_vm14 = vcmp.gt.s32.totalorder %v2339_v57, %v2231_v31  ;;  %v2341_v2 = vsel %vm2340_vm2, %v2333_v30, %v2228_v21  ;;  %v8929_v36 = vld [vmem:[#allocation36_spill] sm:$0xff]  ;;  %v8930_v30 = vld [vmem:[#allocation47_spill] sm:$0xff] }
 0x2ec   :  { %v2343_v9 = vsel %vm2342_vm7, %v2335_v20, %v2229_v63  ;;  %v2345_v22 = vsel %vm2344_vm9, %v2337_v27, %v2230_v58  ;;  %v2347_v29 = vsel %vm2346_vm14, %v2339_v57, %v2231_v31  ;;  %vm2348_vm10 = vcmp.gt.s32.totalorder %v2341_v2, %v2232_v24  ;;  %v8931_v20 = vld [vmem:[#allocation58_spill] sm:$0xff]  ;;  %v8932_v27 = vld [vmem:[#allocation84_spill] sm:$0xff] }
 0x2ed   :  { %vm2350_vm8 = vcmp.gt.s32.totalorder %v2343_v9, %v2233_v10  ;;  %vm2352_vm5 = vcmp.gt.s32.totalorder %v2345_v22, %v2234_v25  ;;  %vm2354_vm3 = vcmp.gt.s32.totalorder %v2347_v29, %v2235_v8  ;;  %v2349_v32 = vsel %vm2348_vm10, %v2341_v2, %v2232_v24 }
 0x2ee   :  { %v2351_v5 = vsel %vm2350_vm8, %v2343_v9, %v2233_v10  ;;  %v2353_v18 = vsel %vm2352_vm5, %v2345_v22, %v2234_v25  ;;  %v2355_v35 = vsel %vm2354_vm3, %v2347_v29, %v2235_v8  ;;  %v1953_v14 = vsel %vm7529_vm0, 1, %v8657_v40  ;;  %v8914_v8 = vld [vmem:[#allocation112_spill] sm:$0xff] }
 0x2ef   :  { %vm2356_vm15 = vcmp.gt.s32.totalorder %v2349_v32, %v2351_v5  ;;  %vm2358_vm11 = vcmp.gt.s32.totalorder %v2353_v18, %v2355_v35  ;;  %v1954_v21 = vsel %vm7533_vm4, 1, %v8657_v40  ;;  %v1955_v31 = vsel %vm7541_vm6, 1, %v8657_v40 }
 0x2f0   :  { %v2357_v63 = vsel %vm2356_vm15, %v2349_v32, %v2351_v5  ;;  %v2359_v58 = vsel %vm2358_vm11, %v2353_v18, %v2355_v35  ;;  %v1956_v24 = vsel %vm7545_vm13, 1, %v8657_v40  ;;  %vm8907_vm5 = vcmp.gt.s32.totalorder %v7024_v51, %v8818_v55 }
 0x2f1   :  { %vm2360_vm3 = vcmp.gt.s32.totalorder %v2357_v63, %v2359_v58  ;;  %v2046_v62 = vsel %vm8907_vm5, %v7024_v51, %v8818_v55  ;;  %vm8908_vm8 = vcmp.gt.s32.totalorder %v7207_v48, %v8843_v33  ;;  %vm8909_vm0 = vcmp.gt.s32.totalorder %v7360_v46, %v8877_v56 }
 0x2f2   :  { %v2048_v59 = vsel %vm8908_vm8, %v7207_v48, %v8843_v33  ;;  %v2050_v12 = vsel %vm8909_vm0, %v7360_v46, %v8877_v56  ;;  %v8911_v10 = vand.u32 2147483647, %v8910_v11  ;;  %v8915_v51 = vand.u32 2147483647, %v8914_v8  ;;  %v8919_v33 = vld [vmem:[#allocation124_spill] sm:$0xff]  ;;  %v8920_v46 = vld [vmem:[#allocation142_spill] sm:$0xff] }
 0x2f3   :  { %v7623_v39 = vsel %vm2360_vm3, %v2357_v63, %v2359_v58  ;;  %vm8918_vm13 = vcmp.gt.s32.totalorder %v7433_v44, %v8882_v53  ;;  %vm2053_vm12 = vcmp.gt.s32.totalorder %v2046_v62, %v8919_v33  ;;  %vm2055_vm1 = vcmp.gt.s32.totalorder %v2048_v59, %v8920_v46  ;;  %v8921_v56 = vld [vmem:[#allocation136_spill] sm:$0xff] }
 0x2f4   :  { %vm7613_vm4 = vcmp.eq.f32.partialorder %v8911_v10, inf  ;;  %vm7619_vm6 = vcmp.eq.f32.partialorder %v8915_v51, inf  ;;  %v2052_v48 = vsel %vm8918_vm13, %v7433_v44, %v8882_v53  ;;  %v8922_v61 = vand.u32 2147483647, %v8921_v56 }
 0x2f5   :  { %v8926_v49 = vand.u32 2147483647, %v8925_v37  ;;  %v2363_v54 = vshra.s32 %v7623_v39, 16  ;;  %v2054_v44 = vsel %vm2053_vm12, %v2046_v62, %v8919_v33  ;;  %v2056_v53 = vsel %vm2055_vm1, %v2048_v59, %v8920_v46  ;;  %v8939_v46 = vld [vmem:[#allocation92_spill] sm:$0xff] }
 0x2f6   :  { %vm7634_vm2 = vcmp.eq.f32.partialorder %v8922_v61, inf  ;;  %vm2057_vm9 = vcmp.gt.s32.totalorder %v2050_v12, %v8929_v36  ;;  %vm2059_vm14 = vcmp.gt.s32.totalorder %v2052_v48, %v8930_v30  ;;  %vm2061_vm10 = vcmp.gt.s32.totalorder %v2054_v44, %v8931_v20 }
 0x2f7   :  { %vm7640_vm7 = vcmp.eq.f32.partialorder %v8926_v49, inf  ;;  %v2058_v34 = vsel %vm2057_vm9, %v2050_v12, %v8929_v36  ;;  %vm2063_vm15 = vcmp.gt.s32.totalorder %v2056_v53, %v8932_v27  ;;  %v7652_v57 = vcvt.s32.f32 %v2363_v54 }
 0x2f8   :  { %v2060_v2 = vsel %vm2059_vm14, %v2052_v48, %v8930_v30  ;;  %v2062_v9 = vsel %vm2061_vm10, %v2054_v44, %v8931_v20  ;;  %v2064_v22 = vsel %vm2063_vm15, %v2056_v53, %v8932_v27  ;;  %vm2663_vm11 = vcmp.gt.s32.totalorder %v7382_v42, %v7453_v16  ;;  %v1466_v44 = vpop.xlane.xlu0 %1465  ;;  %v8941_v20 = vld [vmem:[#allocation134_spill] sm:$0xff] }
 0x2f9   :  { %vm2665_vm3 = vcmp.gt.s32.totalorder %v7456_v15, %v7472_v50  ;;  %vm2065_vm5 = vcmp.gt.s32.totalorder %v2058_v34, %v7252_v17  ;;  %vm2067_vm8 = vcmp.gt.s32.totalorder %v2060_v2, %v7391_v0  ;;  %vm2069_vm0 = vcmp.gt.s32.totalorder %v2062_v9, %v1953_v14  ;;  %2366 = vmax.xlane.f32.xlu2 %v7652_v57 }
 0x2fa   :  { %vm2071_vm13 = vcmp.gt.s32.totalorder %v2064_v22, %v1954_v21  ;;  %v2066_v29 = vsel %vm2065_vm5, %v2058_v34, %v7252_v17  ;;  %v2068_v32 = vsel %vm2067_vm8, %v2060_v2, %v7391_v0  ;;  %v2070_v5 = vsel %vm2069_vm0, %v2062_v9, %v1953_v14  ;;  %v8933_v17 = vld [vmem:[#allocation15_spill] sm:$0xff]  ;;  %v8934_v14 = vld [vmem:[#allocation60_spill] sm:$0xff] }
 0x2fb   :  { %v2072_v18 = vsel %vm2071_vm13, %v2064_v22, %v1954_v21  ;;  %vm2073_vm12 = vcmp.gt.s32.totalorder %v2066_v29, %v1955_v31  ;;  %vm2075_vm1 = vcmp.gt.s32.totalorder %v2068_v32, %v1956_v24  ;;  %v2447_v35 = vand.u32 2147483647, %v7256_v26  ;;  %v8942_v22 = vld [vmem:[#allocation135_spill] sm:$0xff] }
 0x2fc   :  { %vm2077_vm9 = vcmp.gt.s32.totalorder %v2070_v5, %v2072_v18  ;;  %v2074_v63 = vsel %vm2073_vm12, %v2066_v29, %v1955_v31  ;;  %v2076_v58 = vsel %vm2075_vm1, %v2068_v32, %v1956_v24  ;;  %v2448_v59 = vand.u32 2147483647, %v7385_v45 }
 0x2fd   :  { %v2078_v62 = vsel %vm2077_vm9, %v2070_v5, %v2072_v18  ;;  %vm2079_vm14 = vcmp.gt.s32.totalorder %v2074_v63, %v2076_v58  ;;  %v2449_v12 = vand.u32 2147483647, %v7464_v6  ;;  %v2450_v11 = vand.u32 2147483647, %v7476_v47 }
 0x2fe   :  { %vm2507_vm10 = vcmp.eq.f32.partialorder %v8933_v17, inf  ;;  %v2080_v0 = vsel %vm2079_vm14, %v2074_v63, %v2076_v58  ;;  %vm2508_vm15 = vcmp.eq.f32.partialorder %v8934_v14, inf  ;;  %vm2509_vm5 = vcmp.eq.f32.partialorder %v2445_v23, inf }
 0x2ff   :  { %vm2510_vm8 = vcmp.eq.f32.partialorder %v2446_v28, inf  ;;  %vm2081_vm0 = vcmp.gt.s32.totalorder %v2078_v62, %v2080_v0  ;;  %vm2511_vm13 = vcmp.eq.f32.partialorder %v2447_v35, inf  ;;  %vm2512_vm12 = vcmp.eq.f32.partialorder %v2448_v59, inf }
 0x300   :  { %vm2513_vm1 = vcmp.eq.f32.partialorder %v2449_v12, inf  ;;  %v7676_v26 = vsel %vm2081_vm0, %v2078_v62, %v2080_v0  ;;  %vm2514_vm9 = vcmp.eq.f32.partialorder %v2450_v11, inf  ;;  %v2567_v45 = vsel %vm7613_vm4, 1, %v8657_v40 }
 0x301   :  { %v2568_v6 = vsel %vm7619_vm6, 1, %v8657_v40  ;;  %v2084_v60 = vshra.s32 %v7676_v26, 16  ;;  %v2569_v4 = vsel %vm7634_vm2, 1, %v8657_v40  ;;  %v2570_v23 = vsel %vm7640_vm7, 1, %v8657_v40 }
 0x302   :  { %v2571_v28 = vsel %vm2507_vm10, 1, %v8657_v40  ;;  %v2572_v47 = vsel %vm2508_vm15, 1, %v8657_v40  ;;  %v2573_v21 = vsel %vm2509_vm5, 1, %v8657_v40  ;;  %v2574_v31 = vsel %vm2510_vm8, 1, %v8657_v40 }
 0x303   :  { %v2575_v24 = vsel %vm2511_vm13, 1, %v8657_v40  ;;  %v7698_v10 = vcvt.s32.f32 %v2084_v60  ;;  %v2576_v25 = vsel %vm2512_vm12, 1, %v8657_v40  ;;  %v2577_v8 = vsel %vm2513_vm1, 1, %v8657_v40 }
 0x304   :  { %v2578_v51 = vsel %vm2514_vm9, 1, %v8657_v40  ;;  %vm8935_vm4 = vcmp.gt.s32.totalorder %v7041_v7, %v7038_v41  ;;  %vm8936_vm6 = vcmp.gt.s32.totalorder %v7221_v13, %v7218_v19  ;;  %v2664_v33 = vsel %vm2663_vm11, %v7382_v42, %v7453_v16 }
 0x305   :  { %v2660_v55 = vsel %vm8935_vm4, %v7041_v7, %v7038_v41  ;;  %v2662_v48 = vsel %vm8936_vm6, %v7221_v13, %v7218_v19  ;;  %v2666_v40 = vsel %vm2665_vm3, %v7456_v15, %v7472_v50  ;;  %2087 = vmax.xlane.f32.xlu1 %v7698_v10  ;;  %v8937_v41 = vld [vmem:[#allocation38_spill] sm:$0xff]  ;;  %v8938_v7 = vld [vmem:[#allocation19_spill] sm:$0xff]  ;;  %vm2671_vm14 = vcmp.gt.s32.totalorder %v2664_v33, %v8939_v46 }
 0x306   :  { %vm2667_vm2 = vcmp.gt.s32.totalorder %v2660_v55, %v8937_v41  ;;  %vm2669_vm7 = vcmp.gt.s32.totalorder %v2662_v48, %v8938_v7  ;;  %v8940_v19 = vld [vmem:[#allocation114_spill] sm:$0xff]  ;;  %v2672_v16 = vsel %vm2671_vm14, %v2664_v33, %v8939_v46  ;;  %v1461_v27 = vand.u32 65535, %v8941_v20 }
 0x307   :  { %vm2673_vm10 = vcmp.gt.s32.totalorder %v2666_v40, %v8940_v19  ;;  %v2668_v13 = vsel %vm2667_vm2, %v2660_v55, %v8937_v41  ;;  %v2670_v42 = vsel %vm2669_vm7, %v2662_v48, %v8938_v7  ;;  %vm2679_vm15 = vcmp.gt.s32.totalorder %v2672_v16, %v2569_v4 }
 0x308   :  { %v2674_v56 = vsel %vm2673_vm10, %v2666_v40, %v8940_v19  ;;  %vm2675_vm11 = vcmp.gt.s32.totalorder %v2668_v13, %v2567_v45  ;;  %vm2677_vm3 = vcmp.gt.s32.totalorder %v2670_v42, %v2568_v6  ;;  %v2680_v61 = vsel %vm2679_vm15, %v2672_v16, %v2569_v4 }
 0x309   :  { %vm2681_vm5 = vcmp.gt.s32.totalorder %v2674_v56, %v2570_v23  ;;  %v2676_v15 = vsel %vm2675_vm11, %v2668_v13, %v2567_v45  ;;  %v2678_v50 = vsel %vm2677_vm3, %v2670_v42, %v2568_v6  ;;  %vm2687_vm13 = vcmp.gt.s32.totalorder %v2680_v61, %v2573_v21 }
 0x30a   :  { %v2682_v43 = vsel %vm2681_vm5, %v2674_v56, %v2570_v23  ;;  %vm2683_vm8 = vcmp.gt.s32.totalorder %v2676_v15, %v2571_v28  ;;  %vm2685_vm0 = vcmp.gt.s32.totalorder %v2678_v50, %v2572_v47  ;;  %v2688_v1 = vsel %vm2687_vm13, %v2680_v61, %v2573_v21 }
 0x30b   :  { %vm2689_vm12 = vcmp.gt.s32.totalorder %v2682_v43, %v2574_v31  ;;  %v2684_v37 = vsel %vm2683_vm8, %v2676_v15, %v2571_v28  ;;  %v2686_v49 = vsel %vm2685_vm0, %v2678_v50, %v2572_v47  ;;  %vm2695_vm4 = vcmp.gt.s32.totalorder %v2688_v1, %v2577_v8 }
 0x30c   :  { %v2690_v54 = vsel %vm2689_vm12, %v2682_v43, %v2574_v31  ;;  %vm2691_vm1 = vcmp.gt.s32.totalorder %v2684_v37, %v2575_v24  ;;  %vm2693_vm9 = vcmp.gt.s32.totalorder %v2686_v49, %v2576_v25  ;;  %v2696_v34 = vsel %vm2695_vm4, %v2688_v1, %v2577_v8 }
 0x30d   :  { %vm2697_vm6 = vcmp.gt.s32.totalorder %v2690_v54, %v2578_v51  ;;  %v2692_v53 = vsel %vm2691_vm1, %v2684_v37, %v2575_v24  ;;  %v2694_v36 = vsel %vm2693_vm9, %v2686_v49, %v2576_v25  ;;  %vm1467_vm14 = vcmp.eq.f32.partialorder %v8942_v22, %v1466_v44 }
 0x30e   :  { %v2698_v30 = vsel %vm2697_vm6, %v2690_v54, %v2578_v51  ;;  %vm2699_vm2 = vcmp.gt.s32.totalorder %v2692_v53, %v2694_v36  ;;  %v1463_v29 = vcvt.s32.f32 %v1461_v27  ;;  %v1065_v63 = vcvt.f32.s32 %v7469_v52 }
 0x30f   :  { %vm2701_vm7 = vcmp.gt.s32.totalorder %v2696_v34, %v2698_v30  ;;  %v2700_v2 = vsel %vm2699_vm2, %v2692_v53, %v2694_v36  ;;  %v1740_v17 = vand.u32 65535, %v7549_v3  ;;  %v2362_v28 = vand.u32 65535, %v7623_v39 }
 0x310   :  { %v2702_v9 = vsel %vm2701_vm7, %v2696_v34, %v2698_v30  ;;  %v1468_v18 = vsel %vm1467_vm14, %v1463_v29, -inf  ;;  %v1066_v58 = vshll.u32 %v1065_v63, 16  ;;  %v2083_v31 = vand.u32 65535, %v7676_v26 }
 0x311   :  { %vm2703_vm10 = vcmp.gt.s32.totalorder %v2700_v2, %v2702_v9  ;;  %1469 = vmax.xlane.f32.xlu1 %v1468_v18  ;;  %v1742_v6 = vcvt.s32.f32 %v1740_v17  ;;  %v2364_v21 = vcvt.s32.f32 %v2362_v28  ;;  %v1472_v8 = vcvt.f32.s32 %v1466_v44 }
 0x312   :  { %v2704_v32 = vsel %vm2703_vm10, %v2700_v2, %v2702_v9  ;;  %v2085_v25 = vcvt.s32.f32 %v2083_v31 }
 0x313   :  { %v2706_v5 = vshra.s32 %v2704_v32, 16  ;;  %v2705_v51 = vand.u32 65535, %v2704_v32  ;;  %v1473_v39 = vshll.u32 %v1472_v8, 16 }
 0x315   :  { %v2708_v35 = vcvt.s32.f32 %v2706_v5 }
 0x317   :  { %2709 = vmax.xlane.f32.xlu2 %v2708_v35 }
 0x350   :  { %v1063_v62 = vpop.xlane.xlu0 %1062 }
 0x351   :  { %v1064_v59 = vcvt.f32.s32 %v1063_v62 }
 0x353   :  { %v1067_v12 = vadd.s32 %v1066_v58, %v1064_v59 }
 0x355   :  { %v1068_v11 = vrot.slane %v1067_v12, 4 }
 0x357   :  { %vm1069_vm11 = vcmp.gt.s32.totalorder %v1067_v12, %v1068_v11 }
 0x358   :  { %v1070_v0 = vsel %vm1069_vm11, %v1067_v12, %v1068_v11 }
 0x359   :  { %v1071_v14 = vrot.slane %v1070_v0, 2 }
 0x35b   :  { %vm1072_vm3 = vcmp.gt.s32.totalorder %v1070_v0, %v1071_v14 }
 0x35c   :  { %v1745_v45 = vpop.xlane.xlu1 %1744  ;;  %v1073_v60 = vsel %vm1072_vm3, %v1070_v0, %v1071_v14 }
 0x35d   :  { %vm1746_vm15 = vcmp.eq.f32.partialorder %v7567_v38, %v1745_v45  ;;  %v1074_v4 = vrot.slane %v1073_v60, 1  ;;  %v1751_v42 = vcvt.f32.s32 %v1745_v45 }
 0x35e   :  { %v1747_v23 = vsel %vm1746_vm15, %v1742_v6, -inf }
 0x35f   :  { %1748 = vmax.xlane.f32.xlu2 %v1747_v23  ;;  %vm1075_vm5 = vcmp.gt.s32.totalorder %v1073_v60, %v1074_v4  ;;  %v1752_v15 = vshll.u32 %v1751_v42, 16 }
 0x360   :  { %v1076_v52 = vsel %vm1075_vm5, %v1073_v60, %v1074_v4 }
 0x361   :  { %3019 = vpush %v1076_v52 }
 0x36c   :  { %v2367_v47 = vpop.xlane.xlu2 %2366 }
 0x36d   :  { %vm2368_vm8 = vcmp.eq.f32.partialorder %v7652_v57, %v2367_v47  ;;  %v2707_v57 = vcvt.s32.f32 %v2705_v51  ;;  %v2373_v43 = vcvt.f32.s32 %v2367_v47 }
 0x36e   :  { %v2369_v3 = vsel %vm2368_vm8, %v2364_v21, -inf }
 0x36f   :  { %2370 = vmax.xlane.f32.xlu1 %v2369_v3  ;;  %v2374_v49 = vshll.u32 %v2373_v43, 16 }
 0x378   :  { %v7740_v24 = vpop.xlane.xlu1 %2087 }
 0x379   :  { %vm2089_vm0 = vcmp.eq.f32.partialorder %v7698_v10, %v7740_v24  ;;  %v2094_v20 = vcvt.f32.s32 %v7740_v24 }
 0x37a   :  { %v2090_v38 = vsel %vm2089_vm0, %v2085_v25, -inf }
 0x37b   :  { %2091 = vmax.xlane.f32.xlu0 %v2090_v38  ;;  %v2095_v29 = vshll.u32 %v2094_v20, 16 }
 0x384   :  { %v1470_v55 = vpop.xlane.xlu1 %1469 }
 0x385   :  { %v1471_v48 = vcvt.f32.s32 %v1470_v55 }
 0x387   :  { %v1474_v40 = vadd.s32 %v1473_v39, %v1471_v48 }
 0x389   :  { %v1475_v41 = vrot.slane %v1474_v40, 4 }
 0x38a   :  { %v7744_v33 = vpop.xlane.xlu2 %2709 }
 0x38b   :  { %vm2711_vm13 = vcmp.eq.f32.partialorder %v2708_v35, %v7744_v33  ;;  %vm1476_vm12 = vcmp.gt.s32.totalorder %v1474_v40, %v1475_v41  ;;  %v2716_v12 = vcvt.f32.s32 %v7744_v33 }
 0x38c   :  { %v2712_v26 = vsel %vm2711_vm13, %v2707_v57, -inf  ;;  %v1477_v7 = vsel %vm1476_vm12, %v1474_v40, %v1475_v41  ;;  %vm2740_vm13 = vcmask 0  }
 0x38d   :  { %2713 = vmax.xlane.f32.xlu2 %v2712_v26  ;;  %v1478_v46 = vrot.slane %v1477_v7, 2  ;;  %v2717_v14 = vshll.u32 %v2716_v12, 16 }
 0x38f   :  { %vm1479_vm1 = vcmp.gt.s32.totalorder %v1477_v7, %v1478_v46 }
 0x390   :  { %v1480_v10 = vsel %vm1479_vm1, %v1477_v7, %v1478_v46 }
 0x391   :  { %v1481_v19 = vrot.slane %v1480_v10, 1 }
 0x392   :  { %s3020_s3 = spop %3019 }
 0x393   :  { %vm1482_vm9 = vcmp.gt.s32.totalorder %v1480_v10, %v1481_v19  ;;  %v1078_v31 = vstv %s3020_s3 }
 0x394   :  { %v1483_v13 = vsel %vm1482_vm9, %v1480_v10, %v1481_v19  ;;  %v2730_v8 = vmul.u32 32, %v1078_v31 }
 0x395   :  { %3021 = vpush %v1483_v13 }
 0x3c6   :  { %s3022_s4 = spop %3021 }
 0x3c7   :  { %v1485_v3 = vstv %s3022_s4 }
 0x3c8   :  { %v2731_v25 = vmul.u32 16, %v1485_v3 }
 0x3ca   :  { %v2732_v55 = vadd.s32 %v2731_v25, %v2730_v8 }
 0x3d2   :  { %v1749_v16 = vpop.xlane.xlu2 %1748 }
 0x3d3   :  { %v1750_v56 = vcvt.f32.s32 %v1749_v16 }
 0x3d5   :  { %v1753_v50 = vadd.s32 %v1752_v15, %v1750_v56 }
 0x3d7   :  { %v1754_v61 = vrot.slane %v1753_v50, 4 }
 0x3d9   :  { %vm1755_vm4 = vcmp.gt.s32.totalorder %v1753_v50, %v1754_v61 }
 0x3da   :  { %v1756_v54 = vsel %vm1755_vm4, %v1753_v50, %v1754_v61 }
 0x3db   :  { %v1757_v53 = vrot.slane %v1756_v54, 2 }
 0x3dd   :  { %vm1758_vm6 = vcmp.gt.s32.totalorder %v1756_v54, %v1757_v53 }
 0x3de   :  { %v1759_v34 = vsel %vm1758_vm6, %v1756_v54, %v1757_v53 }
 0x3df   :  { %v1760_v30 = vrot.slane %v1759_v34, 1 }
 0x3e1   :  { %vm1761_vm7 = vcmp.gt.s32.totalorder %v1759_v34, %v1760_v30 }
 0x3e2   :  { %v2371_v37 = vpop.xlane.xlu1 %2370  ;;  %v1762_v2 = vsel %vm1761_vm7, %v1759_v34, %v1760_v30 }
 0x3e3   :  { %v2372_v1 = vcvt.f32.s32 %v2371_v37  ;;  %3023 = vpush %v1762_v2 }
 0x3e5   :  { %v2375_v44 = vadd.s32 %v2374_v49, %v2372_v1 }
 0x3e7   :  { %v2376_v36 = vrot.slane %v2375_v44, 4 }
 0x3e9   :  { %vm2377_vm2 = vcmp.gt.s32.totalorder %v2375_v44, %v2376_v36 }
 0x3ea   :  { %v2378_v27 = vsel %vm2377_vm2, %v2375_v44, %v2376_v36 }
 0x3eb   :  { %v2379_v22 = vrot.slane %v2378_v27, 2 }
 0x3ed   :  { %vm2380_vm14 = vcmp.gt.s32.totalorder %v2378_v27, %v2379_v22 }
 0x3ee   :  { %v2092_v9 = vpop.xlane.xlu0 %2091  ;;  %v2381_v35 = vsel %vm2380_vm14, %v2378_v27, %v2379_v22 }
 0x3ef   :  { %v2093_v32 = vcvt.f32.s32 %v2092_v9  ;;  %v2382_v62 = vrot.slane %v2381_v35, 1 }
 0x3f1   :  { %v2096_v5 = vadd.s32 %v2095_v29, %v2093_v32  ;;  %vm2383_vm3 = vcmp.gt.s32.totalorder %v2381_v35, %v2382_v62 }
 0x3f2   :  { %v2384_v6 = vsel %vm2383_vm3, %v2381_v35, %v2382_v62 }
 0x3f3   :  { %v2097_v18 = vrot.slane %v2096_v5, 4 }
 0x3f5   :  { %vm2098_vm10 = vcmp.gt.s32.totalorder %v2096_v5, %v2097_v18 }
 0x3f6   :  { %v2099_v63 = vsel %vm2098_vm10, %v2096_v5, %v2097_v18 }
 0x3f7   :  { %v2100_v58 = vrot.slane %v2099_v63, 2 }
 0x3f9   :  { %vm2101_vm11 = vcmp.gt.s32.totalorder %v2099_v63, %v2100_v58 }
 0x3fa   :  { %v2102_v59 = vsel %vm2101_vm11, %v2099_v63, %v2100_v58 }
 0x3fb   :  { %v2103_v11 = vrot.slane %v2102_v59, 1 }
 0x3fd   :  { %vm2104_vm15 = vcmp.gt.s32.totalorder %v2102_v59, %v2103_v11 }
 0x3fe   :  { %v2105_v0 = vsel %vm2104_vm15, %v2102_v59, %v2103_v11 }
 0x3ff   :  { %3025 = vpush %v2105_v0 }
 0x400   :  { %v2714_v17 = vpop.xlane.xlu2 %2713  ;;  %3027 = vpush %v2384_v6 }
 0x401   :  { %v2715_v45 = vcvt.f32.s32 %v2714_v17 }
 0x403   :  { %v2718_v60 = vadd.s32 %v2717_v14, %v2715_v45 }
 0x405   :  { %v2719_v4 = vrot.slane %v2718_v60, 4 }
 0x407   :  { %vm2720_vm5 = vcmp.gt.s32.totalorder %v2718_v60, %v2719_v4 }
 0x408   :  { %v2721_v23 = vsel %vm2720_vm5, %v2718_v60, %v2719_v4 }
 0x409   :  { %v2722_v52 = vrot.slane %v2721_v23, 2 }
 0x40b   :  { %vm2723_vm8 = vcmp.gt.s32.totalorder %v2721_v23, %v2722_v52 }
 0x40c   :  { %v2724_v28 = vsel %vm2723_vm8, %v2721_v23, %v2722_v52 }
 0x40d   :  { %v2725_v47 = vrot.slane %v2724_v28, 1 }
 0x40f   :  { %vm2726_vm0 = vcmp.gt.s32.totalorder %v2724_v28, %v2725_v47 }
 0x410   :  { %v2727_v21 = vsel %vm2726_vm0, %v2724_v28, %v2725_v47 }
 0x411   :  { %3029 = vpush %v2727_v21 }
 0x414   :  { %s3024_s22 = spop %3023 }
 0x415   :  { %v1764_v24 = vstv %s3024_s22 }
 0x416   :  { %v2733_v51 = vmul.u32 8, %v1764_v24 }
 0x418   :  { %v2734_v48 = vadd.s32 %v2733_v51, %v2732_v55 }
 0x430   :  { %s3026_s23 = spop %3025 }
 0x431   :  { %v2107_v38 = vstv %s3026_s23  ;;  %s3028_s24 = spop %3027 }
 0x432   :  { %v2735_v39 = vmul.u32 4, %v2107_v38  ;;  %v2386_v33 = vstv %s3028_s24 }
 0x433   :  { %v2737_v40 = vmul.u32 2, %v2386_v33 }
 0x434   :  { %v2736_v57 = vadd.s32 %v2735_v39, %v2734_v48 }
 0x436   :  { %v2738_v26 = vadd.s32 %v2737_v40, %v2736_v57 }
 0x442   :  { %s3030_s0 = spop %3029 }
 0x443   :  { %v2729_v41 = vstv %s3030_s0 }
 0x444   :  { %v2739_v7 = vadd.s32 %v2738_v26, %v2729_v41 }
 0x446   :  { %2741 = vst.msk [vmem:[#allocation10] sm:$0x1] %vm2740_vm13, %v2739_v7 }
 0x447   :  { %2778 = dma.vmem_to_hbm [thread:$0]  %s2774_s26, 16, %s2776_s29, [#allocation9]  }
 0x448   :  { %3235 = dma.done.wait [#allocation4], 8192  }
 0x449   :  { %3236 = vsyncadd [#allocation4], 4294959104 }
 0x44a   :  { %3237 = dma.done.wait [#allocation9], 8208  }
 0x44b   :  { %3238 = vsyncadd [#allocation9], 4294959088 }
 0x44c   :  { %2791 = vsyncpa [#allocation3], 1 }
 0x44d   :  { %2792 = vsyncpa [#allocation6], 1 }
 0x44e   :  { %2793 = vsyncpa [#allocation4], 1 }
 0x44f   :  { %2794 = vsyncpa [#allocation9], 1 }

</bundles_post_ra>
